<compile_context>
chip_gen: v7x
topology: tpu7x:2x2x1
jax: 0.10.0
libtpu: 0.0.40
codegen_flags: <defaults>
</compile_context>

<pallas_src>
import functools

import jax
import jax.numpy as jnp
from jax.experimental import pallas as pl
from jax.experimental.pallas import tpu as pltpu


# ----------------------------- Pallas kernels ------------------------------ #

def _matmul_bias_relu_kernel(x_ref, w_ref, b_ref, o_ref):
    # conv1 path: (tm, Kpad) bf16 x (Kpad, 64) bf16 -> f32 acc, +bias, ReLU.
    acc = jnp.dot(x_ref[...], w_ref[...], preferred_element_type=jnp.float32)
    o_ref[...] = jnp.maximum(acc + b_ref[...], 0.0).astype(o_ref.dtype)


def _conv3x3_kernel(*refs, relu, has_residual):
    # One batch sample per grid step.  xp_ref holds the zero-padded (halo'd)
    # NHWC activation; the 3x3 conv is 9 shifted (H*W, C)x(C, C) dots
    # accumulated in f32 (no im2col materialization in HBM).
    if has_residual:
        xp_ref, w_ref, b_ref, r_ref, o_ref = refs
    else:
        xp_ref, w_ref, b_ref, o_ref = refs
        r_ref = None
    _, hp, wp, c = xp_ref.shape
    h, w = hp - 2, wp - 2
    cout = o_ref.shape[3]

    x = xp_ref[0]                                    # (h+2, w+2, c) bf16
    acc = jnp.zeros((h * w, cout), jnp.float32)
    for t in range(9):
        di, dj = divmod(t, 3)
        win = x[di:di + h, dj:dj + w, :].reshape(h * w, c)
        acc = acc + jnp.dot(win, w_ref[t], preferred_element_type=jnp.float32)

    y = acc + b_ref[...]                             # folded-BN bias (f32)
    if has_residual:
        y = y + r_ref[0].reshape(h * w, cout).astype(jnp.float32)
    if relu:
        y = jnp.maximum(y, 0.0)
    o_ref[0] = y.reshape(h, w, cout).astype(o_ref.dtype)


def _maxpool3x3_s1_kernel(xp_ref, o_ref):
    # Dense 3x3 / stride-1 max over a padded sample via 9 shifted views.
    _, hp, wp, _ = xp_ref.shape
    h, w = hp - 2, wp - 2
    x = xp_ref[0]
    m = x[0:h, 0:w, :]
    for di in range(3):
        for dj in range(3):
            if di == 0 and dj == 0:
                continue
            m = jnp.maximum(m, x[di:di + h, dj:dj + w, :])
    o_ref[0] = m


# ------------------------------ Pallas wrappers ----------------------------- #

_PARALLEL1 = pltpu.CompilerParams(dimension_semantics=("parallel",))


def _fold_bn(bn):
    gamma, beta, mean, var = bn
    scale = gamma / jnp.sqrt(var + 1e-5)
    bias = beta - mean * scale
    return scale, bias


def _im2col(x_nhwc, kh, kw, stride, pad):
    """Extract conv patches.  Returns ((N*Ho*Wo, kh*kw*Cin), (N, Ho, Wo))."""
    n, h, w, c = x_nhwc.shape
    xp = jnp.pad(x_nhwc, ((0, 0), (pad, pad), (pad, pad), (0, 0)))
    ho = (h + 2 * pad - kh) // stride + 1
    wo = (w + 2 * pad - kw) // stride + 1
    taps = []
    for i in range(kh):
        for j in range(kw):
            taps.append(
                xp[:, i:i + (ho - 1) * stride + 1:stride,
                      j:j + (wo - 1) * stride + 1:stride, :])
    # (N, Ho, Wo, kh*kw, Cin): patch ordering matches w[o, c, i, j] flattening.
    cols = jnp.stack(taps, axis=3).reshape(n * ho * wo, kh * kw * c)
    return cols, (n, ho, wo)


def _conv1_7x7_s2(x_nhwc, w_oihw, bn, tm=256):
    """conv1 7x7/s2/p3 + BN + ReLU as a K-padded, M-tiled matmul kernel.

    tm=256 suits the small demo shapes; use 512-1024 for real image sizes.
    """
    cout, cin, kh, kw = w_oihw.shape
    cols, (n, ho, wo) = _im2col(x_nhwc, kh, kw, stride=2, pad=3)
    k = kh * kw * cin                                  # 147
    kpad = ((k + 127) // 128) * 128                    # 256: unmasked lanes

    scale, bias = _fold_bn(bn)
    w_mat = jnp.transpose(w_oihw, (2, 3, 1, 0)).reshape(k, cout) * scale[None, :]
    w_mat = jnp.pad(w_mat, ((0, kpad - k), (0, 0))).astype(jnp.bfloat16)
    cols = jnp.pad(cols.astype(jnp.bfloat16), ((0, 0), (0, kpad - k)))

    m = cols.shape[0]
    tm = min(tm, m)
    m_pad = ((m + tm - 1) // tm) * tm
    cols = jnp.pad(cols, ((0, m_pad - m), (0, 0)))

    out = pl.pallas_call(
        _matmul_bias_relu_kernel,
        out_shape=jax.ShapeDtypeStruct((m_pad, cout), jnp.bfloat16),
        grid=(m_pad // tm,),
        in_specs=[pl.BlockSpec((tm, kpad), lambda i: (i, 0)),
                  pl.BlockSpec((kpad, cout), lambda i: (0, 0)),
                  pl.BlockSpec((1, cout), lambda i: (0, 0))],
        out_specs=pl.BlockSpec((tm, cout), lambda i: (i, 0)),
        compiler_params=_PARALLEL1,
    )(cols, w_mat, bias.reshape(1, cout).astype(jnp.float32))
    return out[:m].reshape(n, ho, wo, cout)


def _conv3x3_bn(x, w_oihw, bn, relu=True, residual=None):
    """3x3/s1/p1 conv + folded BN (+residual) (+ReLU), one sample per grid step."""
    n, h, w, c = x.shape
    cout = w_oihw.shape[0]
    scale, bias = _fold_bn(bn)
    # fold BN scale into the weights; layout (tap=kh*3+kw, cin, cout).
    w_taps = (jnp.transpose(w_oihw, (2, 3, 1, 0)) * scale).reshape(
        9, c, cout).astype(jnp.bfloat16)
    b = bias.reshape(1, cout).astype(jnp.float32)
    xp = jnp.pad(x, ((0, 0), (1, 1), (1, 1), (0, 0)))   # halo

    kern = functools.partial(_conv3x3_kernel, relu=relu,
                             has_residual=residual is not None)
    in_specs = [pl.BlockSpec((1, h + 2, w + 2, c), lambda i: (i, 0, 0, 0)),
                pl.BlockSpec((9, c, cout), lambda i: (0, 0, 0)),
                pl.BlockSpec((1, cout), lambda i: (0, 0))]
    args = [xp, w_taps, b]
    if residual is not None:
        in_specs.append(pl.BlockSpec((1, h, w, cout), lambda i: (i, 0, 0, 0)))
        args.append(residual)

    return pl.pallas_call(
        kern,
        out_shape=jax.ShapeDtypeStruct((n, h, w, cout), jnp.bfloat16),
        grid=(n,),
        in_specs=in_specs,
        out_specs=pl.BlockSpec((1, h, w, cout), lambda i: (i, 0, 0, 0)),
        compiler_params=_PARALLEL1,
    )(*args)


def _maxpool_3x3_s2_p1(x):
    """3x3/s2/p1 max pool = dense 3x3/s1 max (Pallas) + stride-2 subsample."""
    n, h, w, c = x.shape
    neg = float(jnp.finfo(jnp.bfloat16).min)
    xp = jnp.pad(x, ((0, 0), (1, 1), (1, 1), (0, 0)), constant_values=neg)
    dense = pl.pallas_call(
        _maxpool3x3_s1_kernel,
        out_shape=jax.ShapeDtypeStruct((n, h, w, c), x.dtype),
        grid=(n,),
        in_specs=[pl.BlockSpec((1, h + 2, w + 2, c), lambda i: (i, 0, 0, 0))],
        out_specs=pl.BlockSpec((1, h, w, c), lambda i: (i, 0, 0, 0)),
        compiler_params=_PARALLEL1,
    )(xp)
    # stride-2 subsample of the dense s1 max == 3x3/s2/p1 pooling.
    return dense[:, ::2, ::2, :]


def _basic_block(x, p):
    out = _conv3x3_bn(x, p['conv1_w'], p['bn1'], relu=True)
    out = _conv3x3_bn(out, p['conv2_w'], p['bn2'], relu=True, residual=x)
    return out


def backbone2d_resnet18_layer1(x_nchw, params):
    """Backbone2DResNet('resnet18', 'layer1', ...) forward.  NCHW in / NCHW out."""
    x = jnp.transpose(x_nchw, (0, 2, 3, 1)).astype(jnp.bfloat16)   # -> NHWC bf16
    x = _conv1_7x7_s2(x, params['conv1_w'], params['bn1'])
    x = _maxpool_3x3_s2_p1(x)
    x = _basic_block(x, params['layer1_0'])
    x = _basic_block(x, params['layer1_1'])
    return jnp.transpose(x.astype(jnp.float32), (0, 3, 1, 2))       # -> NCHW f32


# ------------------------------ parameter init ------------------------------ #

def _init_bn(key, c):
    k1, k2 = jax.random.split(key)
    gamma = 1.0 + 0.01 * jax.random.normal(k1, (c,), jnp.float32)
    beta = 0.01 * jax.random.normal(k2, (c,), jnp.float32)
    mean = jnp.zeros((c,), jnp.float32)       # running_mean
    var = jnp.ones((c,), jnp.float32)         # running_var
    return (gamma, beta, mean, var)


def init_params(key):
    ks = jax.random.split(key, 12)
    conv = lambda k, shape: 0.05 * jax.random.normal(k, shape, jnp.float32)
    return {
        'conv1_w': conv(ks[0], (64, 3, 7, 7)),
        'bn1': _init_bn(ks[1], 64),
        'layer1_0': {
            'conv1_w': conv(ks[2], (64, 64, 3, 3)),
            'bn1': _init_bn(ks[3], 64),
            'conv2_w': conv(ks[4], (64, 64, 3, 3)),
            'bn2': _init_bn(ks[5], 64),
        },
        'layer1_1': {
            'conv1_w': conv(ks[6], (64, 64, 3, 3)),
            'bn1': _init_bn(ks[7], 64),
            'conv2_w': conv(ks[8], (64, 64, 3, 3)),
            'bn2': _init_bn(ks[9], 64),
        },
    }


# ----------------------------------- main ----------------------------------- #

if __name__ == "__main__":
    root = jax.random.PRNGKey(0)
    k_x, k_p = jax.random.split(root)

    # NCHW input, as PyTorch would feed a ResNet (3 input channels required).
    x = jax.random.normal(k_x, (2, 3, 32, 32), jnp.float32)
    params = init_params(k_p)

    fwd = jax.jit(backbone2d_resnet18_layer1)
    y = fwd(x, params)
    jax.block_until_ready(y)

    assert y.shape == (2, 64, 8, 8), y.shape   # layer1 output of resnet18
    assert y.dtype == jnp.float32
    print("KERNEL_OK")
</pallas_src>

<mosaic_0001>
module attributes {stable_mosaic.version = 11 : i64} {
  func.func @_matmul_bias_relu_kernel(%arg0: i32, %arg1: memref<256x256xbf16, #tpu.memory_space<vmem>>, %arg2: memref<256x64xbf16, #tpu.memory_space<vmem>>, %arg3: memref<1x64xf32, #tpu.memory_space<vmem>>, %arg4: memref<256x64xbf16, #tpu.memory_space<vmem>>) attributes {dimension_semantics = [#tpu.dimension_semantics<parallel>], iteration_bounds = array<i64: 2>, scalar_prefetch = 0 : i64, scratch_operands = 0 : i64, tpu.core_type = #tpu.core_type<tc>, window_params = [{transform_indices = @transform_0, window_bounds = array<i64: 256, 256>}, {pipeline_mode = #tpu.pipeline_mode<synchronous>, transform_indices = @transform_1, window_bounds = array<i64: 256, 64>}, {pipeline_mode = #tpu.pipeline_mode<synchronous>, transform_indices = @transform_2, window_bounds = array<i64: 1, 64>}, {transform_indices = @transform_3, window_bounds = array<i64: 256, 64>}]} {
    %c0 = arith.constant 0 : index
    %c0_0 = arith.constant 0 : index
    %0 = vector.load %arg1[%c0, %c0_0] : memref<256x256xbf16, #tpu.memory_space<vmem>>, vector<256x256xbf16>
    %c0_1 = arith.constant 0 : index
    %c0_2 = arith.constant 0 : index
    %1 = vector.load %arg2[%c0_1, %c0_2] : memref<256x64xbf16, #tpu.memory_space<vmem>>, vector<256x64xbf16>
    %cst = arith.constant dense<0.000000e+00> : vector<256x64xf32>
    %2 = tpu.matmul %0, %1, %cst {dimension_numbers = #tpu.dot_dimension_numbers<[1], [0], [0], [1], [0, 0, 1, 1], [], []>} : vector<256x256xbf16>, vector<256x64xbf16>, vector<256x64xf32> -> vector<256x64xf32>
    %c0_3 = arith.constant 0 : index
    %c0_4 = arith.constant 0 : index
    %3 = vector.load %arg3[%c0_3, %c0_4] : memref<1x64xf32, #tpu.memory_space<vmem>>, vector<1x64xf32>
    %4 = vector.broadcast %3 : vector<1x64xf32> to vector<256x64xf32>
    %5 = arith.addf %2, %4 : vector<256x64xf32>
    %cst_5 = arith.constant 0.000000e+00 : f32
    %6 = vector.broadcast %cst_5 : f32 to vector<256x64xf32>
    %7 = arith.maximumf %5, %6 : vector<256x64xf32>
    %8 = arith.truncf %7 : vector<256x64xf32> to vector<256x64xbf16>
    %c0_6 = arith.constant 0 : index
    %c0_7 = arith.constant 0 : index
    %9 = vector.load %arg4[%c0_6, %c0_7] : memref<256x64xbf16, #tpu.memory_space<vmem>>, vector<256x64xbf16>
    tpu.vector_store %arg4[%c0_6, %c0_7], %8 {strides = array<i32>} : memref<256x64xbf16, #tpu.memory_space<vmem>>, vector<256x64xbf16>,
    return
  }
  func.func @transform_0(%arg0: i32) -> (i32, i32) {
    %c0_i32 = arith.constant 0 : i32
    %c0_i32_0 = arith.constant 0 : i32
    return %arg0, %c0_i32 : i32, i32
  }
  func.func @transform_1(%arg0: i32) -> (i32, i32) {
    %c0_i32 = arith.constant 0 : i32
    %c0_i32_0 = arith.constant 0 : i32
    %c0_i32_1 = arith.constant 0 : i32
    return %c0_i32, %c0_i32_0 : i32, i32
  }
  func.func @transform_2(%arg0: i32) -> (i32, i32) {
    %c0_i32 = arith.constant 0 : i32
    %c0_i32_0 = arith.constant 0 : i32
    %c0_i32_1 = arith.constant 0 : i32
    return %c0_i32, %c0_i32_0 : i32, i32
  }
  func.func @transform_3(%arg0: i32) -> (i32, i32) {
    %c0_i32 = arith.constant 0 : i32
    %c0_i32_0 = arith.constant 0 : i32
    return %arg0, %c0_i32 : i32, i32
  }
}

module attributes {stable_mosaic.version = 11 : i64} {
  func.func @_maxpool3x3_s1_kernel(%arg0: i32, %arg1: memref<1x18x18x64xbf16, #tpu.memory_space<vmem>>, %arg2: memref<1x16x16x64xbf16, #tpu.memory_space<vmem>>) attributes {dimension_semantics = [#tpu.dimension_semantics<parallel>], iteration_bounds = array<i64: 2>, scalar_prefetch = 0 : i64, scratch_operands = 0 : i64, tpu.core_type = #tpu.core_type<tc>, window_params = [{transform_indices = @transform_0, window_bounds = array<i64: 1, 18, 18, 64>}, {transform_indices = @transform_1, window_bounds = array<i64: 1, 16, 16, 64>}]} {
    %c0 = arith.constant 0 : index
    %c0_0 = arith.constant 0 : index
    %c0_1 = arith.constant 0 : index
    %c0_2 = arith.constant 0 : index
    %0 = vector.load %arg1[%c0, %c0_0, %c0_1, %c0_2] : memref<1x18x18x64xbf16, #tpu.memory_space<vmem>>, vector<1x18x18x64xbf16>
    %1 = vector.shape_cast %0 : vector<1x18x18x64xbf16> to vector<18x18x64xbf16>
    %2 = vector.extract_strided_slice %1 {offsets = [0, 0, 0], sizes = [16, 16, 64], strides = [1, 1, 1]} : vector<18x18x64xbf16> to vector<16x16x64xbf16>
    %3 = vector.extract_strided_slice %1 {offsets = [0, 1, 0], sizes = [16, 16, 64], strides = [1, 1, 1]} : vector<18x18x64xbf16> to vector<16x16x64xbf16>
    %4 = arith.maximumf %2, %3 : vector<16x16x64xbf16>
    %5 = vector.extract_strided_slice %1 {offsets = [0, 2, 0], sizes = [16, 16, 64], strides = [1, 1, 1]} : vector<18x18x64xbf16> to vector<16x16x64xbf16>
    %6 = arith.maximumf %4, %5 : vector<16x16x64xbf16>
    %7 = vector.extract_strided_slice %1 {offsets = [1, 0, 0], sizes = [16, 16, 64], strides = [1, 1, 1]} : vector<18x18x64xbf16> to vector<16x16x64xbf16>
    %8 = arith.maximumf %6, %7 : vector<16x16x64xbf16>
    %9 = vector.extract_strided_slice %1 {offsets = [1, 1, 0], sizes = [16, 16, 64], strides = [1, 1, 1]} : vector<18x18x64xbf16> to vector<16x16x64xbf16>
    %10 = arith.maximumf %8, %9 : vector<16x16x64xbf16>
    %11 = vector.extract_strided_slice %1 {offsets = [1, 2, 0], sizes = [16, 16, 64], strides = [1, 1, 1]} : vector<18x18x64xbf16> to vector<16x16x64xbf16>
    %12 = arith.maximumf %10, %11 : vector<16x16x64xbf16>
    %13 = vector.extract_strided_slice %1 {offsets = [2, 0, 0], sizes = [16, 16, 64], strides = [1, 1, 1]} : vector<18x18x64xbf16> to vector<16x16x64xbf16>
    %14 = arith.maximumf %12, %13 : vector<16x16x64xbf16>
    %15 = vector.extract_strided_slice %1 {offsets = [2, 1, 0], sizes = [16, 16, 64], strides = [1, 1, 1]} : vector<18x18x64xbf16> to vector<16x16x64xbf16>
    %16 = arith.maximumf %14, %15 : vector<16x16x64xbf16>
    %17 = vector.extract_strided_slice %1 {offsets = [2, 2, 0], sizes = [16, 16, 64], strides = [1, 1, 1]} : vector<18x18x64xbf16> to vector<16x16x64xbf16>
    %18 = arith.maximumf %16, %17 : vector<16x16x64xbf16>
    %c0_3 = arith.constant 0 : index
    %c0_4 = arith.constant 0 : index
    %c0_5 = arith.constant 0 : index
    %c0_6 = arith.constant 0 : index
    %19 = vector.load %arg2[%c0_3, %c0_4, %c0_5, %c0_6] : memref<1x16x16x64xbf16, #tpu.memory_space<vmem>>, vector<1x16x16x64xbf16>
    %20 = vector.shape_cast %19 : vector<1x16x16x64xbf16> to vector<16x16x64xbf16>
    %21 = vector.shape_cast %18 : vector<16x16x64xbf16> to vector<1x16x16x64xbf16>
    tpu.vector_store %arg2[%c0_3, %c0_4, %c0_5, %c0_6], %21 {strides = array<i32>} : memref<1x16x16x64xbf16, #tpu.memory_space<vmem>>, vector<1x16x16x64xbf16>,
    return
  }
  func.func @transform_0(%arg0: i32) -> (i32, i32, i32, i32) {
    %c0_i32 = arith.constant 0 : i32
    %c0_i32_0 = arith.constant 0 : i32
    %c0_i32_1 = arith.constant 0 : i32
    %c0_i32_2 = arith.constant 0 : i32
    return %arg0, %c0_i32, %c0_i32_0, %c0_i32_1 : i32, i32, i32, i32
  }
  func.func @transform_1(%arg0: i32) -> (i32, i32, i32, i32) {
    %c0_i32 = arith.constant 0 : i32
    %c0_i32_0 = arith.constant 0 : i32
    %c0_i32_1 = arith.constant 0 : i32
    %c0_i32_2 = arith.constant 0 : i32
    return %arg0, %c0_i32, %c0_i32_0, %c0_i32_1 : i32, i32, i32, i32
  }
}

module attributes {stable_mosaic.version = 11 : i64} {
  func.func @_conv3x3_kernel(%arg0: i32, %arg1: memref<1x10x10x64xbf16, #tpu.memory_space<vmem>>, %arg2: memref<9x64x64xbf16, #tpu.memory_space<vmem>>, %arg3: memref<1x64xf32, #tpu.memory_space<vmem>>, %arg4: memref<1x8x8x64xbf16, #tpu.memory_space<vmem>>) attributes {dimension_semantics = [#tpu.dimension_semantics<parallel>], iteration_bounds = array<i64: 2>, scalar_prefetch = 0 : i64, scratch_operands = 0 : i64, tpu.core_type = #tpu.core_type<tc>, window_params = [{transform_indices = @transform_0, window_bounds = array<i64: 1, 10, 10, 64>}, {pipeline_mode = #tpu.pipeline_mode<synchronous>, transform_indices = @transform_1, window_bounds = array<i64: 9, 64, 64>}, {pipeline_mode = #tpu.pipeline_mode<synchronous>, transform_indices = @transform_2, window_bounds = array<i64: 1, 64>}, {transform_indices = @transform_3, window_bounds = array<i64: 1, 8, 8, 64>}]} {
    %c0 = arith.constant 0 : index
    %c0_0 = arith.constant 0 : index
    %c0_1 = arith.constant 0 : index
    %c0_2 = arith.constant 0 : index
    %0 = vector.load %arg1[%c0, %c0_0, %c0_1, %c0_2] : memref<1x10x10x64xbf16, #tpu.memory_space<vmem>>, vector<1x10x10x64xbf16>
    %1 = vector.shape_cast %0 : vector<1x10x10x64xbf16> to vector<10x10x64xbf16>
    %cst = arith.constant 0.000000e+00 : f32
    %2 = vector.broadcast %cst : f32 to vector<64x64xf32>
    %3 = vector.extract_strided_slice %1 {offsets = [0, 0, 0], sizes = [8, 8, 64], strides = [1, 1, 1]} : vector<10x10x64xbf16> to vector<8x8x64xbf16>
    %4 = vector.shape_cast %3 : vector<8x8x64xbf16> to vector<64x64xbf16>
    %c0_3 = arith.constant 0 : index
    %c0_4 = arith.constant 0 : index
    %c0_5 = arith.constant 0 : index
    %5 = vector.load %arg2[%c0_3, %c0_4, %c0_5] : memref<9x64x64xbf16, #tpu.memory_space<vmem>>, vector<1x64x64xbf16>
    %6 = vector.shape_cast %5 : vector<1x64x64xbf16> to vector<64x64xbf16>
    %cst_6 = arith.constant dense<0.000000e+00> : vector<64x64xf32>
    %7 = tpu.matmul %4, %6, %cst_6 {dimension_numbers = #tpu.dot_dimension_numbers<[1], [0], [0], [1], [0, 0, 1, 1], [], []>} : vector<64x64xbf16>, vector<64x64xbf16>, vector<64x64xf32> -> vector<64x64xf32>
    %8 = arith.addf %2, %7 : vector<64x64xf32>
    %9 = vector.extract_strided_slice %1 {offsets = [0, 1, 0], sizes = [8, 8, 64], strides = [1, 1, 1]} : vector<10x10x64xbf16> to vector<8x8x64xbf16>
    %10 = vector.shape_cast %9 : vector<8x8x64xbf16> to vector<64x64xbf16>
    %c1 = arith.constant 1 : index
    %c0_7 = arith.constant 0 : index
    %c0_8 = arith.constant 0 : index
    %11 = vector.load %arg2[%c1, %c0_7, %c0_8] : memref<9x64x64xbf16, #tpu.memory_space<vmem>>, vector<1x64x64xbf16>
    %12 = vector.shape_cast %11 : vector<1x64x64xbf16> to vector<64x64xbf16>
    %cst_9 = arith.constant dense<0.000000e+00> : vector<64x64xf32>
    %13 = tpu.matmul %10, %12, %cst_9 {dimension_numbers = #tpu.dot_dimension_numbers<[1], [0], [0], [1], [0, 0, 1, 1], [], []>} : vector<64x64xbf16>, vector<64x64xbf16>, vector<64x64xf32> -> vector<64x64xf32>
    %14 = arith.addf %8, %13 : vector<64x64xf32>
    %15 = vector.extract_strided_slice %1 {offsets = [0, 2, 0], sizes = [8, 8, 64], strides = [1, 1, 1]} : vector<10x10x64xbf16> to vector<8x8x64xbf16>
    %16 = vector.shape_cast %15 : vector<8x8x64xbf16> to vector<64x64xbf16>
    %c2 = arith.constant 2 : index
    %c0_10 = arith.constant 0 : index
    %c0_11 = arith.constant 0 : index
    %17 = vector.load %arg2[%c2, %c0_10, %c0_11] : memref<9x64x64xbf16, #tpu.memory_space<vmem>>, vector<1x64x64xbf16>
    %18 = vector.shape_cast %17 : vector<1x64x64xbf16> to vector<64x64xbf16>
    %cst_12 = arith.constant dense<0.000000e+00> : vector<64x64xf32>
    %19 = tpu.matmul %16, %18, %cst_12 {dimension_numbers = #tpu.dot_dimension_numbers<[1], [0], [0], [1], [0, 0, 1, 1], [], []>} : vector<64x64xbf16>, vector<64x64xbf16>, vector<64x64xf32> -> vector<64x64xf32>
    %20 = arith.addf %14, %19 : vector<64x64xf32>
    %21 = vector.extract_strided_slice %1 {offsets = [1, 0, 0], sizes = [8, 8, 64], strides = [1, 1, 1]} : vector<10x10x64xbf16> to vector<8x8x64xbf16>
    %22 = vector.shape_cast %21 : vector<8x8x64xbf16> to vector<64x64xbf16>
    %c3 = arith.constant 3 : index
    %c0_13 = arith.constant 0 : index
    %c0_14 = arith.constant 0 : index
    %23 = vector.load %arg2[%c3, %c0_13, %c0_14] : memref<9x64x64xbf16, #tpu.memory_space<vmem>>, vector<1x64x64xbf16>
    %24 = vector.shape_cast %23 : vector<1x64x64xbf16> to vector<64x64xbf16>
    %cst_15 = arith.constant dense<0.000000e+00> : vector<64x64xf32>
    %25 = tpu.matmul %22, %24, %cst_15 {dimension_numbers = #tpu.dot_dimension_numbers<[1], [0], [0], [1], [0, 0, 1, 1], [], []>} : vector<64x64xbf16>, vector<64x64xbf16>, vector<64x64xf32> -> vector<64x64xf32>
    %26 = arith.addf %20, %25 : vector<64x64xf32>
    %27 = vector.extract_strided_slice %1 {offsets = [1, 1, 0], sizes = [8, 8, 64], strides = [1, 1, 1]} : vector<10x10x64xbf16> to vector<8x8x64xbf16>
    %28 = vector.shape_cast %27 : vector<8x8x64xbf16> to vector<64x64xbf16>
    %c4 = arith.constant 4 : index
    %c0_16 = arith.constant 0 : index
    %c0_17 = arith.constant 0 : index
    %29 = vector.load %arg2[%c4, %c0_16, %c0_17] : memref<9x64x64xbf16, #tpu.memory_space<vmem>>, vector<1x64x64xbf16>
    %30 = vector.shape_cast %29 : vector<1x64x64xbf16> to vector<64x64xbf16>
    %cst_18 = arith.constant dense<0.000000e+00> : vector<64x64xf32>
    %31 = tpu.matmul %28, %30, %cst_18 {dimension_numbers = #tpu.dot_dimension_numbers<[1], [0], [0], [1], [0, 0, 1, 1], [], []>} : vector<64x64xbf16>, vector<64x64xbf16>, vector<64x64xf32> -> vector<64x64xf32>
    %32 = arith.addf %26, %31 : vector<64x64xf32>
    %33 = vector.extract_strided_slice %1 {offsets = [1, 2, 0], sizes = [8, 8, 64], strides = [1, 1, 1]} : vector<10x10x64xbf16> to vector<8x8x64xbf16>
    %34 = vector.shape_cast %33 : vector<8x8x64xbf16> to vector<64x64xbf16>
    %c5 = arith.constant 5 : index
    %c0_19 = arith.constant 0 : index
    %c0_20 = arith.constant 0 : index
    %35 = vector.load %arg2[%c5, %c0_19, %c0_20] : memref<9x64x64xbf16, #tpu.memory_space<vmem>>, vector<1x64x64xbf16>
    %36 = vector.shape_cast %35 : vector<1x64x64xbf16> to vector<64x64xbf16>
    %cst_21 = arith.constant dense<0.000000e+00> : vector<64x64xf32>
    %37 = tpu.matmul %34, %36, %cst_21 {dimension_numbers = #tpu.dot_dimension_numbers<[1], [0], [0], [1], [0, 0, 1, 1], [], []>} : vector<64x64xbf16>, vector<64x64xbf16>, vector<64x64xf32> -> vector<64x64xf32>
    %38 = arith.addf %32, %37 : vector<64x64xf32>
    %39 = vector.extract_strided_slice %1 {offsets = [2, 0, 0], sizes = [8, 8, 64], strides = [1, 1, 1]} : vector<10x10x64xbf16> to vector<8x8x64xbf16>
    %40 = vector.shape_cast %39 : vector<8x8x64xbf16> to vector<64x64xbf16>
    %c6 = arith.constant 6 : index
    %c0_22 = arith.constant 0 : index
    %c0_23 = arith.constant 0 : index
    %41 = vector.load %arg2[%c6, %c0_22, %c0_23] : memref<9x64x64xbf16, #tpu.memory_space<vmem>>, vector<1x64x64xbf16>
    %42 = vector.shape_cast %41 : vector<1x64x64xbf16> to vector<64x64xbf16>
    %cst_24 = arith.constant dense<0.000000e+00> : vector<64x64xf32>
    %43 = tpu.matmul %40, %42, %cst_24 {dimension_numbers = #tpu.dot_dimension_numbers<[1], [0], [0], [1], [0, 0, 1, 1], [], []>} : vector<64x64xbf16>, vector<64x64xbf16>, vector<64x64xf32> -> vector<64x64xf32>
    %44 = arith.addf %38, %43 : vector<64x64xf32>
    %45 = vector.extract_strided_slice %1 {offsets = [2, 1, 0], sizes = [8, 8, 64], strides = [1, 1, 1]} : vector<10x10x64xbf16> to vector<8x8x64xbf16>
    %46 = vector.shape_cast %45 : vector<8x8x64xbf16> to vector<64x64xbf16>
    %c7 = arith.constant 7 : index
    %c0_25 = arith.constant 0 : index
    %c0_26 = arith.constant 0 : index
    %47 = vector.load %arg2[%c7, %c0_25, %c0_26] : memref<9x64x64xbf16, #tpu.memory_space<vmem>>, vector<1x64x64xbf16>
    %48 = vector.shape_cast %47 : vector<1x64x64xbf16> to vector<64x64xbf16>
    %cst_27 = arith.constant dense<0.000000e+00> : vector<64x64xf32>
    %49 = tpu.matmul %46, %48, %cst_27 {dimension_numbers = #tpu.dot_dimension_numbers<[1], [0], [0], [1], [0, 0, 1, 1], [], []>} : vector<64x64xbf16>, vector<64x64xbf16>, vector<64x64xf32> -> vector<64x64xf32>
    %50 = arith.addf %44, %49 : vector<64x64xf32>
    %51 = vector.extract_strided_slice %1 {offsets = [2, 2, 0], sizes = [8, 8, 64], strides = [1, 1, 1]} : vector<10x10x64xbf16> to vector<8x8x64xbf16>
    %52 = vector.shape_cast %51 : vector<8x8x64xbf16> to vector<64x64xbf16>
    %c8 = arith.constant 8 : index
    %c0_28 = arith.constant 0 : index
    %c0_29 = arith.constant 0 : index
    %53 = vector.load %arg2[%c8, %c0_28, %c0_29] : memref<9x64x64xbf16, #tpu.memory_space<vmem>>, vector<1x64x64xbf16>
    %54 = vector.shape_cast %53 : vector<1x64x64xbf16> to vector<64x64xbf16>
    %cst_30 = arith.constant dense<0.000000e+00> : vector<64x64xf32>
    %55 = tpu.matmul %52, %54, %cst_30 {dimension_numbers = #tpu.dot_dimension_numbers<[1], [0], [0], [1], [0, 0, 1, 1], [], []>} : vector<64x64xbf16>, vector<64x64xbf16>, vector<64x64xf32> -> vector<64x64xf32>
    %56 = arith.addf %50, %55 : vector<64x64xf32>
    %c0_31 = arith.constant 0 : index
    %c0_32 = arith.constant 0 : index
    %57 = vector.load %arg3[%c0_31, %c0_32] : memref<1x64xf32, #tpu.memory_space<vmem>>, vector<1x64xf32>
    %58 = vector.broadcast %57 : vector<1x64xf32> to vector<64x64xf32>
    %59 = arith.addf %56, %58 : vector<64x64xf32>
    %cst_33 = arith.constant 0.000000e+00 : f32
    %60 = vector.broadcast %cst_33 : f32 to vector<64x64xf32>
    %61 = arith.maximumf %59, %60 : vector<64x64xf32>
    %62 = vector.shape_cast %61 : vector<64x64xf32> to vector<8x8x64xf32>
    %63 = arith.truncf %62 : vector<8x8x64xf32> to vector<8x8x64xbf16>
    %c0_34 = arith.constant 0 : index
    %c0_35 = arith.constant 0 : index
    %c0_36 = arith.constant 0 : index
    %c0_37 = arith.constant 0 : index
    %64 = vector.load %arg4[%c0_34, %c0_35, %c0_36, %c0_37] : memref<1x8x8x64xbf16, #tpu.memory_space<vmem>>, vector<1x8x8x64xbf16>
    %65 = vector.shape_cast %64 : vector<1x8x8x64xbf16> to vector<8x8x64xbf16>
    %66 = vector.shape_cast %63 : vector<8x8x64xbf16> to vector<1x8x8x64xbf16>
    tpu.vector_store %arg4[%c0_34, %c0_35, %c0_36, %c0_37], %66 {strides = array<i32>} : memref<1x8x8x64xbf16, #tpu.memory_space<vmem>>, vector<1x8x8x64xbf16>,
    return
  }
  func.func @transform_0(%arg0: i32) -> (i32, i32, i32, i32) {
    %c0_i32 = arith.constant 0 : i32
    %c0_i32_0 = arith.constant 0 : i32
    %c0_i32_1 = arith.constant 0 : i32
    %c0_i32_2 = arith.constant 0 : i32
    return %arg0, %c0_i32, %c0_i32_0, %c0_i32_1 : i32, i32, i32, i32
  }
  func.func @transform_1(%arg0: i32) -> (i32, i32, i32) {
    %c0_i32 = arith.constant 0 : i32
    %c0_i32_0 = arith.constant 0 : i32
    %c0_i32_1 = arith.constant 0 : i32
    %c0_i32_2 = arith.constant 0 : i32
    return %c0_i32, %c0_i32_0, %c0_i32_1 : i32, i32, i32
  }
  func.func @transform_2(%arg0: i32) -> (i32, i32) {
    %c0_i32 = arith.constant 0 : i32
    %c0_i32_0 = arith.constant 0 : i32
    %c0_i32_1 = arith.constant 0 : i32
    return %c0_i32, %c0_i32_0 : i32, i32
  }
  func.func @transform_3(%arg0: i32) -> (i32, i32, i32, i32) {
    %c0_i32 = arith.constant 0 : i32
    %c0_i32_0 = arith.constant 0 : i32
    %c0_i32_1 = arith.constant 0 : i32
    %c0_i32_2 = arith.constant 0 : i32
    return %arg0, %c0_i32, %c0_i32_0, %c0_i32_1 : i32, i32, i32, i32
  }
}

module attributes {stable_mosaic.version = 11 : i64} {
  func.func @_conv3x3_kernel(%arg0: i32, %arg1: memref<1x10x10x64xbf16, #tpu.memory_space<vmem>>, %arg2: memref<9x64x64xbf16, #tpu.memory_space<vmem>>, %arg3: memref<1x64xf32, #tpu.memory_space<vmem>>, %arg4: memref<1x8x8x64xbf16, #tpu.memory_space<vmem>>, %arg5: memref<1x8x8x64xbf16, #tpu.memory_space<vmem>>) attributes {dimension_semantics = [#tpu.dimension_semantics<parallel>], iteration_bounds = array<i64: 2>, scalar_prefetch = 0 : i64, scratch_operands = 0 : i64, tpu.core_type = #tpu.core_type<tc>, window_params = [{transform_indices = @transform_0, window_bounds = array<i64: 1, 10, 10, 64>}, {pipeline_mode = #tpu.pipeline_mode<synchronous>, transform_indices = @transform_1, window_bounds = array<i64: 9, 64, 64>}, {pipeline_mode = #tpu.pipeline_mode<synchronous>, transform_indices = @transform_2, window_bounds = array<i64: 1, 64>}, {transform_indices = @transform_3, window_bounds = array<i64: 1, 8, 8, 64>}, {transform_indices = @transform_4, window_bounds = array<i64: 1, 8, 8, 64>}]} {
    %c0 = arith.constant 0 : index
    %c0_0 = arith.constant 0 : index
    %c0_1 = arith.constant 0 : index
    %c0_2 = arith.constant 0 : index
    %0 = vector.load %arg1[%c0, %c0_0, %c0_1, %c0_2] : memref<1x10x10x64xbf16, #tpu.memory_space<vmem>>, vector<1x10x10x64xbf16>
    %1 = vector.shape_cast %0 : vector<1x10x10x64xbf16> to vector<10x10x64xbf16>
    %cst = arith.constant 0.000000e+00 : f32
    %2 = vector.broadcast %cst : f32 to vector<64x64xf32>
    %3 = vector.extract_strided_slice %1 {offsets = [0, 0, 0], sizes = [8, 8, 64], strides = [1, 1, 1]} : vector<10x10x64xbf16> to vector<8x8x64xbf16>
    %4 = vector.shape_cast %3 : vector<8x8x64xbf16> to vector<64x64xbf16>
    %c0_3 = arith.constant 0 : index
    %c0_4 = arith.constant 0 : index
    %c0_5 = arith.constant 0 : index
    %5 = vector.load %arg2[%c0_3, %c0_4, %c0_5] : memref<9x64x64xbf16, #tpu.memory_space<vmem>>, vector<1x64x64xbf16>
    %6 = vector.shape_cast %5 : vector<1x64x64xbf16> to vector<64x64xbf16>
    %cst_6 = arith.constant dense<0.000000e+00> : vector<64x64xf32>
    %7 = tpu.matmul %4, %6, %cst_6 {dimension_numbers = #tpu.dot_dimension_numbers<[1], [0], [0], [1], [0, 0, 1, 1], [], []>} : vector<64x64xbf16>, vector<64x64xbf16>, vector<64x64xf32> -> vector<64x64xf32>
    %8 = arith.addf %2, %7 : vector<64x64xf32>
    %9 = vector.extract_strided_slice %1 {offsets = [0, 1, 0], sizes = [8, 8, 64], strides = [1, 1, 1]} : vector<10x10x64xbf16> to vector<8x8x64xbf16>
    %10 = vector.shape_cast %9 : vector<8x8x64xbf16> to vector<64x64xbf16>
    %c1 = arith.constant 1 : index
    %c0_7 = arith.constant 0 : index
    %c0_8 = arith.constant 0 : index
    %11 = vector.load %arg2[%c1, %c0_7, %c0_8] : memref<9x64x64xbf16, #tpu.memory_space<vmem>>, vector<1x64x64xbf16>
    %12 = vector.shape_cast %11 : vector<1x64x64xbf16> to vector<64x64xbf16>
    %cst_9 = arith.constant dense<0.000000e+00> : vector<64x64xf32>
    %13 = tpu.matmul %10, %12, %cst_9 {dimension_numbers = #tpu.dot_dimension_numbers<[1], [0], [0], [1], [0, 0, 1, 1], [], []>} : vector<64x64xbf16>, vector<64x64xbf16>, vector<64x64xf32> -> vector<64x64xf32>
    %14 = arith.addf %8, %13 : vector<64x64xf32>
    %15 = vector.extract_strided_slice %1 {offsets = [0, 2, 0], sizes = [8, 8, 64], strides = [1, 1, 1]} : vector<10x10x64xbf16> to vector<8x8x64xbf16>
    %16 = vector.shape_cast %15 : vector<8x8x64xbf16> to vector<64x64xbf16>
    %c2 = arith.constant 2 : index
    %c0_10 = arith.constant 0 : index
    %c0_11 = arith.constant 0 : index
    %17 = vector.load %arg2[%c2, %c0_10, %c0_11] : memref<9x64x64xbf16, #tpu.memory_space<vmem>>, vector<1x64x64xbf16>
    %18 = vector.shape_cast %17 : vector<1x64x64xbf16> to vector<64x64xbf16>
    %cst_12 = arith.constant dense<0.000000e+00> : vector<64x64xf32>
    %19 = tpu.matmul %16, %18, %cst_12 {dimension_numbers = #tpu.dot_dimension_numbers<[1], [0], [0], [1], [0, 0, 1, 1], [], []>} : vector<64x64xbf16>, vector<64x64xbf16>, vector<64x64xf32> -> vector<64x64xf32>
    %20 = arith.addf %14, %19 : vector<64x64xf32>
    %21 = vector.extract_strided_slice %1 {offsets = [1, 0, 0], sizes = [8, 8, 64], strides = [1, 1, 1]} : vector<10x10x64xbf16> to vector<8x8x64xbf16>
    %22 = vector.shape_cast %21 : vector<8x8x64xbf16> to vector<64x64xbf16>
    %c3 = arith.constant 3 : index
    %c0_13 = arith.constant 0 : index
    %c0_14 = arith.constant 0 : index
    %23 = vector.load %arg2[%c3, %c0_13, %c0_14] : memref<9x64x64xbf16, #tpu.memory_space<vmem>>, vector<1x64x64xbf16>
    %24 = vector.shape_cast %23 : vector<1x64x64xbf16> to vector<64x64xbf16>
    %cst_15 = arith.constant dense<0.000000e+00> : vector<64x64xf32>
    %25 = tpu.matmul %22, %24, %cst_15 {dimension_numbers = #tpu.dot_dimension_numbers<[1], [0], [0], [1], [0, 0, 1, 1], [], []>} : vector<64x64xbf16>, vector<64x64xbf16>, vector<64x64xf32> -> vector<64x64xf32>
    %26 = arith.addf %20, %25 : vector<64x64xf32>
    %27 = vector.extract_strided_slice %1 {offsets = [1, 1, 0], sizes = [8, 8, 64], strides = [1, 1, 1]} : vector<10x10x64xbf16> to vector<8x8x64xbf16>
    %28 = vector.shape_cast %27 : vector<8x8x64xbf16> to vector<64x64xbf16>
    %c4 = arith.constant 4 : index
    %c0_16 = arith.constant 0 : index
    %c0_17 = arith.constant 0 : index
    %29 = vector.load %arg2[%c4, %c0_16, %c0_17] : memref<9x64x64xbf16, #tpu.memory_space<vmem>>, vector<1x64x64xbf16>
    %30 = vector.shape_cast %29 : vector<1x64x64xbf16> to vector<64x64xbf16>
    %cst_18 = arith.constant dense<0.000000e+00> : vector<64x64xf32>
    %31 = tpu.matmul %28, %30, %cst_18 {dimension_numbers = #tpu.dot_dimension_numbers<[1], [0], [0], [1], [0, 0, 1, 1], [], []>} : vector<64x64xbf16>, vector<64x64xbf16>, vector<64x64xf32> -> vector<64x64xf32>
    %32 = arith.addf %26, %31 : vector<64x64xf32>
    %33 = vector.extract_strided_slice %1 {offsets = [1, 2, 0], sizes = [8, 8, 64], strides = [1, 1, 1]} : vector<10x10x64xbf16> to vector<8x8x64xbf16>
    %34 = vector.shape_cast %33 : vector<8x8x64xbf16> to vector<64x64xbf16>
    %c5 = arith.constant 5 : index
    %c0_19 = arith.constant 0 : index
    %c0_20 = arith.constant 0 : index
    %35 = vector.load %arg2[%c5, %c0_19, %c0_20] : memref<9x64x64xbf16, #tpu.memory_space<vmem>>, vector<1x64x64xbf16>
    %36 = vector.shape_cast %35 : vector<1x64x64xbf16> to vector<64x64xbf16>
    %cst_21 = arith.constant dense<0.000000e+00> : vector<64x64xf32>
    %37 = tpu.matmul %34, %36, %cst_21 {dimension_numbers = #tpu.dot_dimension_numbers<[1], [0], [0], [1], [0, 0, 1, 1], [], []>} : vector<64x64xbf16>, vector<64x64xbf16>, vector<64x64xf32> -> vector<64x64xf32>
    %38 = arith.addf %32, %37 : vector<64x64xf32>
    %39 = vector.extract_strided_slice %1 {offsets = [2, 0, 0], sizes = [8, 8, 64], strides = [1, 1, 1]} : vector<10x10x64xbf16> to vector<8x8x64xbf16>
    %40 = vector.shape_cast %39 : vector<8x8x64xbf16> to vector<64x64xbf16>
    %c6 = arith.constant 6 : index
    %c0_22 = arith.constant 0 : index
    %c0_23 = arith.constant 0 : index
    %41 = vector.load %arg2[%c6, %c0_22, %c0_23] : memref<9x64x64xbf16, #tpu.memory_space<vmem>>, vector<1x64x64xbf16>
    %42 = vector.shape_cast %41 : vector<1x64x64xbf16> to vector<64x64xbf16>
    %cst_24 = arith.constant dense<0.000000e+00> : vector<64x64xf32>
    %43 = tpu.matmul %40, %42, %cst_24 {dimension_numbers = #tpu.dot_dimension_numbers<[1], [0], [0], [1], [0, 0, 1, 1], [], []>} : vector<64x64xbf16>, vector<64x64xbf16>, vector<64x64xf32> -> vector<64x64xf32>
    %44 = arith.addf %38, %43 : vector<64x64xf32>
    %45 = vector.extract_strided_slice %1 {offsets = [2, 1, 0], sizes = [8, 8, 64], strides = [1, 1, 1]} : vector<10x10x64xbf16> to vector<8x8x64xbf16>
    %46 = vector.shape_cast %45 : vector<8x8x64xbf16> to vector<64x64xbf16>
    %c7 = arith.constant 7 : index
    %c0_25 = arith.constant 0 : index
    %c0_26 = arith.constant 0 : index
    %47 = vector.load %arg2[%c7, %c0_25, %c0_26] : memref<9x64x64xbf16, #tpu.memory_space<vmem>>, vector<1x64x64xbf16>
    %48 = vector.shape_cast %47 : vector<1x64x64xbf16> to vector<64x64xbf16>
    %cst_27 = arith.constant dense<0.000000e+00> : vector<64x64xf32>
    %49 = tpu.matmul %46, %48, %cst_27 {dimension_numbers = #tpu.dot_dimension_numbers<[1], [0], [0], [1], [0, 0, 1, 1], [], []>} : vector<64x64xbf16>, vector<64x64xbf16>, vector<64x64xf32> -> vector<64x64xf32>
    %50 = arith.addf %44, %49 : vector<64x64xf32>
    %51 = vector.extract_strided_slice %1 {offsets = [2, 2, 0], sizes = [8, 8, 64], strides = [1, 1, 1]} : vector<10x10x64xbf16> to vector<8x8x64xbf16>
    %52 = vector.shape_cast %51 : vector<8x8x64xbf16> to vector<64x64xbf16>
    %c8 = arith.constant 8 : index
    %c0_28 = arith.constant 0 : index
    %c0_29 = arith.constant 0 : index
    %53 = vector.load %arg2[%c8, %c0_28, %c0_29] : memref<9x64x64xbf16, #tpu.memory_space<vmem>>, vector<1x64x64xbf16>
    %54 = vector.shape_cast %53 : vector<1x64x64xbf16> to vector<64x64xbf16>
    %cst_30 = arith.constant dense<0.000000e+00> : vector<64x64xf32>
    %55 = tpu.matmul %52, %54, %cst_30 {dimension_numbers = #tpu.dot_dimension_numbers<[1], [0], [0], [1], [0, 0, 1, 1], [], []>} : vector<64x64xbf16>, vector<64x64xbf16>, vector<64x64xf32> -> vector<64x64xf32>
    %56 = arith.addf %50, %55 : vector<64x64xf32>
    %c0_31 = arith.constant 0 : index
    %c0_32 = arith.constant 0 : index
    %57 = vector.load %arg3[%c0_31, %c0_32] : memref<1x64xf32, #tpu.memory_space<vmem>>, vector<1x64xf32>
    %58 = vector.broadcast %57 : vector<1x64xf32> to vector<64x64xf32>
    %59 = arith.addf %56, %58 : vector<64x64xf32>
    %c0_33 = arith.constant 0 : index
    %c0_34 = arith.constant 0 : index
    %c0_35 = arith.constant 0 : index
    %c0_36 = arith.constant 0 : index
    %60 = vector.load %arg4[%c0_33, %c0_34, %c0_35, %c0_36] : memref<1x8x8x64xbf16, #tpu.memory_space<vmem>>, vector<1x8x8x64xbf16>
    %61 = vector.shape_cast %60 : vector<1x8x8x64xbf16> to vector<8x8x64xbf16>
    %62 = vector.shape_cast %61 : vector<8x8x64xbf16> to vector<64x64xbf16>
    %63 = arith.extf %62 : vector<64x64xbf16> to vector<64x64xf32>
    %64 = arith.addf %59, %63 : vector<64x64xf32>
    %cst_37 = arith.constant 0.000000e+00 : f32
    %65 = vector.broadcast %cst_37 : f32 to vector<64x64xf32>
    %66 = arith.maximumf %64, %65 : vector<64x64xf32>
    %67 = vector.shape_cast %66 : vector<64x64xf32> to vector<8x8x64xf32>
    %68 = arith.truncf %67 : vector<8x8x64xf32> to vector<8x8x64xbf16>
    %c0_38 = arith.constant 0 : index
    %c0_39 = arith.constant 0 : index
    %c0_40 = arith.constant 0 : index
    %c0_41 = arith.constant 0 : index
    %69 = vector.load %arg5[%c0_38, %c0_39, %c0_40, %c0_41] : memref<1x8x8x64xbf16, #tpu.memory_space<vmem>>, vector<1x8x8x64xbf16>
    %70 = vector.shape_cast %69 : vector<1x8x8x64xbf16> to vector<8x8x64xbf16>
    %71 = vector.shape_cast %68 : vector<8x8x64xbf16> to vector<1x8x8x64xbf16>
    tpu.vector_store %arg5[%c0_38, %c0_39, %c0_40, %c0_41], %71 {strides = array<i32>} : memref<1x8x8x64xbf16, #tpu.memory_space<vmem>>, vector<1x8x8x64xbf16>,
    return
  }
  func.func @transform_0(%arg0: i32) -> (i32, i32, i32, i32) {
    %c0_i32 = arith.constant 0 : i32
    %c0_i32_0 = arith.constant 0 : i32
    %c0_i32_1 = arith.constant 0 : i32
    %c0_i32_2 = arith.constant 0 : i32
    return %arg0, %c0_i32, %c0_i32_0, %c0_i32_1 : i32, i32, i32, i32
  }
  func.func @transform_1(%arg0: i32) -> (i32, i32, i32) {
    %c0_i32 = arith.constant 0 : i32
    %c0_i32_0 = arith.constant 0 : i32
    %c0_i32_1 = arith.constant 0 : i32
    %c0_i32_2 = arith.constant 0 : i32
    return %c0_i32, %c0_i32_0, %c0_i32_1 : i32, i32, i32
  }
  func.func @transform_2(%arg0: i32) -> (i32, i32) {
    %c0_i32 = arith.constant 0 : i32
    %c0_i32_0 = arith.constant 0 : i32
    %c0_i32_1 = arith.constant 0 : i32
    return %c0_i32, %c0_i32_0 : i32, i32
  }
  func.func @transform_3(%arg0: i32) -> (i32, i32, i32, i32) {
    %c0_i32 = arith.constant 0 : i32
    %c0_i32_0 = arith.constant 0 : i32
    %c0_i32_1 = arith.constant 0 : i32
    %c0_i32_2 = arith.constant 0 : i32
    return %arg0, %c0_i32, %c0_i32_0, %c0_i32_1 : i32, i32, i32, i32
  }
  func.func @transform_4(%arg0: i32) -> (i32, i32, i32, i32) {
    %c0_i32 = arith.constant 0 : i32
    %c0_i32_0 = arith.constant 0 : i32
    %c0_i32_1 = arith.constant 0 : i32
    %c0_i32_2 = arith.constant 0 : i32
    return %arg0, %c0_i32, %c0_i32_0, %c0_i32_1 : i32, i32, i32, i32
  }
}

</mosaic_0001>

<bundles_post_ra>
// kernel: backbone2d_resnet18_layer1.6
= control target key start
LH: loop header
LB: loop body
LE: loop exit
PB: predicated region body
PF: predicated region fallthrough
CT: control target
= control target key end

     0   :  { %s1269_s12 = smov 0   ;;  %s1475_s0 = inlined_call_operand.vmem [shape: bf16[512,256], index: 0, kind: input, shape index: {}]   ;;  %s1476_s1 = inlined_call_operand.vmem [shape: bf16[256,64], index: 1, kind: input, shape index: {}]   ;;  %s1477_s2 = inlined_call_operand.vmem [shape: f32[1,64], index: 2, kind: input, shape index: {}]   ;;  %s1478_s3 = inlined_call_operand.vmem [shape: bf16[512,64], index: 3, kind: output, shape index: {}]  }
   0x1 LB: > { %s915_s13 = sadd.s32 4294967295, %s1247_s12   ;;  %p919_p0 = scmp.ge.s32.totalorder %s1247_s12, 1  ;;  %s1247_s12 = sphi %s1269_s12, %s13_s12  }
   0x2   : > { %p139_p1 = scmp.lt.s32.totalorder %s1247_s12, 3 }
   0x4   : > { %p140_p2 = pnand %p919_p0, %p139_p1 }
   0x5   : > { %v1177_v0 = vld [vmem:[%s1476_s1 + $0x40] sm:$0xff] (!%p140_p2)   ;;  %s920_s16 = sshll.u32 (!%p140_p2), %s915_s13, 5  ;;  %v1179_v2 = vld [vmem:[%s1476_s1 + $0x48] sm:$0xff] (!%p140_p2)   ;;  %v1181_v4 = vld [vmem:[%s1476_s1 + $0x50] sm:$0xff] (!%p140_p2)   ;;  %vm826_vm0 = vcmask (!%p140_p2), 519168  }
   0x6   : > { %143 = sbr.rel (%p140_p2) target bundleno = 318 (0x13e), region = 32  ;;  %v1178_v1 = vld [vmem:[%s1476_s1] sm:$0xff] (!%p140_p2)   ;;  %1041 = vmatprep.subr.bf16.mxu0 (!%p140_p2), %v1177_v0  ;;  %1153 = vmatprep.subr.bf16.mxu1 (!%p140_p2), %v1177_v0  ;;  %v1180_v3 = vld [vmem:[%s1476_s1 + $0x8] sm:$0xff] (!%p140_p2)   ;;  %p165_p3 = scmp.lt.s32.totalorder (!%p140_p2), %s920_s16, 63  ;;  %v1182_v5 = vld [vmem:[%s1476_s1 + $0x10] sm:$0xff] (!%p140_p2)  }
   0x7   : > { %1042 = vmatpush3.bf16.msra.mxu0 (!%p140_p2), %v1178_v1  ;;  %1161 = vmatpush3.bf16.msra.mxu1 (!%p140_p2), %v1178_v1  ;;  %v1183_v6 = vld [vmem:[%s1476_s1 + $0x58] sm:$0xff] (!%p140_p2)   ;;  %v1185_v8 = vld [vmem:[%s1476_s1 + $0x60] sm:$0xff] (!%p140_p2)   ;;  %v1187_v10 = vld [vmem:[%s1476_s1 + $0x68] sm:$0xff] (!%p140_p2)  }
   0x8   : > { %1043 = vmatprep.subr.bf16.mxu0 (!%p140_p2), %v1179_v2  ;;  %1154 = vmatprep.subr.bf16.mxu1 (!%p140_p2), %v1179_v2  ;;  %v1184_v7 = vld [vmem:[%s1476_s1 + $0x18] sm:$0xff] (!%p140_p2)   ;;  %v1186_v9 = vld [vmem:[%s1476_s1 + $0x20] sm:$0xff] (!%p140_p2)   ;;  %v1188_v13 = vld [vmem:[%s1476_s1 + $0x28] sm:$0xff] (!%p140_p2)  }
   0x9   : > { %v1189_v14 = vld [vmem:[%s1476_s1 + $0x70] sm:$0xff] (!%p140_p2)   ;;  %v1191_v16 = vld [vmem:[%s1476_s1 + $0x78] sm:$0xff] (!%p140_p2)   ;;  %v1368_v50 = vld [vmem:[%s1477_s2] ss:$0 sm:$0xff] (!%p140_p2) }
   0xa   : > { %v1190_v15 = vld [vmem:[%s1476_s1 + $0x30] sm:$0xff] (!%p140_p2)   ;;  %v1192_v17 = vld [vmem:[%s1476_s1 + $0x38] sm:$0xff] (!%p140_p2)  }
   0xb   : > { %1044 = vmatpush3.bf16.msra.mxu0 (!%p140_p2), %v1180_v3  ;;  %1162 = vmatpush3.bf16.msra.mxu1 (!%p140_p2), %v1180_v3 }
   0xc   : > { %1045 = vmatprep.subr.bf16.mxu0 (!%p140_p2), %v1181_v4  ;;  %1155 = vmatprep.subr.bf16.mxu1 (!%p140_p2), %v1181_v4 }
   0xd   : > { %s1480_s16 = smov (!%p165_p3, %s920_s16), 63 }
   0xe   : > { %s1008_s4 = sshll.u32 %s1480_s16, 3  ;;  %s924_s28 = sshll.u32 %s1480_s16, 2 }
   0xf   : > { %1046 = vmatpush3.bf16.msra.mxu0 %v1182_v5  ;;  %1163 = vmatpush3.bf16.msra.mxu1 %v1182_v5  ;;  %s1310_s9 = scalar_lea.vmem %s1475_s0, %s1008_s4  ;;  %s1378_s4 = scalar_lea.vmem %s1478_s3, %s924_s28 }
  0x10   : > { %1047 = vmatprep.subr.bf16.mxu0 %v1183_v6  ;;  %1156 = vmatprep.subr.bf16.mxu1 %v1183_v6  ;;  %v1195_v11 = vld [vmem:[%s1310_s9 + $0x4] ss:$8 sps:$4 sm:$0xff]   ;;  %v1193_v18 = vld [vmem:[%s1310_s9] ss:$8 sps:$4 sm:$0xff]   ;;  %v1199_v20 = vld [vmem:[%s1310_s9 + $0x14] ss:$8 sps:$4 sm:$0xff]  }
  0x11   : > { %v1198_v12 = vld [vmem:[%s1310_s9 + $0x84] ss:$8 sps:$4 sm:$0xff]   ;;  %537 = vmatprep.mubr.bf16.mxu0 %v1195_v11  ;;  %v1196_v19 = vld [vmem:[%s1310_s9 + $0x80] ss:$8 sps:$4 sm:$0xff]   ;;  %v1201_v21 = vld [vmem:[%s1310_s9 + $0x94] ss:$8 sps:$4 sm:$0xff]  }
  0x12   : > { %601 = vmatprep.mubr.bf16.mxu1 %v1198_v12  ;;  %v1203_v22 = vld [vmem:[%s1310_s9 + $0x10] ss:$8 sps:$4 sm:$0xff]   ;;  %v1205_v24 = vld [vmem:[%s1310_s9 + $0x24] ss:$8 sps:$4 sm:$0xff]   ;;  %v1209_v26 = vld [vmem:[%s1310_s9 + $0x20] ss:$8 sps:$4 sm:$0xff]  }
  0x13   : > { %1048 = vmatpush3.bf16.msra.mxu0 %v1184_v7  ;;  %1164 = vmatpush3.bf16.msra.mxu1 %v1184_v7  ;;  %v1204_v23 = vld [vmem:[%s1310_s9 + $0x90] ss:$8 sps:$4 sm:$0xff]   ;;  %v1207_v25 = vld [vmem:[%s1310_s9 + $0xa4] ss:$8 sps:$4 sm:$0xff]   ;;  %v1210_v27 = vld [vmem:[%s1310_s9 + $0xa0] ss:$8 sps:$4 sm:$0xff]  }
  0x14   : > { %1049 = vmatprep.subr.bf16.mxu0 %v1185_v8  ;;  %1157 = vmatprep.subr.bf16.mxu1 %v1185_v8  ;;  %v1211_v28 = vld [vmem:[%s1310_s9 + $0x34] ss:$8 sps:$4 sm:$0xff]   ;;  %v1215_v30 = vld [vmem:[%s1310_s9 + $0x30] ss:$8 sps:$4 sm:$0xff]   ;;  %v1217_v32 = vld [vmem:[%s1310_s9 + $0x44] ss:$8 sps:$4 sm:$0xff]  }
  0x15   : > { %v1213_v29 = vld [vmem:[%s1310_s9 + $0xb4] ss:$8 sps:$4 sm:$0xff]   ;;  %v1216_v31 = vld [vmem:[%s1310_s9 + $0xb0] ss:$8 sps:$4 sm:$0xff]   ;;  %v1219_v33 = vld [vmem:[%s1310_s9 + $0xc4] ss:$8 sps:$4 sm:$0xff]  }
  0x16   : > { %v1221_v34 = vld [vmem:[%s1310_s9 + $0x40] ss:$8 sps:$4 sm:$0xff]   ;;  %v1223_v36 = vld [vmem:[%s1310_s9 + $0x54] ss:$8 sps:$4 sm:$0xff]   ;;  %v1227_v38 = vld [vmem:[%s1310_s9 + $0x50] ss:$8 sps:$4 sm:$0xff]  }
  0x17   : > { %1050 = vmatpush3.bf16.msra.mxu0 %v1186_v9  ;;  %1165 = vmatpush3.bf16.msra.mxu1 %v1186_v9  ;;  %v1222_v35 = vld [vmem:[%s1310_s9 + $0xc0] ss:$8 sps:$4 sm:$0xff]   ;;  %v1225_v37 = vld [vmem:[%s1310_s9 + $0xd4] ss:$8 sps:$4 sm:$0xff]   ;;  %v1228_v39 = vld [vmem:[%s1310_s9 + $0xd0] ss:$8 sps:$4 sm:$0xff]  }
  0x18   : > { %1051 = vmatprep.subr.bf16.mxu0 %v1187_v10  ;;  %1158 = vmatprep.subr.bf16.mxu1 %v1187_v10  ;;  %v1229_v40 = vld [vmem:[%s1310_s9 + $0x64] ss:$8 sps:$4 sm:$0xff]   ;;  %v1233_v42 = vld [vmem:[%s1310_s9 + $0x60] ss:$8 sps:$4 sm:$0xff]   ;;  %v1235_v44 = vld [vmem:[%s1310_s9 + $0x74] ss:$8 sps:$4 sm:$0xff]  }
  0x19   : > { %v1231_v41 = vld [vmem:[%s1310_s9 + $0xe4] ss:$8 sps:$4 sm:$0xff]   ;;  %v1234_v43 = vld [vmem:[%s1310_s9 + $0xe0] ss:$8 sps:$4 sm:$0xff]   ;;  %v1237_v45 = vld [vmem:[%s1310_s9 + $0xf4] ss:$8 sps:$4 sm:$0xff]  }
  0x1a   : > { %v1239_v46 = vld [vmem:[%s1310_s9 + $0x70] ss:$8 sps:$4 sm:$0xff]  }
  0x1b   : > { %1052 = vmatpush3.bf16.msra.mxu0 %v1188_v13  ;;  %1166 = vmatpush3.bf16.msra.mxu1 %v1188_v13  ;;  %v1240_v47 = vld [vmem:[%s1310_s9 + $0xf0] ss:$8 sps:$4 sm:$0xff]  }
  0x1c   : > { %1053 = vmatprep.subr.bf16.mxu0 %v1189_v14  ;;  %1159 = vmatprep.subr.bf16.mxu1 %v1189_v14 }
  0x1f   : > { %1054 = vmatpush3.bf16.msra.mxu0 %v1190_v15  ;;  %1167 = vmatpush3.bf16.msra.mxu1 %v1190_v15 }
  0x20   : > { %1055 = vmatprep.subr.bf16.mxu0 %v1191_v16  ;;  %1160 = vmatprep.subr.bf16.mxu1 %v1191_v16 }
  0x23   : > { %1056 = vmatpush3.bf16.msra.mxu0 %v1192_v17  ;;  %1168 = vmatpush3.bf16.msra.mxu1 %v1192_v17 }
  0x26   : > { %538 = vmatmul.mubr.bf16.vlgmr.msra.gmra.mrb[0].mxu0 %v1193_v18  ;;  %602 = vmatmul.mubr.bf16.vlgmr.msra.gmra.mrb[0].mxu1 %v1196_v19 }
  0x27   : > { %545 = vmatprep.mubr.bf16.mxu0 %v1199_v20  ;;  %609 = vmatprep.mubr.bf16.mxu1 %v1201_v21 }
  0x2e   : > { %546 = vmatmul.mubr.bf16.gmra.mrb[4].mxu0 %v1203_v22  ;;  %610 = vmatmul.mubr.bf16.gmra.mrb[4].mxu1 %v1204_v23 }
  0x2f   : > { %553 = vmatprep.mubr.bf16.mxu0 %v1205_v24  ;;  %617 = vmatprep.mubr.bf16.mxu1 %v1207_v25 }
  0x36   : > { %554 = vmatmul.mubr.bf16.gmra.mrb[8].mxu0 %v1209_v26  ;;  %618 = vmatmul.mubr.bf16.gmra.mrb[8].mxu1 %v1210_v27 }
  0x37   : > { %561 = vmatprep.mubr.bf16.mxu0 %v1211_v28  ;;  %625 = vmatprep.mubr.bf16.mxu1 %v1213_v29 }
  0x3e   : > { %562 = vmatmul.mubr.bf16.gmra.mrb[12].mxu0 %v1215_v30  ;;  %626 = vmatmul.mubr.bf16.gmra.mrb[12].mxu1 %v1216_v31 }
  0x3f   : > { %569 = vmatprep.mubr.bf16.mxu0 %v1217_v32  ;;  %633 = vmatprep.mubr.bf16.mxu1 %v1219_v33 }
  0x46   : > { %570 = vmatmul.mubr.bf16.gmra.mrb[16].mxu0 %v1221_v34  ;;  %634 = vmatmul.mubr.bf16.gmra.mrb[16].mxu1 %v1222_v35 }
  0x47   : > { %577 = vmatprep.mubr.bf16.mxu0 %v1223_v36  ;;  %641 = vmatprep.mubr.bf16.mxu1 %v1225_v37 }
  0x4e   : > { %578 = vmatmul.mubr.bf16.gmra.mrb[20].mxu0 %v1227_v38  ;;  %642 = vmatmul.mubr.bf16.gmra.mrb[20].mxu1 %v1228_v39 }
  0x4f   : > { %585 = vmatprep.mubr.bf16.mxu0 %v1229_v40  ;;  %649 = vmatprep.mubr.bf16.mxu1 %v1231_v41 }
  0x56   : > { %586 = vmatmul.mubr.bf16.gmra.mrb[24].mxu0 %v1233_v42  ;;  %650 = vmatmul.mubr.bf16.gmra.mrb[24].mxu1 %v1234_v43 }
  0x57   : > { %593 = vmatprep.mubr.bf16.mxu0 %v1235_v44  ;;  %657 = vmatprep.mubr.bf16.mxu1 %v1237_v45 }
  0x5e   : > { %594 = vmatmul.mubr.bf16.gmra.mrb[28].mxu0 %v1239_v46  ;;  %658 = vmatmul.mubr.bf16.gmra.mrb[28].mxu1 %v1240_v47 }
  0xf9   : > { %v1057_v48 = vpop.f32.mrb[0].mxu0  ;;  %v1105_v49 = vpop.f32.mrb[0].mxu1 }
  0xfa   : > { %v1058_v51 = vpop.f32.mrb[1].mxu0  ;;  %v1106_v52 = vpop.f32.mrb[1].mxu1 }
  0xfb   : > { %v1059_v53 = vadd.f32 %v1058_v51, %v1057_v48  ;;  %v1107_v54 = vadd.f32 %v1106_v52, %v1105_v49  ;;  %v1060_v55 = vpop.f32.mrb[2].mxu0  ;;  %v1108_v56 = vpop.f32.mrb[2].mxu1 }
  0xfc   : > { %v1061_v57 = vpop.f32.mrb[3].mxu0  ;;  %v1109_v58 = vpop.f32.mrb[3].mxu1 }
  0xfd   : > { %v540_v59 = vadd.f32 %v1059_v53, %v1368_v50  ;;  %v604_v60 = vadd.f32 %v1107_v54, %v1368_v50  ;;  %v1062_v61 = vadd.f32 %v1061_v57, %v1060_v55  ;;  %v1110_v62 = vadd.f32 %v1109_v58, %v1108_v56 }
  0xff   : > { %v666_v63 = vmax.f32 %v540_v59, 0.0  ;;  %v682_v0 = vmax.f32 %v604_v60, 0.0  ;;  %v543_v1 = vadd.f32 %v1062_v61, %v1368_v50  ;;  %v607_v2 = vadd.f32 %v1110_v62, %v1368_v50 }
 0x101   : > { %v1009_v3 = vpack.c.bf16 %v666_v63, %v666_v63  ;;  %v1025_v4 = vpack.c.bf16 %v682_v0, %v682_v0  ;;  %v667_v5 = vmax.f32 %v543_v1, 0.0  ;;  %v683_v6 = vmax.f32 %v607_v2, 0.0  ;;  %v1063_v7 = vpop.f32.mrb[4].mxu0  ;;  %v1111_v8 = vpop.f32.mrb[4].mxu1 }
 0x102   : > { %v1064_v9 = vpop.f32.mrb[5].mxu0  ;;  %v1112_v10 = vpop.f32.mrb[5].mxu1 }
 0x103   : > { %827 = vst.msk [vmem:[%s1378_s4] sm:$0xf] %vm826_vm0, %v1009_v3  ;;  %843 = vst.msk [vmem:[%s1378_s4 + $0x40] sm:$0xf] %vm826_vm0, %v1025_v4  ;;  %v1010_v11 = vpack.c.bf16 %v667_v5, %v667_v5  ;;  %v1026_v12 = vpack.c.bf16 %v683_v6, %v683_v6  ;;  %v1065_v13 = vadd.f32 %v1064_v9, %v1063_v7  ;;  %v1066_v15 = vpop.f32.mrb[6].mxu0  ;;  %v1114_v16 = vpop.f32.mrb[6].mxu1 }
 0x104   : > { %v1113_v14 = vadd.f32 %v1112_v10, %v1111_v8  ;;  %v1067_v17 = vpop.f32.mrb[7].mxu0  ;;  %v1115_v18 = vpop.f32.mrb[7].mxu1 }
 0x105   : > { %828 = vst.msk [vmem:[%s1378_s4 + $0x4] sm:$0xf] %vm826_vm0, %v1010_v11  ;;  %844 = vst.msk [vmem:[%s1378_s4 + $0x44] sm:$0xf] %vm826_vm0, %v1026_v12  ;;  %v548_v19 = vadd.f32 %v1065_v13, %v1368_v50  ;;  %v1068_v21 = vadd.f32 %v1067_v17, %v1066_v15  ;;  %v1116_v22 = vadd.f32 %v1115_v18, %v1114_v16 }
 0x106   : > { %v612_v20 = vadd.f32 %v1113_v14, %v1368_v50 }
 0x107   : > { %v668_v23 = vmax.f32 %v548_v19, 0.0  ;;  %v551_v25 = vadd.f32 %v1068_v21, %v1368_v50  ;;  %v615_v26 = vadd.f32 %v1116_v22, %v1368_v50 }
 0x108   : > { %v684_v24 = vmax.f32 %v612_v20, 0.0 }
 0x109   : > { %v1011_v27 = vpack.c.bf16 %v668_v23, %v668_v23  ;;  %v669_v29 = vmax.f32 %v551_v25, 0.0  ;;  %v685_v30 = vmax.f32 %v615_v26, 0.0  ;;  %v1069_v31 = vpop.f32.mrb[8].mxu0  ;;  %v1117_v32 = vpop.f32.mrb[8].mxu1 }
 0x10a   : > { %v1027_v28 = vpack.c.bf16 %v684_v24, %v684_v24  ;;  %v1070_v33 = vpop.f32.mrb[9].mxu0  ;;  %v1118_v34 = vpop.f32.mrb[9].mxu1 }
 0x10b   : > { %829 = vst.msk [vmem:[%s1378_s4 + $0x8] sm:$0xf] %vm826_vm0, %v1011_v27  ;;  %v1012_v35 = vpack.c.bf16 %v669_v29, %v669_v29  ;;  %v1028_v36 = vpack.c.bf16 %v685_v30, %v685_v30  ;;  %v1071_v37 = vadd.f32 %v1070_v33, %v1069_v31  ;;  %v1119_v38 = vadd.f32 %v1118_v34, %v1117_v32  ;;  %v1072_v39 = vpop.f32.mrb[10].mxu0  ;;  %v1120_v40 = vpop.f32.mrb[10].mxu1 }
 0x10c   : > { %845 = vst.msk [vmem:[%s1378_s4 + $0x48] sm:$0xf] %vm826_vm0, %v1027_v28  ;;  %v1073_v41 = vpop.f32.mrb[11].mxu0  ;;  %v1121_v42 = vpop.f32.mrb[11].mxu1 }
 0x10d   : > { %830 = vst.msk [vmem:[%s1378_s4 + $0xc] sm:$0xf] %vm826_vm0, %v1012_v35  ;;  %846 = vst.msk [vmem:[%s1378_s4 + $0x4c] sm:$0xf] %vm826_vm0, %v1028_v36  ;;  %v556_v43 = vadd.f32 %v1071_v37, %v1368_v50  ;;  %v620_v44 = vadd.f32 %v1119_v38, %v1368_v50  ;;  %v1074_v45 = vadd.f32 %v1073_v41, %v1072_v39 }
 0x10e   : > { %v1122_v46 = vadd.f32 %v1121_v42, %v1120_v40 }
 0x10f   : > { %v670_v47 = vmax.f32 %v556_v43, 0.0  ;;  %v686_v48 = vmax.f32 %v620_v44, 0.0  ;;  %v559_v49 = vadd.f32 %v1074_v45, %v1368_v50 }
 0x110   : > { %v623_v51 = vadd.f32 %v1122_v46, %v1368_v50 }
 0x111   : > { %v1013_v52 = vpack.c.bf16 %v670_v47, %v670_v47  ;;  %v1029_v53 = vpack.c.bf16 %v686_v48, %v686_v48  ;;  %v671_v54 = vmax.f32 %v559_v49, 0.0  ;;  %v1075_v56 = vpop.f32.mrb[12].mxu0  ;;  %v1123_v57 = vpop.f32.mrb[12].mxu1 }
 0x112   : > { %v687_v55 = vmax.f32 %v623_v51, 0.0  ;;  %v1076_v58 = vpop.f32.mrb[13].mxu0  ;;  %v1124_v59 = vpop.f32.mrb[13].mxu1 }
 0x113   : > { %831 = vst.msk [vmem:[%s1378_s4 + $0x10] sm:$0xf] %vm826_vm0, %v1013_v52  ;;  %847 = vst.msk [vmem:[%s1378_s4 + $0x50] sm:$0xf] %vm826_vm0, %v1029_v53  ;;  %v1014_v60 = vpack.c.bf16 %v671_v54, %v671_v54  ;;  %v1077_v62 = vadd.f32 %v1076_v58, %v1075_v56  ;;  %v1125_v63 = vadd.f32 %v1124_v59, %v1123_v57  ;;  %v1078_v0 = vpop.f32.mrb[14].mxu0  ;;  %v1126_v1 = vpop.f32.mrb[14].mxu1 }
 0x114   : > { %v1030_v61 = vpack.c.bf16 %v687_v55, %v687_v55  ;;  %v1079_v2 = vpop.f32.mrb[15].mxu0  ;;  %v1127_v3 = vpop.f32.mrb[15].mxu1 }
 0x115   : > { %832 = vst.msk [vmem:[%s1378_s4 + $0x14] sm:$0xf] %vm826_vm0, %v1014_v60  ;;  %v564_v4 = vadd.f32 %v1077_v62, %v1368_v50  ;;  %v628_v5 = vadd.f32 %v1125_v63, %v1368_v50  ;;  %v1080_v6 = vadd.f32 %v1079_v2, %v1078_v0  ;;  %v1128_v7 = vadd.f32 %v1127_v3, %v1126_v1 }
 0x116   : > { %848 = vst.msk [vmem:[%s1378_s4 + $0x54] sm:$0xf] %vm826_vm0, %v1030_v61 }
 0x117   : > { %v672_v8 = vmax.f32 %v564_v4, 0.0  ;;  %v688_v9 = vmax.f32 %v628_v5, 0.0  ;;  %v567_v10 = vadd.f32 %v1080_v6, %v1368_v50  ;;  %v631_v11 = vadd.f32 %v1128_v7, %v1368_v50 }
 0x119   : > { %v1015_v12 = vpack.c.bf16 %v672_v8, %v672_v8  ;;  %v1031_v13 = vpack.c.bf16 %v688_v9, %v688_v9  ;;  %v673_v14 = vmax.f32 %v567_v10, 0.0  ;;  %v689_v15 = vmax.f32 %v631_v11, 0.0  ;;  %v1081_v16 = vpop.f32.mrb[16].mxu0  ;;  %v1129_v17 = vpop.f32.mrb[16].mxu1 }
 0x11a   : > { %v1082_v18 = vpop.f32.mrb[17].mxu0  ;;  %v1130_v19 = vpop.f32.mrb[17].mxu1 }
 0x11b   : > { %833 = vst.msk [vmem:[%s1378_s4 + $0x18] sm:$0xf] %vm826_vm0, %v1015_v12  ;;  %849 = vst.msk [vmem:[%s1378_s4 + $0x58] sm:$0xf] %vm826_vm0, %v1031_v13  ;;  %v1016_v20 = vpack.c.bf16 %v673_v14, %v673_v14  ;;  %v1032_v21 = vpack.c.bf16 %v689_v15, %v689_v15  ;;  %v1083_v22 = vadd.f32 %v1082_v18, %v1081_v16  ;;  %v1084_v24 = vpop.f32.mrb[18].mxu0  ;;  %v1132_v25 = vpop.f32.mrb[18].mxu1 }
 0x11c   : > { %v1131_v23 = vadd.f32 %v1130_v19, %v1129_v17  ;;  %v1085_v26 = vpop.f32.mrb[19].mxu0  ;;  %v1133_v27 = vpop.f32.mrb[19].mxu1 }
 0x11d   : > { %834 = vst.msk [vmem:[%s1378_s4 + $0x1c] sm:$0xf] %vm826_vm0, %v1016_v20  ;;  %850 = vst.msk [vmem:[%s1378_s4 + $0x5c] sm:$0xf] %vm826_vm0, %v1032_v21  ;;  %v572_v28 = vadd.f32 %v1083_v22, %v1368_v50  ;;  %v1086_v30 = vadd.f32 %v1085_v26, %v1084_v24  ;;  %v1134_v31 = vadd.f32 %v1133_v27, %v1132_v25 }
 0x11e   : > { %v636_v29 = vadd.f32 %v1131_v23, %v1368_v50 }
 0x11f   : > { %v674_v32 = vmax.f32 %v572_v28, 0.0  ;;  %v575_v34 = vadd.f32 %v1086_v30, %v1368_v50  ;;  %v639_v35 = vadd.f32 %v1134_v31, %v1368_v50 }
 0x120   : > { %v690_v33 = vmax.f32 %v636_v29, 0.0 }
 0x121   : > { %v1017_v36 = vpack.c.bf16 %v674_v32, %v674_v32  ;;  %v675_v38 = vmax.f32 %v575_v34, 0.0  ;;  %v691_v39 = vmax.f32 %v639_v35, 0.0  ;;  %v1087_v40 = vpop.f32.mrb[20].mxu0  ;;  %v1135_v41 = vpop.f32.mrb[20].mxu1 }
 0x122   : > { %v1033_v37 = vpack.c.bf16 %v690_v33, %v690_v33  ;;  %v1088_v42 = vpop.f32.mrb[21].mxu0  ;;  %v1136_v43 = vpop.f32.mrb[21].mxu1 }
 0x123   : > { %835 = vst.msk [vmem:[%s1378_s4 + $0x20] sm:$0xf] %vm826_vm0, %v1017_v36  ;;  %v1018_v44 = vpack.c.bf16 %v675_v38, %v675_v38  ;;  %v1034_v45 = vpack.c.bf16 %v691_v39, %v691_v39  ;;  %v1089_v46 = vadd.f32 %v1088_v42, %v1087_v40  ;;  %v1137_v47 = vadd.f32 %v1136_v43, %v1135_v41  ;;  %v1090_v48 = vpop.f32.mrb[22].mxu0  ;;  %v1138_v49 = vpop.f32.mrb[22].mxu1 }
 0x124   : > { %851 = vst.msk [vmem:[%s1378_s4 + $0x60] sm:$0xf] %vm826_vm0, %v1033_v37  ;;  %v1091_v51 = vpop.f32.mrb[23].mxu0  ;;  %v1139_v52 = vpop.f32.mrb[23].mxu1 }
 0x125   : > { %836 = vst.msk [vmem:[%s1378_s4 + $0x24] sm:$0xf] %vm826_vm0, %v1018_v44  ;;  %852 = vst.msk [vmem:[%s1378_s4 + $0x64] sm:$0xf] %vm826_vm0, %v1034_v45  ;;  %v580_v53 = vadd.f32 %v1089_v46, %v1368_v50  ;;  %v644_v54 = vadd.f32 %v1137_v47, %v1368_v50  ;;  %v1092_v55 = vadd.f32 %v1091_v51, %v1090_v48 }
 0x126   : > { %v1140_v56 = vadd.f32 %v1139_v52, %v1138_v49 }
 0x127   : > { %v676_v57 = vmax.f32 %v580_v53, 0.0  ;;  %v692_v58 = vmax.f32 %v644_v54, 0.0  ;;  %v583_v59 = vadd.f32 %v1092_v55, %v1368_v50 }
 0x128   : > { %v647_v60 = vadd.f32 %v1140_v56, %v1368_v50 }
 0x129   : > { %v1019_v61 = vpack.c.bf16 %v676_v57, %v676_v57  ;;  %v1035_v62 = vpack.c.bf16 %v692_v58, %v692_v58  ;;  %v677_v63 = vmax.f32 %v583_v59, 0.0  ;;  %v1093_v1 = vpop.f32.mrb[24].mxu0  ;;  %v1141_v2 = vpop.f32.mrb[24].mxu1 }
 0x12a   : > { %v693_v0 = vmax.f32 %v647_v60, 0.0  ;;  %v1094_v3 = vpop.f32.mrb[25].mxu0  ;;  %v1142_v4 = vpop.f32.mrb[25].mxu1 }
 0x12b   : > { %837 = vst.msk [vmem:[%s1378_s4 + $0x28] sm:$0xf] %vm826_vm0, %v1019_v61  ;;  %853 = vst.msk [vmem:[%s1378_s4 + $0x68] sm:$0xf] %vm826_vm0, %v1035_v62  ;;  %v1020_v5 = vpack.c.bf16 %v677_v63, %v677_v63  ;;  %v1095_v7 = vadd.f32 %v1094_v3, %v1093_v1  ;;  %v1143_v8 = vadd.f32 %v1142_v4, %v1141_v2  ;;  %v1096_v9 = vpop.f32.mrb[26].mxu0  ;;  %v1144_v10 = vpop.f32.mrb[26].mxu1 }
 0x12c   : > { %v1036_v6 = vpack.c.bf16 %v693_v0, %v693_v0  ;;  %v1097_v11 = vpop.f32.mrb[27].mxu0  ;;  %v1145_v12 = vpop.f32.mrb[27].mxu1 }
 0x12d   : > { %838 = vst.msk [vmem:[%s1378_s4 + $0x2c] sm:$0xf] %vm826_vm0, %v1020_v5  ;;  %v588_v13 = vadd.f32 %v1095_v7, %v1368_v50  ;;  %v652_v14 = vadd.f32 %v1143_v8, %v1368_v50  ;;  %v1098_v15 = vadd.f32 %v1097_v11, %v1096_v9  ;;  %v1146_v16 = vadd.f32 %v1145_v12, %v1144_v10 }
 0x12e   : > { %854 = vst.msk [vmem:[%s1378_s4 + $0x6c] sm:$0xf] %vm826_vm0, %v1036_v6 }
 0x12f   : > { %v678_v17 = vmax.f32 %v588_v13, 0.0  ;;  %v694_v18 = vmax.f32 %v652_v14, 0.0  ;;  %v591_v19 = vadd.f32 %v1098_v15, %v1368_v50  ;;  %v655_v20 = vadd.f32 %v1146_v16, %v1368_v50 }
 0x131   : > { %v1021_v21 = vpack.c.bf16 %v678_v17, %v678_v17  ;;  %v1037_v22 = vpack.c.bf16 %v694_v18, %v694_v18  ;;  %v679_v23 = vmax.f32 %v591_v19, 0.0  ;;  %v695_v24 = vmax.f32 %v655_v20, 0.0  ;;  %v1099_v25 = vpop.f32.mrb[28].mxu0  ;;  %v1147_v26 = vpop.f32.mrb[28].mxu1 }
 0x132   : > { %v1100_v27 = vpop.f32.mrb[29].mxu0  ;;  %v1148_v28 = vpop.f32.mrb[29].mxu1 }
 0x133   : > { %839 = vst.msk [vmem:[%s1378_s4 + $0x30] sm:$0xf] %vm826_vm0, %v1021_v21  ;;  %855 = vst.msk [vmem:[%s1378_s4 + $0x70] sm:$0xf] %vm826_vm0, %v1037_v22  ;;  %v1022_v29 = vpack.c.bf16 %v679_v23, %v679_v23  ;;  %v1038_v30 = vpack.c.bf16 %v695_v24, %v695_v24  ;;  %v1101_v31 = vadd.f32 %v1100_v27, %v1099_v25  ;;  %v1102_v33 = vpop.f32.mrb[30].mxu0  ;;  %v1150_v34 = vpop.f32.mrb[30].mxu1 }
 0x134   : > { %v1149_v32 = vadd.f32 %v1148_v28, %v1147_v26  ;;  %v1103_v35 = vpop.f32.mrb[31].mxu0  ;;  %v1151_v36 = vpop.f32.mrb[31].mxu1 }
 0x135   : > { %840 = vst.msk [vmem:[%s1378_s4 + $0x34] sm:$0xf] %vm826_vm0, %v1022_v29  ;;  %856 = vst.msk [vmem:[%s1378_s4 + $0x74] sm:$0xf] %vm826_vm0, %v1038_v30  ;;  %v596_v37 = vadd.f32 %v1101_v31, %v1368_v50  ;;  %v1104_v39 = vadd.f32 %v1103_v35, %v1102_v33  ;;  %v1152_v40 = vadd.f32 %v1151_v36, %v1150_v34 }
 0x136   : > { %v660_v38 = vadd.f32 %v1149_v32, %v1368_v50 }
 0x137   : > { %v680_v41 = vmax.f32 %v596_v37, 0.0  ;;  %v599_v43 = vadd.f32 %v1104_v39, %v1368_v50  ;;  %v663_v44 = vadd.f32 %v1152_v40, %v1368_v50 }
 0x138   : > { %v696_v42 = vmax.f32 %v660_v38, 0.0 }
 0x139   : > { %v1023_v45 = vpack.c.bf16 %v680_v41, %v680_v41  ;;  %v681_v47 = vmax.f32 %v599_v43, 0.0  ;;  %v697_v48 = vmax.f32 %v663_v44, 0.0 }
 0x13a   : > { %v1039_v46 = vpack.c.bf16 %v696_v42, %v696_v42 }
 0x13b   : > { %841 = vst.msk [vmem:[%s1378_s4 + $0x38] sm:$0xf] %vm826_vm0, %v1023_v45  ;;  %v1024_v49 = vpack.c.bf16 %v681_v47, %v681_v47  ;;  %v1040_v51 = vpack.c.bf16 %v697_v48, %v697_v48 }
 0x13c   : > { %857 = vst.msk [vmem:[%s1378_s4 + $0x78] sm:$0xf] %vm826_vm0, %v1039_v46 }
 0x13d   : > { %842 = vst.msk [vmem:[%s1378_s4 + $0x3c] sm:$0xf] %vm826_vm0, %v1024_v49  ;;  %858 = vst.msk [vmem:[%s1378_s4 + $0x7c] sm:$0xf] %vm826_vm0, %v1040_v51 }
 0x13e PF: > { %s13_s12 = sadd.s32 1, %s1247_s12  }
 0x13f   : > { %p10_p4 = scmp.ge.s32.totalorder %s13_s12, 4  }
 0x141   :  { %12 = sbr.rel (!%p10_p4) target bundleno = 1 (0x1), region = 62 }

// kernel: backbone2d_resnet18_layer1.7
= control target key start
LH: loop header
LB: loop body
LE: loop exit
PB: predicated region body
PF: predicated region fallthrough
CT: control target
= control target key end

     0   :  { %s1261_s6 = smov 0   ;;  %s1815_s0 = inlined_call_operand.vmem [shape: bf16[2,18,18,64], index: 0, kind: input, shape index: {}]   ;;  %s1816_s1 = inlined_call_operand.vmem [shape: bf16[2,16,16,64], index: 1, kind: output, shape index: {}]  }
   0x1 LB: > { %s1205_s7 = sadd.s32 4294967295, %s1249_s6   ;;  %p1209_p0 = scmp.ge.s32.totalorder %s1249_s6, 1  ;;  %s1249_s6 = sphi %s1261_s6, %s11_s6  }
   0x2   : > { %p87_p1 = scmp.lt.s32.totalorder %s1249_s6, 3 }
   0x4   : > { %p88_p2 = pnand %p1209_p0, %p87_p1 }
   0x5   : > { %p107_p3 = scmp.lt.s32.totalorder (!%p88_p2), %s1205_s7, 1  ;;  %vm171_vm0 = vsmask.f32 (!%p88_p2), 3328  ;;  %vm172_vm1 = vsmask.f32 (!%p88_p2), 7440  ;;  %vm670_vm2 = vcmask (!%p88_p2), 1042432  }
   0x6   : > { %91 = sbr.rel (%p88_p2) target bundleno = 189 (0xbd), region = 24  ;;  %vm671_vm3 = vcmask (!%p88_p2), 1046532   ;;  %vm1309_vm5 = vmor (!%p88_p2), %vm171_vm0, %vm172_vm1  ;;  %vm1117_vm6 = vcmask (!%p88_p2), 519168  }
   0x7   : > { %vm1301_vm4 = vmor (!%p88_p2), %vm670_vm2, %vm671_vm3 }
   0xd   : > { %s1822_s7 = smov (!%p107_p3, %s1205_s7), 1 }
   0xe   : > { %s1234_s8 = smul.u32 216, %s1822_s7  ;;  %s1233_s12 = sshll.u32 %s1822_s7, 7 }
   0xf   : > { %s1375_s15 = scalar_lea.vmem %s1816_s1, %s1233_s12 }
  0x10   : > { %s1275_s11 = scalar_lea.vmem %s1815_s0, %s1234_s8 }
  0x11   : > { %v117_v0 = vld [vmem:[%s1275_s11] sm:$0xf]  ;;  %v1279_v1 = vld [vmem:[%s1275_s11 + $0x4] sm:$0xf]  ;;  %v1282_v2 = vld [vmem:[%s1275_s11 + $0xc] sm:$0xf] }
  0x12   : > { %v1285_v3 = vld [vmem:[%s1275_s11 + $0x10] sm:$0xf]  ;;  %v1288_v4 = vld [vmem:[%s1275_s11 + $0x18] sm:$0xf]  ;;  %v175_v5 = vshrl.u32 %v117_v0, 16  ;;  %v178_v6 = vshll.u32 %v117_v0, 16 }
  0x13   : > { %v184_v7 = vshll.u32 %v1279_v1, 16  ;;  %v199_v8 = vshrl.u32 %v1282_v2, 16  ;;  %v1293_v9 = vld [vmem:[%s1275_s11 + $0x1c] sm:$0xf]  ;;  %v202_v10 = vshll.u32 %v1282_v2, 16  ;;  %v208_v11 = vshll.u32 %v1285_v3, 16 }
  0x14   : > { %v223_v12 = vshrl.u32 %v1288_v4, 16  ;;  %v226_v13 = vshll.u32 %v1288_v4, 16  ;;  %v177_v14 = vrot.slane %v175_v5, 4  ;;  %v180_v15 = vrot.slane %v178_v6, 5  ;;  %v119_v32 = vld [vmem:[%s1275_s11 + $0x8] sm:$0x1] }
  0x15   : > { %v186_v16 = vrot.slane %v184_v7, 5  ;;  %v201_v17 = vrot.slane %v199_v8, 4  ;;  %v204_v18 = vrot.slane %v202_v10, 5  ;;  %v210_v19 = vrot.slane %v208_v11, 5  ;;  %v122_v42 = vld [vmem:[%s1275_s11 + $0x14] sm:$0x1] }
  0x16   : > { %v225_v20 = vrot.slane %v223_v12, 4  ;;  %v228_v21 = vrot.slane %v226_v13, 5  ;;  %v181_v23 = vor.u32 %v180_v15, %v177_v14  ;;  %v232_v24 = vshll.u32 %v1293_v9, 16  ;;  %v125_v50 = vld [vmem:[%s1275_s11 + $0x20] sm:$0x1] }
  0x17   : > { %v1213_v25 = vrot.slane %v117_v0, 9  ;;  %v675_v26 = vrot.slane %v1279_v1, 5  ;;  %v205_v28 = vor.u32 %v204_v18, %v201_v17  ;;  %v1214_v30 = vrot.slane %v1282_v2, 9  ;;  %v1343_v63 = vld [vmem:[%s1275_s11 + $0x24] sm:$0xf] }
  0x18   : > { %v229_v29 = vor.u32 %v228_v21, %v225_v20  ;;  %v682_v31 = vrot.slane %v1285_v3, 5  ;;  %v182_v33 = vrot.slane %v181_v23, 4  ;;  %v234_v34 = vrot.slane %v232_v24, 5 }
  0x19   : > { %v676_v35 = vsel %vm1301_vm4, %v1213_v25, %v675_v26  ;;  %v1215_v36 = vrot.slane %v1288_v4, 9  ;;  %v206_v37 = vrot.slane %v205_v28, 4  ;;  %v689_v40 = vrot.slane %v1293_v9, 5 }
  0x1a   : > { %v230_v38 = vrot.slane %v229_v29, 4  ;;  %v683_v39 = vsel %vm1301_vm4, %v1214_v30, %v682_v31  ;;  %v187_v41 = vsel %vm1309_vm5, %v182_v33, %v186_v16  ;;  %v188_v43 = vshrl.u32 %v1279_v1, 16 }
  0x1b   : > { %v194_v44 = vshll.u32 %v119_v32, 16  ;;  %v212_v45 = vshrl.u32 %v1285_v3, 16  ;;  %v211_v46 = vsel %vm1309_vm5, %v206_v37, %v210_v19  ;;  %v590_v48 = vmax.bf16 %v187_v41, %v117_v0 }
  0x1c   : > { %v235_v47 = vsel %vm1309_vm5, %v230_v38, %v234_v34  ;;  %v1333_v49 = vsel %vm1301_vm4, %v1215_v36, %v689_v40  ;;  %v592_v51 = vmax.bf16 %v211_v46, %v1282_v2  ;;  %v190_v53 = vrot.slane %v188_v43, 4 }
  0x1d   : > { %v594_v52 = vmax.bf16 %v235_v47, %v1288_v4  ;;  %v196_v54 = vrot.slane %v194_v44, 5  ;;  %v817_v55 = vmax.bf16 %v676_v35, %v590_v48  ;;  %v214_v56 = vrot.slane %v212_v45, 4 }
  0x1e   : > { %v218_v57 = vshll.u32 %v122_v42, 16  ;;  %v236_v58 = vshrl.u32 %v1293_v9, 16  ;;  %v819_v59 = vmax.bf16 %v683_v39, %v592_v51  ;;  %v191_v61 = vor.u32 %v190_v53, %v186_v16 }
  0x1f   : > { %v1340_v60 = vmax.bf16 %v1333_v49, %v594_v52  ;;  %v242_v62 = vshll.u32 %v125_v50, 16  ;;  %v849_v0 = vmax.bf16 %v817_v55, %v1282_v2  ;;  %v215_v5 = vor.u32 %v214_v56, %v210_v19  ;;  %v1388_v55 = vld [vmem:[%s1275_s11 + $0x30] sm:$0xf] }
  0x20   : > { %v220_v6 = vrot.slane %v218_v57, 5  ;;  %v238_v7 = vrot.slane %v236_v58, 4  ;;  %v851_v8 = vmax.bf16 %v819_v59, %v1288_v4  ;;  %v192_v11 = vrot.slane %v191_v61, 4 }
  0x21   : > { %v853_v10 = vmax.bf16 %v1340_v60, %v1343_v63  ;;  %v244_v12 = vrot.slane %v242_v62, 5  ;;  %v907_v13 = vmax.bf16 %v849_v0, %v211_v46  ;;  %v216_v14 = vrot.slane %v215_v5, 4 }
  0x22   : > { %v239_v15 = vor.u32 %v238_v7, %v234_v34  ;;  %v677_v16 = vrot.slane %v675_v26, 4  ;;  %v909_v17 = vmax.bf16 %v851_v8, %v235_v47  ;;  %v197_v2 = vsel %vm1309_vm5, %v192_v11, %v196_v54  ;;  %v1396_v11 = vld [vmem:[%s1275_s11 + $0x34] sm:$0xf] }
  0x23   : > { %v678_v18 = vrot.slane %v119_v32, 5  ;;  %v684_v19 = vrot.slane %v682_v31, 4  ;;  %v951_v20 = vmax.bf16 %v907_v13, %v683_v39  ;;  %v221_v21 = vsel %vm1309_vm5, %v216_v14, %v220_v6  ;;  %v1361_v32 = vld [vmem:[%s1275_s11 + $0x28] sm:$0xf] }
  0x24   : > { %v240_v23 = vrot.slane %v239_v15, 4  ;;  %v591_v24 = vmax.bf16 %v197_v2, %v1279_v1  ;;  %v953_v25 = vmax.bf16 %v909_v17, %v1333_v49  ;;  %v593_v28 = vmax.bf16 %v221_v21, %v1285_v3 }
  0x25   : > { %v679_v26 = vsel %vm1301_vm4, %v677_v16, %v678_v18  ;;  %v685_v29 = vrot.slane %v122_v42, 5  ;;  %v983_v30 = vmax.bf16 %v951_v20, %v1288_v4  ;;  %v691_v33 = vrot.slane %v689_v40, 4 }
  0x26   : > { %v245_v31 = vsel %vm1309_vm5, %v240_v23, %v244_v12  ;;  %v692_v34 = vrot.slane %v125_v50, 5  ;;  %v818_v36 = vmax.bf16 %v679_v26, %v591_v24  ;;  %v247_v37 = vshrl.u32 %v1343_v63, 16  ;;  %v128_v50 = vld [vmem:[%s1275_s11 + $0x2c] sm:$0x1] }
  0x27   : > { %v595_v1 = vmax.bf16 %v245_v31, %v1293_v9  ;;  %v686_v35 = vsel %vm1301_vm4, %v684_v19, %v685_v29  ;;  %v1041_v38 = vmax.bf16 %v983_v30, %v235_v47  ;;  %v250_v41 = vshll.u32 %v1343_v63, 16 }
  0x28   : > { %v693_v4 = vsel %vm1301_vm4, %v691_v33, %v692_v34  ;;  %v820_v39 = vmax.bf16 %v686_v35, %v593_v28  ;;  %v850_v42 = vmax.bf16 %v818_v36, %v1285_v3  ;;  %v249_v43 = vrot.slane %v247_v37, 4 }
  0x29   : > { %v822_v40 = vmax.bf16 %v693_v4, %v595_v1  ;;  %v256_v44 = vshll.u32 %v1361_v32, 16  ;;  %v1085_v45 = vmax.bf16 %v1041_v38, %v1333_v49  ;;  %v252_v47 = vrot.slane %v250_v41, 5 }
  0x2a   : > { %v852_v46 = vmax.bf16 %v820_v39, %v1293_v9  ;;  %v1216_v48 = vrot.slane %v1343_v63, 9  ;;  %v908_v52 = vmax.bf16 %v850_v42, %v221_v21  ;;  %v696_v54 = vrot.slane %v1361_v32, 5 }
  0x2b   : > { %v854_v51 = vmax.bf16 %v822_v40, %v1361_v32  ;;  %v258_v53 = vrot.slane %v256_v44, 5  ;;  %1118 = vst.msk [vmem:[%s1375_s15] sm:$0xf] %vm1117_vm6, %v1085_v45  ;;  %v253_v56 = vor.u32 %v252_v47, %v249_v43  ;;  %v985_v49 = vmax.bf16 %v953_v25, %v1343_v63  ;;  %v1424_v44 = vld [vmem:[%s1275_s11 + $0x3c] sm:$0xf] }
  0x2c   : > { %v910_v3 = vmax.bf16 %v852_v46, %v245_v31  ;;  %v260_v57 = vshrl.u32 %v1361_v32, 16  ;;  %v952_v58 = vmax.bf16 %v908_v52, %v686_v35  ;;  %v697_v59 = vsel %vm1301_vm4, %v1216_v48, %v696_v54 }
  0x2d   : > { %v266_v61 = vshll.u32 %v128_v50, 16  ;;  %v698_v62 = vrot.slane %v696_v54, 4  ;;  %v254_v5 = vrot.slane %v253_v56, 4  ;;  %v699_v7 = vrot.slane %v128_v50, 5 }
  0x2e   : > { %v954_v0 = vmax.bf16 %v910_v3, %v693_v4  ;;  %v262_v6 = vrot.slane %v260_v57, 4  ;;  %v984_v8 = vmax.bf16 %v952_v58, %v1293_v9  ;;  %v271_v13 = vshrl.u32 %v1388_v55, 16 }
  0x2f   : > { %v268_v12 = vrot.slane %v266_v61, 5  ;;  %v274_v14 = vshll.u32 %v1388_v55, 16  ;;  %v259_v15 = vsel %vm1309_vm5, %v254_v5, %v258_v53  ;;  %v700_v17 = vsel %vm1301_vm4, %v698_v62, %v699_v7 }
  0x30   : > { %v263_v16 = vor.u32 %v262_v6, %v258_v53  ;;  %v986_v2 = vmax.bf16 %v954_v0, %v1361_v32  ;;  %v1042_v18 = vmax.bf16 %v984_v8, %v245_v31  ;;  %v596_v9 = vmax.bf16 %v259_v15, %v1343_v63  ;;  %v131_v63 = vld [vmem:[%s1275_s11 + $0x38] sm:$0x1]  ;;  %v1435_v53 = vld [vmem:[%s1275_s11 + $0x40] sm:$0xf] }
  0x31   : > { %v911_v19 = vmax.bf16 %v853_v10, %v259_v15  ;;  %v1043_v20 = vmax.bf16 %v985_v49, %v259_v15  ;;  %v273_v23 = vrot.slane %v271_v13, 4  ;;  %v276_v24 = vrot.slane %v274_v14, 5  ;;  %v134_v13 = vld [vmem:[%s1275_s11 + $0x44] sm:$0x1] }
  0x32   : > { %v264_v21 = vrot.slane %v263_v16, 4  ;;  %v280_v25 = vshll.u32 %v1396_v11, 16  ;;  %v1086_v28 = vmax.bf16 %v1042_v18, %v693_v4  ;;  %v823_v26 = vmax.bf16 %v697_v59, %v596_v9 }
  0x33   : > { %v955_v29 = vmax.bf16 %v911_v19, %v697_v59  ;;  %v1087_v30 = vmax.bf16 %v1043_v20, %v697_v59  ;;  %v277_v33 = vor.u32 %v276_v24, %v273_v23  ;;  %v1217_v60 = vrot.slane %v1388_v55, 9  ;;  %v1454_v19 = vld [vmem:[%s1275_s11 + $0x48] sm:$0xf] }
  0x34   : > { %v269_v31 = vsel %vm1309_vm5, %v264_v21, %v268_v12  ;;  %v282_v34 = vrot.slane %v280_v25, 5  ;;  %1119 = vst.msk [vmem:[%s1375_s15 + $0x4] sm:$0xf] %vm1117_vm6, %v1086_v28  ;;  %v855_v10 = vmax.bf16 %v823_v26, %v1388_v55  ;;  %v703_v38 = vrot.slane %v1396_v11, 5 }
  0x35   : > { %1120 = vst.msk [vmem:[%s1375_s15 + $0x8] sm:$0xf] %vm1117_vm6, %v1087_v30  ;;  %v597_v1 = vmax.bf16 %v269_v31, %v1361_v32  ;;  %v912_v35 = vmax.bf16 %v854_v51, %v269_v31  ;;  %v1044_v36 = vmax.bf16 %v986_v2, %v269_v31  ;;  %v278_v37 = vrot.slane %v277_v33, 4  ;;  %v1460_v30 = vld [vmem:[%s1275_s11 + $0x4c] sm:$0xf] }
  0x36   : > { %v987_v4 = vmax.bf16 %v955_v29, %v1388_v55  ;;  %v284_v39 = vshrl.u32 %v1396_v11, 16  ;;  %v290_v43 = vshll.u32 %v131_v63, 16  ;;  %v704_v45 = vsel %vm1301_vm4, %v1217_v60, %v703_v38 }
  0x37   : > { %v824_v41 = vmax.bf16 %v700_v17, %v597_v1  ;;  %v956_v40 = vmax.bf16 %v912_v35, %v700_v17  ;;  %v1088_v42 = vmax.bf16 %v1044_v36, %v700_v17  ;;  %v283_v32 = vsel %vm1309_vm5, %v278_v37, %v282_v34 }
  0x38   : > { %v286_v46 = vrot.slane %v284_v39, 4  ;;  %v705_v47 = vrot.slane %v703_v38, 4  ;;  %v598_v50 = vmax.bf16 %v283_v32, %v1388_v55  ;;  %v913_v51 = vmax.bf16 %v855_v10, %v283_v32 }
  0x39   : > { %v856_v48 = vmax.bf16 %v824_v41, %v1396_v11  ;;  %1121 = vst.msk [vmem:[%s1375_s15 + $0xc] sm:$0xf] %vm1117_vm6, %v1088_v42  ;;  %v1045_v52 = vmax.bf16 %v987_v4, %v283_v32  ;;  %v292_v3 = vrot.slane %v290_v43, 5  ;;  %v706_v56 = vrot.slane %v131_v63, 5  ;;  %v137_v43 = vld [vmem:[%s1275_s11 + $0x50] sm:$0x1] }
  0x3a   : > { %v287_v54 = vor.u32 %v286_v46, %v282_v34  ;;  %v988_v49 = vmax.bf16 %v956_v40, %v1396_v11  ;;  %v825_v57 = vmax.bf16 %v704_v45, %v598_v50  ;;  %v957_v58 = vmax.bf16 %v913_v51, %v704_v45 }
  0x3b   : > { %v1089_v59 = vmax.bf16 %v1045_v52, %v704_v45  ;;  %v295_v61 = vshrl.u32 %v1424_v44, 16  ;;  %v707_v55 = vsel %vm1301_vm4, %v705_v47, %v706_v56  ;;  %v298_v0 = vshll.u32 %v1424_v44, 16 }
  0x3c   : > { %v288_v62 = vrot.slane %v287_v54, 4  ;;  %v304_v5 = vshll.u32 %v1435_v53, 16  ;;  %v857_v6 = vmax.bf16 %v825_v57, %v1424_v44  ;;  %v1218_v8 = vrot.slane %v1424_v44, 9 }
  0x3d   : > { %1122 = vst.msk [vmem:[%s1375_s15 + $0x10] sm:$0xf] %vm1117_vm6, %v1089_v59  ;;  %v297_v7 = vrot.slane %v295_v61, 4  ;;  %v710_v12 = vrot.slane %v1435_v53, 5  ;;  %v300_v15 = vrot.slane %v298_v0, 5  ;;  %v989_v17 = vmax.bf16 %v957_v58, %v1424_v44 }
  0x3e   : > { %v293_v14 = vsel %vm1309_vm5, %v288_v62, %v292_v3  ;;  %v306_v16 = vrot.slane %v304_v5, 5  ;;  %v308_v23 = vshrl.u32 %v1435_v53, 16  ;;  %v314_v24 = vshll.u32 %v134_v13, 16  ;;  %v1487_v61 = vld [vmem:[%s1275_s11 + $0x54] sm:$0xf] }
  0x3f   : > { %v599_v2 = vmax.bf16 %v293_v14, %v1396_v11  ;;  %v914_v18 = vmax.bf16 %v856_v48, %v293_v14  ;;  %v1046_v9 = vmax.bf16 %v988_v49, %v293_v14  ;;  %v711_v20 = vsel %vm1301_vm4, %v1218_v8, %v710_v12 }
  0x40   : > { %v301_v21 = vor.u32 %v300_v15, %v297_v7  ;;  %v712_v25 = vrot.slane %v710_v12, 4  ;;  %v713_v31 = vrot.slane %v134_v13, 5  ;;  %v310_v33 = vrot.slane %v308_v23, 4 }
  0x41   : > { %v826_v28 = vmax.bf16 %v707_v55, %v599_v2  ;;  %v958_v26 = vmax.bf16 %v914_v18, %v707_v55  ;;  %v1090_v29 = vmax.bf16 %v1046_v9, %v707_v55  ;;  %v316_v34 = vrot.slane %v314_v24, 5  ;;  %v1498_v9 = vld [vmem:[%s1275_s11 + $0x58] sm:$0xf] }
  0x42   : > { %v302_v11 = vrot.slane %v301_v21, 4  ;;  %v319_v60 = vshrl.u32 %v1454_v19, 16  ;;  %v714_v10 = vsel %vm1301_vm4, %v712_v25, %v713_v31  ;;  %v322_v35 = vshll.u32 %v1454_v19, 16 }
  0x43   : > { %v858_v63 = vmax.bf16 %v826_v28, %v1435_v53  ;;  %1123 = vst.msk [vmem:[%s1375_s15 + $0x14] sm:$0xf] %vm1117_vm6, %v1090_v29  ;;  %v990_v1 = vmax.bf16 %v958_v26, %v1435_v53  ;;  %v311_v37 = vor.u32 %v310_v33, %v306_v16  ;;  %v328_v4 = vshll.u32 %v1460_v30, 16 }
  0x44   : > { %v307_v36 = vsel %vm1309_vm5, %v302_v11, %v306_v16  ;;  %v321_v38 = vrot.slane %v319_v60, 4  ;;  %v324_v42 = vrot.slane %v322_v35, 5  ;;  %v1219_v46 = vrot.slane %v1454_v19, 9  ;;  %v1515_v35 = vld [vmem:[%s1275_s11 + $0x60] sm:$0xf] }
  0x45   : > { %v600_v39 = vmax.bf16 %v307_v36, %v1424_v44  ;;  %v915_v41 = vmax.bf16 %v857_v6, %v307_v36  ;;  %v1047_v40 = vmax.bf16 %v989_v17, %v307_v36  ;;  %v312_v32 = vrot.slane %v311_v37, 4 }
  0x46   : > { %v330_v45 = vrot.slane %v328_v4, 5  ;;  %v717_v47 = vrot.slane %v1460_v30, 5  ;;  %v325_v52 = vor.u32 %v324_v42, %v321_v38  ;;  %v332_v3 = vshrl.u32 %v1460_v30, 16 }
  0x47   : > { %v827_v48 = vmax.bf16 %v711_v20, %v600_v39  ;;  %v959_v50 = vmax.bf16 %v915_v41, %v711_v20  ;;  %v1091_v51 = vmax.bf16 %v1047_v40, %v711_v20  ;;  %v317_v54 = vsel %vm1309_vm5, %v312_v32, %v316_v34 }
  0x48   : > { %v718_v44 = vsel %vm1301_vm4, %v1219_v46, %v717_v47  ;;  %v338_v56 = vshll.u32 %v137_v43, 16  ;;  %v601_v57 = vmax.bf16 %v317_v54, %v1435_v53  ;;  %v916_v58 = vmax.bf16 %v858_v63, %v317_v54 }
  0x49   : > { %v859_v49 = vmax.bf16 %v827_v48, %v1454_v19  ;;  %1124 = vst.msk [vmem:[%s1375_s15 + $0x18] sm:$0xf] %vm1117_vm6, %v1091_v51  ;;  %v1048_v59 = vmax.bf16 %v990_v1, %v317_v54  ;;  %v326_v62 = vrot.slane %v325_v52, 4  ;;  %v991_v55 = vmax.bf16 %v959_v50, %v1454_v19  ;;  %v140_v1 = vld [vmem:[%s1275_s11 + $0x5c] sm:$0x1] }
  0x4a   : > { %v334_v0 = vrot.slane %v332_v3, 4  ;;  %v340_v5 = vrot.slane %v338_v56, 5  ;;  %v828_v6 = vmax.bf16 %v714_v10, %v601_v57  ;;  %v960_v7 = vmax.bf16 %v916_v58, %v714_v10 }
  0x4b   : > { %v1092_v8 = vmax.bf16 %v1048_v59, %v714_v10  ;;  %v719_v12 = vrot.slane %v717_v47, 4  ;;  %v331_v13 = vsel %vm1309_vm5, %v326_v62, %v330_v45  ;;  %v720_v53 = vrot.slane %v137_v43, 5 }
  0x4c   : > { %v335_v14 = vor.u32 %v334_v0, %v330_v45  ;;  %v343_v15 = vshrl.u32 %v1487_v61, 16  ;;  %v860_v16 = vmax.bf16 %v828_v6, %v1460_v30  ;;  %v602_v17 = vmax.bf16 %v331_v13, %v1454_v19 }
  0x4d   : > { %1125 = vst.msk [vmem:[%s1375_s15 + $0x1c] sm:$0xf] %vm1117_vm6, %v1092_v8  ;;  %v917_v2 = vmax.bf16 %v859_v49, %v331_v13  ;;  %v1049_v18 = vmax.bf16 %v991_v55, %v331_v13  ;;  %v721_v21 = vsel %vm1301_vm4, %v719_v12, %v720_v53  ;;  %v992_v23 = vmax.bf16 %v960_v7, %v1460_v30  ;;  %v143_v53 = vld [vmem:[%s1275_s11 + $0x68] sm:$0x1] }
  0x4e   : > { %v336_v20 = vrot.slane %v335_v14, 4  ;;  %v345_v24 = vrot.slane %v343_v15, 4  ;;  %v829_v25 = vmax.bf16 %v718_v44, %v602_v17  ;;  %v346_v29 = vshll.u32 %v1487_v61, 16 }
  0x4f   : > { %v961_v28 = vmax.bf16 %v917_v2, %v718_v44  ;;  %v1093_v26 = vmax.bf16 %v1049_v18, %v718_v44  ;;  %v352_v31 = vshll.u32 %v1498_v9, 16  ;;  %v1220_v11 = vrot.slane %v1487_v61, 9 }
  0x50   : > { %v341_v19 = vsel %vm1309_vm5, %v336_v20, %v340_v5  ;;  %v724_v33 = vrot.slane %v1498_v9, 5  ;;  %v861_v34 = vmax.bf16 %v829_v25, %v1487_v61  ;;  %v348_v36 = vrot.slane %v346_v29, 5 }
  0x51   : > { %1126 = vst.msk [vmem:[%s1375_s15 + $0x20] sm:$0xf] %vm1117_vm6, %v1093_v26  ;;  %v603_v60 = vmax.bf16 %v341_v19, %v1460_v30  ;;  %v918_v63 = vmax.bf16 %v860_v16, %v341_v19  ;;  %v1050_v10 = vmax.bf16 %v992_v23, %v341_v19  ;;  %v354_v37 = vrot.slane %v352_v31, 5  ;;  %v1522_v30 = vld [vmem:[%s1275_s11 + $0x64] sm:$0xf] }
  0x52   : > { %v725_v38 = vsel %vm1301_vm4, %v1220_v11, %v724_v33  ;;  %v993_v4 = vmax.bf16 %v961_v28, %v1487_v61  ;;  %v356_v42 = vshrl.u32 %v1498_v9, 16  ;;  %v349_v43 = vor.u32 %v348_v36, %v345_v24 }
  0x53   : > { %v830_v39 = vmax.bf16 %v721_v21, %v603_v60  ;;  %v962_v41 = vmax.bf16 %v918_v63, %v721_v21  ;;  %v1094_v40 = vmax.bf16 %v1050_v10, %v721_v21  ;;  %v362_v32 = vshll.u32 %v140_v1, 16 }
  0x54   : > { %v726_v45 = vrot.slane %v724_v33, 4  ;;  %v727_v46 = vrot.slane %v140_v1, 5  ;;  %v358_v48 = vrot.slane %v356_v42, 4  ;;  %v367_v51 = vshrl.u32 %v1515_v35, 16 }
  0x55   : > { %v862_v47 = vmax.bf16 %v830_v39, %v1498_v9  ;;  %1127 = vst.msk [vmem:[%s1375_s15 + $0x24] sm:$0xf] %vm1117_vm6, %v1094_v40  ;;  %v994_v50 = vmax.bf16 %v962_v41, %v1498_v9  ;;  %v350_v52 = vrot.slane %v349_v43, 4  ;;  %v364_v54 = vrot.slane %v362_v32, 5  ;;  %v1559_v41 = vld [vmem:[%s1275_s11 + $0x70] sm:$0xf] }
  0x56   : > { %v728_v44 = vsel %vm1301_vm4, %v726_v45, %v727_v46  ;;  %v370_v3 = vshll.u32 %v1515_v35, 16  ;;  %v359_v56 = vor.u32 %v358_v48, %v354_v37  ;;  %v369_v49 = vrot.slane %v367_v51, 4 }
  0x57   : > { %v376_v57 = vshll.u32 %v1522_v30, 16  ;;  %v1221_v58 = vrot.slane %v1515_v35, 9  ;;  %v355_v59 = vsel %vm1309_vm5, %v350_v52, %v354_v37  ;;  %v731_v55 = vrot.slane %v1522_v30, 5 }
  0x58   : > { %v372_v62 = vrot.slane %v370_v3, 5  ;;  %v380_v0 = vshrl.u32 %v1522_v30, 16  ;;  %v604_v5 = vmax.bf16 %v355_v59, %v1487_v61  ;;  %v919_v6 = vmax.bf16 %v861_v34, %v355_v59 }
  0x59   : > { %v1051_v7 = vmax.bf16 %v993_v4, %v355_v59  ;;  %v360_v8 = vrot.slane %v359_v56, 4  ;;  %v378_v13 = vrot.slane %v376_v57, 5  ;;  %v732_v14 = vsel %vm1301_vm4, %v1221_v58, %v731_v55  ;;  %v1577_v58 = vld [vmem:[%s1275_s11 + $0x78] sm:$0xf] }
  0x5a   : > { %v373_v12 = vor.u32 %v372_v62, %v369_v49  ;;  %v382_v15 = vrot.slane %v380_v0, 4  ;;  %v831_v16 = vmax.bf16 %v725_v38, %v604_v5  ;;  %v963_v17 = vmax.bf16 %v919_v6, %v725_v38 }
  0x5b   : > { %v1095_v2 = vmax.bf16 %v1051_v7, %v725_v38  ;;  %v365_v18 = vsel %vm1309_vm5, %v360_v8, %v364_v54  ;;  %v386_v26 = vshll.u32 %v143_v53, 16  ;;  %v733_v36 = vrot.slane %v731_v55, 4  ;;  %v1581_v55 = vld [vmem:[%s1275_s11 + $0x7c] sm:$0xf] }
  0x5c   : > { %v605_v61 = vmax.bf16 %v365_v18, %v1498_v9  ;;  %v920_v20 = vmax.bf16 %v862_v47, %v365_v18  ;;  %v1052_v21 = vmax.bf16 %v994_v50, %v365_v18  ;;  %v374_v23 = vrot.slane %v373_v12, 4  ;;  %v1552_v9 = vld [vmem:[%s1275_s11 + $0x6c] sm:$0xf] }
  0x5d   : > { %v863_v24 = vmax.bf16 %v831_v16, %v1515_v35  ;;  %1128 = vst.msk [vmem:[%s1375_s15 + $0x28] sm:$0xf] %vm1117_vm6, %v1095_v2  ;;  %v995_v25 = vmax.bf16 %v963_v17, %v1515_v35  ;;  %v383_v28 = vor.u32 %v382_v15, %v378_v13  ;;  %v388_v1 = vrot.slane %v386_v26, 5  ;;  %v149_v26 = vld [vmem:[%s1275_s11 + $0x80] sm:$0x1] }
  0x5e   : > { %v832_v29 = vmax.bf16 %v728_v44, %v605_v61  ;;  %v964_v19 = vmax.bf16 %v920_v20, %v728_v44  ;;  %v1096_v31 = vmax.bf16 %v1052_v21, %v728_v44  ;;  %v379_v11 = vsel %vm1309_vm5, %v374_v23, %v378_v13  ;;  %v146_v44 = vld [vmem:[%s1275_s11 + $0x74] sm:$0x1] }
  0x5f   : > { %v606_v33 = vmax.bf16 %v379_v11, %v1515_v35  ;;  %v921_v34 = vmax.bf16 %v863_v24, %v379_v11  ;;  %v1053_v60 = vmax.bf16 %v995_v25, %v379_v11  ;;  %v384_v63 = vrot.slane %v383_v28, 4 }
  0x60   : > { %v864_v10 = vmax.bf16 %v832_v29, %v1522_v30  ;;  %1129 = vst.msk [vmem:[%s1375_s15 + $0x2c] sm:$0xf] %vm1117_vm6, %v1096_v31  ;;  %v734_v37 = vrot.slane %v143_v53, 5  ;;  %v996_v40 = vmax.bf16 %v964_v19, %v1522_v30  ;;  %v391_v43 = vshrl.u32 %v1552_v9, 16 }
  0x61   : > { %v833_v38 = vmax.bf16 %v732_v14, %v606_v33  ;;  %v965_v4 = vmax.bf16 %v921_v34, %v732_v14  ;;  %v1097_v39 = vmax.bf16 %v1053_v60, %v732_v14  ;;  %v389_v35 = vsel %vm1309_vm5, %v384_v63, %v388_v1 }
  0x62   : > { %v735_v42 = vsel %vm1301_vm4, %v733_v36, %v734_v37  ;;  %v394_v32 = vshll.u32 %v1552_v9, 16  ;;  %v607_v46 = vmax.bf16 %v389_v35, %v1522_v30  ;;  %v922_v47 = vmax.bf16 %v864_v10, %v389_v35 }
  0x63   : > { %v865_v45 = vmax.bf16 %v833_v38, %v1552_v9  ;;  %1130 = vst.msk [vmem:[%s1375_s15 + $0x30] sm:$0xf] %vm1117_vm6, %v1097_v39  ;;  %v1054_v48 = vmax.bf16 %v996_v40, %v389_v35  ;;  %v393_v50 = vrot.slane %v391_v43, 4  ;;  %v400_v52 = vshll.u32 %v1559_v41, 16  ;;  %v1611_v40 = vld [vmem:[%s1275_s11 + $0x84] sm:$0xf] }
  0x64   : > { %v396_v51 = vrot.slane %v394_v32, 5  ;;  %v1222_v54 = vrot.slane %v1552_v9, 9  ;;  %v834_v3 = vmax.bf16 %v735_v42, %v607_v46  ;;  %v966_v56 = vmax.bf16 %v922_v47, %v735_v42 }
  0x65   : > { %v1098_v49 = vmax.bf16 %v1054_v48, %v735_v42  ;;  %v738_v57 = vrot.slane %v1559_v41, 5  ;;  %v402_v30 = vrot.slane %v400_v52, 5  ;;  %v997_v62 = vmax.bf16 %v965_v4, %v1552_v9 }
  0x66   : > { %v397_v59 = vor.u32 %v396_v51, %v393_v50  ;;  %v404_v0 = vshrl.u32 %v1559_v41, 16  ;;  %v866_v5 = vmax.bf16 %v834_v3, %v1559_v41  ;;  %v410_v7 = vshll.u32 %v146_v44, 16 }
  0x67   : > { %1131 = vst.msk [vmem:[%s1375_s15 + $0x34] sm:$0xf] %vm1117_vm6, %v1098_v49  ;;  %v739_v6 = vsel %vm1301_vm4, %v1222_v54, %v738_v57  ;;  %v740_v8 = vrot.slane %v738_v57, 4  ;;  %v741_v14 = vrot.slane %v146_v44, 5  ;;  %v998_v53 = vmax.bf16 %v966_v56, %v1559_v41  ;;  %v1622_v49 = vld [vmem:[%s1275_s11 + $0x88] sm:$0xf] }
  0x68   : > { %v398_v12 = vrot.slane %v397_v59, 4  ;;  %v406_v13 = vrot.slane %v404_v0, 4  ;;  %v412_v15 = vrot.slane %v410_v7, 5  ;;  %v415_v16 = vshrl.u32 %v1577_v58, 16 }
  0x69   : > { %v418_v17 = vshll.u32 %v1577_v58, 16  ;;  %v424_v2 = vshll.u32 %v1581_v55, 16  ;;  %v742_v20 = vsel %vm1301_vm4, %v740_v8, %v741_v14  ;;  %v1223_v21 = vrot.slane %v1577_v58, 9 }
  0x6a   : > { %v403_v18 = vsel %vm1309_vm5, %v398_v12, %v402_v30  ;;  %v407_v61 = vor.u32 %v406_v13, %v402_v30  ;;  %v417_v28 = vrot.slane %v415_v16, 4  ;;  %v745_v11 = vrot.slane %v1581_v55, 5 }
  0x6b   : > { %v608_v23 = vmax.bf16 %v403_v18, %v1552_v9  ;;  %v923_v24 = vmax.bf16 %v865_v45, %v403_v18  ;;  %v1055_v25 = vmax.bf16 %v997_v62, %v403_v18  ;;  %v420_v19 = vrot.slane %v418_v17, 5  ;;  %v152_v17 = vld [vmem:[%s1275_s11 + $0x8c] sm:$0x1] }
  0x6c   : > { %v408_v29 = vrot.slane %v407_v61, 4  ;;  %v426_v31 = vrot.slane %v424_v2, 5  ;;  %v428_v63 = vshrl.u32 %v1581_v55, 16  ;;  %v746_v1 = vsel %vm1301_vm4, %v1223_v21, %v745_v11  ;;  %v1639_v2 = vld [vmem:[%s1275_s11 + $0x90] sm:$0xf] }
  0x6d   : > { %v835_v33 = vmax.bf16 %v739_v6, %v608_v23  ;;  %v967_v34 = vmax.bf16 %v923_v24, %v739_v6  ;;  %v1099_v60 = vmax.bf16 %v1055_v25, %v739_v6  ;;  %v421_v9 = vor.u32 %v420_v19, %v417_v28 }
  0x6e   : > { %v413_v10 = vsel %vm1309_vm5, %v408_v29, %v412_v15  ;;  %v434_v36 = vshll.u32 %v149_v26, 16  ;;  %v430_v43 = vrot.slane %v428_v63, 4  ;;  %v747_v48 = vrot.slane %v745_v11, 4 }
  0x6f   : > { %v867_v37 = vmax.bf16 %v835_v33, %v1577_v58  ;;  %1132 = vst.msk [vmem:[%s1375_s15 + $0x38] sm:$0xf] %vm1117_vm6, %v1099_v60  ;;  %v609_v38 = vmax.bf16 %v413_v10, %v1559_v41  ;;  %v924_v4 = vmax.bf16 %v866_v5, %v413_v10  ;;  %v1056_v39 = vmax.bf16 %v998_v53, %v413_v10 }
  0x70   : > { %v422_v35 = vrot.slane %v421_v9, 4  ;;  %v999_v42 = vmax.bf16 %v967_v34, %v1577_v58  ;;  %v436_v32 = vrot.slane %v434_v36, 5  ;;  %v431_v51 = vor.u32 %v430_v43, %v426_v31 }
  0x71   : > { %v836_v45 = vmax.bf16 %v742_v20, %v609_v38  ;;  %v968_v46 = vmax.bf16 %v924_v4, %v742_v20  ;;  %v1100_v47 = vmax.bf16 %v1056_v39, %v742_v20  ;;  %v748_v41 = vrot.slane %v149_v26, 5 }
  0x72   : > { %v427_v50 = vsel %vm1309_vm5, %v422_v35, %v426_v31  ;;  %v439_v52 = vshrl.u32 %v1611_v40, 16  ;;  %v432_v57 = vrot.slane %v431_v51, 4  ;;  %v442_v7 = vshll.u32 %v1611_v40, 16 }
  0x73   : > { %v868_v54 = vmax.bf16 %v836_v45, %v1581_v55  ;;  %1133 = vst.msk [vmem:[%s1375_s15 + $0x3c] sm:$0xf] %vm1117_vm6, %v1100_v47  ;;  %v610_v44 = vmax.bf16 %v427_v50, %v1577_v58  ;;  %v925_v3 = vmax.bf16 %v867_v37, %v427_v50  ;;  %v1057_v56 = vmax.bf16 %v999_v42, %v427_v50 }
  0x74   : > { %v749_v59 = vsel %vm1301_vm4, %v747_v48, %v748_v41  ;;  %v1000_v30 = vmax.bf16 %v968_v46, %v1581_v55  ;;  %v441_v62 = vrot.slane %v439_v52, 4  ;;  %v437_v58 = vsel %vm1309_vm5, %v432_v57, %v436_v32  ;;  %v155_v41 = vld [vmem:[%s1275_s11 + $0x98] sm:$0x1] }
  0x75   : > { %v837_v0 = vmax.bf16 %v746_v1, %v610_v44  ;;  %v969_v5 = vmax.bf16 %v925_v3, %v746_v1  ;;  %v1101_v6 = vmax.bf16 %v1057_v56, %v746_v1  ;;  %v448_v8 = vshll.u32 %v1622_v49, 16 }
  0x76   : > { %v1224_v12 = vrot.slane %v1611_v40, 9  ;;  %v752_v13 = vrot.slane %v1622_v49, 5  ;;  %v611_v53 = vmax.bf16 %v437_v58, %v1581_v55  ;;  %v926_v15 = vmax.bf16 %v868_v54, %v437_v58  ;;  %v1646_v55 = vld [vmem:[%s1275_s11 + $0x94] sm:$0xf] }
  0x77   : > { %v869_v14 = vmax.bf16 %v837_v0, %v1611_v40  ;;  %1134 = vst.msk [vmem:[%s1375_s15 + $0x40] sm:$0xf] %vm1117_vm6, %v1101_v6  ;;  %v1058_v16 = vmax.bf16 %v1000_v30, %v437_v58  ;;  %v444_v18 = vrot.slane %v442_v7, 5  ;;  %v450_v61 = vrot.slane %v448_v8, 5 }
  0x78   : > { %v753_v20 = vsel %vm1301_vm4, %v1224_v12, %v752_v13  ;;  %v1001_v21 = vmax.bf16 %v969_v5, %v1611_v40  ;;  %v838_v23 = vmax.bf16 %v749_v59, %v611_v53  ;;  %v970_v24 = vmax.bf16 %v926_v15, %v749_v59 }
  0x79   : > { %v1102_v25 = vmax.bf16 %v1058_v16, %v749_v59  ;;  %v452_v28 = vshrl.u32 %v1622_v49, 16  ;;  %v445_v26 = vor.u32 %v444_v18, %v441_v62  ;;  %v458_v29 = vshll.u32 %v152_v17, 16 }
  0x7a   : > { %v754_v19 = vrot.slane %v752_v13, 4  ;;  %v755_v31 = vrot.slane %v152_v17, 5  ;;  %v870_v11 = vmax.bf16 %v838_v23, %v1622_v49  ;;  %v1002_v34 = vmax.bf16 %v970_v24, %v1622_v49  ;;  %v1683_v24 = vld [vmem:[%s1275_s11 + $0xa0] sm:$0xf] }
  0x7b   : > { %1135 = vst.msk [vmem:[%s1375_s15 + $0x44] sm:$0xf] %vm1117_vm6, %v1102_v25  ;;  %v454_v33 = vrot.slane %v452_v28, 4  ;;  %v463_v60 = vshrl.u32 %v1639_v2, 16  ;;  %v446_v63 = vrot.slane %v445_v26, 4  ;;  %v460_v10 = vrot.slane %v458_v29, 5 }
  0x7c   : > { %v756_v9 = vsel %vm1301_vm4, %v754_v19, %v755_v31  ;;  %v466_v1 = vshll.u32 %v1639_v2, 16  ;;  %v472_v38 = vshll.u32 %v1646_v55, 16  ;;  %v1225_v4 = vrot.slane %v1639_v2, 9 }
  0x7d   : > { %v455_v36 = vor.u32 %v454_v33, %v450_v61  ;;  %v465_v37 = vrot.slane %v463_v60, 4  ;;  %v451_v39 = vsel %vm1309_vm5, %v446_v63, %v450_v61  ;;  %v759_v42 = vrot.slane %v1646_v55, 5 }
  0x7e   : > { %v468_v35 = vrot.slane %v466_v1, 5  ;;  %v476_v43 = vshrl.u32 %v1646_v55, 16  ;;  %v612_v32 = vmax.bf16 %v451_v39, %v1611_v40  ;;  %v927_v45 = vmax.bf16 %v869_v14, %v451_v39 }
  0x7f   : > { %v1059_v46 = vmax.bf16 %v1001_v21, %v451_v39  ;;  %v456_v47 = vrot.slane %v455_v36, 4  ;;  %v474_v50 = vrot.slane %v472_v38, 5  ;;  %v760_v51 = vsel %vm1301_vm4, %v1225_v4, %v759_v42  ;;  %v1701_v4 = vld [vmem:[%s1275_s11 + $0xa8] sm:$0xf] }
  0x80   : > { %v469_v48 = vor.u32 %v468_v35, %v465_v37  ;;  %v478_v52 = vrot.slane %v476_v43, 4  ;;  %v839_v54 = vmax.bf16 %v753_v20, %v612_v32  ;;  %v971_v44 = vmax.bf16 %v927_v45, %v753_v20 }
  0x81   : > { %v1103_v3 = vmax.bf16 %v1059_v46, %v753_v20  ;;  %v461_v56 = vsel %vm1309_vm5, %v456_v47, %v460_v10  ;;  %v482_v6 = vshll.u32 %v155_v41, 16  ;;  %v761_v18 = vrot.slane %v759_v42, 4  ;;  %v1705_v42 = vld [vmem:[%s1275_s11 + $0xac] sm:$0xf] }
  0x82   : > { %v613_v40 = vmax.bf16 %v461_v56, %v1622_v49  ;;  %v928_v57 = vmax.bf16 %v870_v11, %v461_v56  ;;  %v1060_v59 = vmax.bf16 %v1002_v34, %v461_v56  ;;  %v470_v30 = vrot.slane %v469_v48, 4  ;;  %v1676_v49 = vld [vmem:[%s1275_s11 + $0x9c] sm:$0xf] }
  0x83   : > { %v871_v62 = vmax.bf16 %v839_v54, %v1639_v2  ;;  %1136 = vst.msk [vmem:[%s1375_s15 + $0x48] sm:$0xf] %vm1117_vm6, %v1103_v3  ;;  %v1003_v0 = vmax.bf16 %v971_v44, %v1639_v2  ;;  %v479_v5 = vor.u32 %v478_v52, %v474_v50  ;;  %v484_v17 = vrot.slane %v482_v6, 5  ;;  %v161_v6 = vld [vmem:[%s1275_s11 + $0xb0] sm:$0x1] }
  0x84   : > { %v840_v7 = vmax.bf16 %v756_v9, %v613_v40  ;;  %v972_v58 = vmax.bf16 %v928_v57, %v756_v9  ;;  %v1104_v8 = vmax.bf16 %v1060_v59, %v756_v9  ;;  %v475_v12 = vsel %vm1309_vm5, %v470_v30, %v474_v50  ;;  %v158_v9 = vld [vmem:[%s1275_s11 + $0xa4] sm:$0x1] }
  0x85   : > { %v614_v13 = vmax.bf16 %v475_v12, %v1639_v2  ;;  %v929_v14 = vmax.bf16 %v871_v62, %v475_v12  ;;  %v1061_v53 = vmax.bf16 %v1003_v0, %v475_v12  ;;  %v480_v15 = vrot.slane %v479_v5, 4 }
  0x86   : > { %v872_v16 = vmax.bf16 %v840_v7, %v1646_v55  ;;  %1137 = vst.msk [vmem:[%s1375_s15 + $0x4c] sm:$0xf] %vm1117_vm6, %v1104_v8  ;;  %v762_v61 = vrot.slane %v155_v41, 5  ;;  %v1004_v25 = vmax.bf16 %v972_v58, %v1646_v55  ;;  %v487_v26 = vshrl.u32 %v1676_v49, 16 }
  0x87   : > { %v841_v20 = vmax.bf16 %v760_v51, %v614_v13  ;;  %v973_v21 = vmax.bf16 %v929_v14, %v760_v51  ;;  %v1105_v23 = vmax.bf16 %v1061_v53, %v760_v51  ;;  %v485_v2 = vsel %vm1309_vm5, %v480_v15, %v484_v17 }
  0x88   : > { %v763_v28 = vsel %vm1301_vm4, %v761_v18, %v762_v61  ;;  %v490_v29 = vshll.u32 %v1676_v49, 16  ;;  %v615_v31 = vmax.bf16 %v485_v2, %v1646_v55  ;;  %v930_v11 = vmax.bf16 %v872_v16, %v485_v2 }
  0x89   : > { %v873_v19 = vmax.bf16 %v841_v20, %v1676_v49  ;;  %1138 = vst.msk [vmem:[%s1375_s15 + $0x50] sm:$0xf] %vm1117_vm6, %v1105_v23  ;;  %v1062_v33 = vmax.bf16 %v1004_v25, %v485_v2  ;;  %v489_v34 = vrot.slane %v487_v26, 4  ;;  %v496_v63 = vshll.u32 %v1683_v24, 16  ;;  %v1735_v25 = vld [vmem:[%s1275_s11 + $0xb4] sm:$0xf] }
  0x8a   : > { %v492_v60 = vrot.slane %v490_v29, 5  ;;  %v1226_v10 = vrot.slane %v1676_v49, 9  ;;  %v842_v1 = vmax.bf16 %v763_v28, %v615_v31  ;;  %v974_v36 = vmax.bf16 %v930_v11, %v763_v28 }
  0x8b   : > { %v1106_v37 = vmax.bf16 %v1062_v33, %v763_v28  ;;  %v766_v38 = vrot.slane %v1683_v24, 5  ;;  %v498_v55 = vrot.slane %v496_v63, 5  ;;  %v1005_v35 = vmax.bf16 %v973_v21, %v1676_v49 }
  0x8c   : > { %v493_v39 = vor.u32 %v492_v60, %v489_v34  ;;  %v500_v43 = vshrl.u32 %v1683_v24, 16  ;;  %v874_v32 = vmax.bf16 %v842_v1, %v1683_v24  ;;  %v506_v46 = vshll.u32 %v158_v9, 16 }
  0x8d   : > { %1139 = vst.msk [vmem:[%s1375_s15 + $0x54] sm:$0xf] %vm1117_vm6, %v1106_v37  ;;  %v767_v45 = vsel %vm1301_vm4, %v1226_v10, %v766_v38  ;;  %v768_v47 = vrot.slane %v766_v38, 4  ;;  %v769_v51 = vrot.slane %v158_v9, 5  ;;  %v1006_v41 = vmax.bf16 %v974_v36, %v1683_v24  ;;  %v1746_v37 = vld [vmem:[%s1275_s11 + $0xb8] sm:$0xf] }
  0x8e   : > { %v494_v48 = vrot.slane %v493_v39, 4  ;;  %v502_v50 = vrot.slane %v500_v43, 4  ;;  %v508_v52 = vrot.slane %v506_v46, 5  ;;  %v511_v54 = vshrl.u32 %v1701_v4, 16 }
  0x8f   : > { %v514_v44 = vshll.u32 %v1701_v4, 16  ;;  %v520_v3 = vshll.u32 %v1705_v42, 16  ;;  %v770_v57 = vsel %vm1301_vm4, %v768_v47, %v769_v51  ;;  %v1227_v59 = vrot.slane %v1701_v4, 9 }
  0x90   : > { %v499_v56 = vsel %vm1309_vm5, %v494_v48, %v498_v55  ;;  %v503_v40 = vor.u32 %v502_v50, %v498_v55  ;;  %v513_v5 = vrot.slane %v511_v54, 4  ;;  %v773_v12 = vrot.slane %v1705_v42, 5 }
  0x91   : > { %v616_v30 = vmax.bf16 %v499_v56, %v1676_v49  ;;  %v931_v62 = vmax.bf16 %v873_v19, %v499_v56  ;;  %v1063_v0 = vmax.bf16 %v1005_v35, %v499_v56  ;;  %v516_v58 = vrot.slane %v514_v44, 5  ;;  %v164_v44 = vld [vmem:[%s1275_s11 + $0xbc] sm:$0x1] }
  0x92   : > { %v504_v7 = vrot.slane %v503_v40, 4  ;;  %v522_v8 = vrot.slane %v520_v3, 5  ;;  %v524_v15 = vshrl.u32 %v1705_v42, 16  ;;  %v774_v17 = vsel %vm1301_vm4, %v1227_v59, %v773_v12  ;;  %v165_v59 = vld [vmem:[%s1275_s11 + $0xc0] sm:$0xf] }
  0x93   : > { %v843_v13 = vmax.bf16 %v767_v45, %v616_v30  ;;  %v975_v14 = vmax.bf16 %v931_v62, %v767_v45  ;;  %v1107_v53 = vmax.bf16 %v1063_v0, %v767_v45  ;;  %v517_v49 = vor.u32 %v516_v58, %v513_v5 }
  0x94   : > { %v509_v16 = vsel %vm1309_vm5, %v504_v7, %v508_v52  ;;  %v530_v18 = vshll.u32 %v161_v6, 16  ;;  %v526_v26 = vrot.slane %v524_v15, 4  ;;  %v775_v33 = vrot.slane %v773_v12, 4 }
  0x95   : > { %v875_v61 = vmax.bf16 %v843_v13, %v1701_v4  ;;  %1140 = vst.msk [vmem:[%s1375_s15 + $0x58] sm:$0xf] %vm1117_vm6, %v1107_v53  ;;  %v617_v20 = vmax.bf16 %v509_v16, %v1683_v24  ;;  %v932_v21 = vmax.bf16 %v874_v32, %v509_v16  ;;  %v1064_v23 = vmax.bf16 %v1006_v41, %v509_v16 }
  0x96   : > { %v518_v2 = vrot.slane %v517_v49, 4  ;;  %v1007_v28 = vmax.bf16 %v975_v14, %v1701_v4  ;;  %v532_v29 = vrot.slane %v530_v18, 5  ;;  %v527_v60 = vor.u32 %v526_v26, %v522_v8 }
  0x97   : > { %v844_v19 = vmax.bf16 %v770_v57, %v617_v20  ;;  %v976_v31 = vmax.bf16 %v932_v21, %v770_v57  ;;  %v1108_v11 = vmax.bf16 %v1064_v23, %v770_v57  ;;  %v776_v24 = vrot.slane %v161_v6, 5 }
  0x98   : > { %v523_v34 = vsel %vm1309_vm5, %v518_v2, %v522_v8  ;;  %v535_v63 = vshrl.u32 %v1735_v25, 16  ;;  %v528_v38 = vrot.slane %v527_v60, 4  ;;  %v538_v46 = vshll.u32 %v1735_v25, 16  ;;  %v166_v8 = vld [vmem:[%s1275_s11 + $0xc4] sm:$0xf] }
  0x99   : > { %v876_v10 = vmax.bf16 %v844_v19, %v1705_v42  ;;  %1141 = vst.msk [vmem:[%s1375_s15 + $0x5c] sm:$0xf] %vm1117_vm6, %v1108_v11  ;;  %v618_v9 = vmax.bf16 %v523_v34, %v1701_v4  ;;  %v933_v1 = vmax.bf16 %v875_v61, %v523_v34  ;;  %v1065_v36 = vmax.bf16 %v1007_v28, %v523_v34 }
  0x9a   : > { %v777_v39 = vsel %vm1301_vm4, %v775_v33, %v776_v24  ;;  %v1008_v55 = vmax.bf16 %v976_v31, %v1705_v42  ;;  %v537_v35 = vrot.slane %v535_v63, 4  ;;  %v533_v4 = vsel %vm1309_vm5, %v528_v38, %v532_v29  ;;  %v167_v24 = vld [vmem:[%s1275_s11 + $0xc8] sm:$0x1] }
  0x9b   : > { %v845_v43 = vmax.bf16 %v774_v17, %v618_v9  ;;  %v977_v32 = vmax.bf16 %v933_v1, %v774_v17  ;;  %v1109_v45 = vmax.bf16 %v1065_v36, %v774_v17  ;;  %v544_v47 = vshll.u32 %v1746_v37, 16 }
  0x9c   : > { %v1228_v48 = vrot.slane %v1735_v25, 9  ;;  %v780_v50 = vrot.slane %v1746_v37, 5  ;;  %v619_v41 = vmax.bf16 %v533_v4, %v1705_v42  ;;  %v934_v52 = vmax.bf16 %v876_v10, %v533_v4 }
  0x9d   : > { %v877_v51 = vmax.bf16 %v845_v43, %v1735_v25  ;;  %1142 = vst.msk [vmem:[%s1375_s15 + $0x60] sm:$0xf] %vm1117_vm6, %v1109_v45  ;;  %v1066_v54 = vmax.bf16 %v1008_v55, %v533_v4  ;;  %v540_v3 = vrot.slane %v538_v46, 5  ;;  %v546_v56 = vrot.slane %v544_v47, 5 }
  0x9e   : > { %v781_v40 = vsel %vm1301_vm4, %v1228_v48, %v780_v50  ;;  %v1009_v57 = vmax.bf16 %v977_v32, %v1735_v25  ;;  %v846_v30 = vmax.bf16 %v777_v39, %v619_v41  ;;  %v978_v62 = vmax.bf16 %v934_v52, %v777_v39 }
  0x9f   : > { %v1110_v0 = vmax.bf16 %v1066_v54, %v777_v39  ;;  %v548_v5 = vshrl.u32 %v1746_v37, 16  ;;  %v541_v6 = vor.u32 %v540_v3, %v537_v35  ;;  %v554_v42 = vshll.u32 %v164_v44, 16 }
  0xa0   : > { %v782_v7 = vrot.slane %v780_v50, 4  ;;  %v783_v58 = vrot.slane %v164_v44, 5  ;;  %v878_v12 = vmax.bf16 %v846_v30, %v1746_v37  ;;  %v1010_v14 = vmax.bf16 %v978_v62, %v1746_v37  ;;  %v168_v50 = vld [vmem:[%s1275_s11 + $0xcc] sm:$0xf] }
  0xa1   : > { %1143 = vst.msk [vmem:[%s1375_s15 + $0x64] sm:$0xf] %vm1117_vm6, %v1110_v0  ;;  %v550_v13 = vrot.slane %v548_v5, 4  ;;  %v882_v53 = vshrl.u32 %v165_v59, 16  ;;  %v542_v15 = vrot.slane %v541_v6, 4  ;;  %v556_v16 = vrot.slane %v554_v42, 5 }
  0xa2   : > { %v784_v49 = vsel %vm1301_vm4, %v782_v7, %v783_v58  ;;  %v885_v17 = vshll.u32 %v165_v59, 16  ;;  %v891_v20 = vshll.u32 %v166_v8, 16  ;;  %v1229_v21 = vrot.slane %v165_v59, 9  ;;  %v170_v6 = vld [vmem:[%s1275_s11 + $0xd4] sm:$0x1] }
  0xa3   : > { %v551_v18 = vor.u32 %v550_v13, %v546_v56  ;;  %v884_v61 = vrot.slane %v882_v53, 4  ;;  %v547_v23 = vsel %vm1309_vm5, %v542_v15, %v546_v56  ;;  %v944_v28 = vrot.slane %v166_v8, 5 }
  0xa4   : > { %v887_v2 = vrot.slane %v885_v17, 5  ;;  %v895_v26 = vshrl.u32 %v166_v8, 16  ;;  %v620_v29 = vmax.bf16 %v547_v23, %v1735_v25  ;;  %v935_v19 = vmax.bf16 %v877_v51, %v547_v23 }
  0xa5   : > { %v1067_v31 = vmax.bf16 %v1009_v57, %v547_v23  ;;  %v552_v11 = vrot.slane %v551_v18, 4  ;;  %v893_v34 = vrot.slane %v891_v20, 5  ;;  %v945_v60 = vsel %vm1301_vm4, %v1229_v21, %v944_v28 }
  0xa6   : > { %v888_v33 = vor.u32 %v887_v2, %v884_v61  ;;  %v897_v63 = vrot.slane %v895_v26, 4  ;;  %v847_v10 = vmax.bf16 %v781_v40, %v620_v29  ;;  %v979_v9 = vmax.bf16 %v935_v19, %v781_v40 }
  0xa7   : > { %v1111_v1 = vmax.bf16 %v1067_v31, %v781_v40  ;;  %v557_v36 = vsel %vm1309_vm5, %v552_v11, %v556_v16  ;;  %v901_v45 = vshll.u32 %v167_v24, 16  ;;  %v946_v44 = vrot.slane %v944_v28, 4  ;;  %v169_v40 = vld [vmem:[%s1275_s11 + $0xd0] sm:$0xf] }
  0xa8   : > { %v621_v25 = vmax.bf16 %v557_v36, %v1746_v37  ;;  %v936_v38 = vmax.bf16 %v878_v12, %v557_v36  ;;  %v1068_v39 = vmax.bf16 %v1010_v14, %v557_v36  ;;  %v889_v55 = vrot.slane %v888_v33, 4 }
  0xa9   : > { %1144 = vst.msk [vmem:[%s1375_s15 + $0x68] sm:$0xf] %vm1117_vm6, %v1111_v1  ;;  %v879_v35 = vmax.bf16 %v847_v10, %v165_v59  ;;  %v1011_v43 = vmax.bf16 %v979_v9, %v165_v59  ;;  %v898_v32 = vor.u32 %v897_v63, %v893_v34  ;;  %v903_v52 = vrot.slane %v901_v45, 5 }
  0xaa   : > { %v848_v46 = vmax.bf16 %v784_v49, %v621_v25  ;;  %v980_v4 = vmax.bf16 %v936_v38, %v784_v49  ;;  %v1112_v47 = vmax.bf16 %v1068_v39, %v784_v49  ;;  %v894_v48 = vsel %vm1309_vm5, %v889_v55, %v893_v34 }
  0xab   : > { %v937_v51 = vmax.bf16 %v894_v48, %v879_v35  ;;  %v1069_v37 = vmax.bf16 %v1011_v43, %v894_v48  ;;  %v899_v41 = vrot.slane %v898_v32, 4  ;;  %v947_v3 = vrot.slane %v167_v24, 5 }
  0xac   : > { %1145 = vst.msk [vmem:[%s1375_s15 + $0x6c] sm:$0xf] %vm1117_vm6, %v1112_v47  ;;  %v880_v54 = vmax.bf16 %v848_v46, %v166_v8  ;;  %v1012_v56 = vmax.bf16 %v980_v4, %v166_v8  ;;  %v1016_v30 = vshrl.u32 %v168_v50, 16  ;;  %v1019_v5 = vshll.u32 %v168_v50, 16 }
  0xad   : > { %v1113_v57 = vmax.bf16 %v1069_v37, %v945_v60  ;;  %v904_v59 = vsel %vm1309_vm5, %v899_v41, %v903_v52  ;;  %v981_v42 = vmax.bf16 %v945_v60, %v937_v51  ;;  %v948_v7 = vsel %vm1301_vm4, %v946_v44, %v947_v3 }
  0xae   : > { %v938_v62 = vmax.bf16 %v904_v59, %v880_v54  ;;  %v1070_v0 = vmax.bf16 %v1012_v56, %v904_v59  ;;  %v1018_v58 = vrot.slane %v1016_v30, 4  ;;  %v1025_v12 = vshll.u32 %v169_v40, 16 }
  0xaf   : > { %1146 = vst.msk [vmem:[%s1375_s15 + $0x70] sm:$0xf] %vm1117_vm6, %v1113_v57  ;;  %v1021_v13 = vrot.slane %v1019_v5, 5  ;;  %v1078_v53 = vrot.slane %v169_v40, 5  ;;  %v1029_v15 = vshrl.u32 %v169_v40, 16  ;;  %v1035_v16 = vshll.u32 %v170_v6, 16 }
  0xb0   : > { %v1114_v8 = vmax.bf16 %v1070_v0, %v948_v7  ;;  %v1027_v14 = vrot.slane %v1025_v12, 5  ;;  %v982_v49 = vmax.bf16 %v948_v7, %v938_v62  ;;  %v1230_v18 = vrot.slane %v168_v50, 9 }
  0xb1   : > { %v1022_v17 = vor.u32 %v1021_v13, %v1018_v58  ;;  %v1013_v61 = vmax.bf16 %v981_v42, %v168_v50  ;;  %v1031_v20 = vrot.slane %v1029_v15, 4  ;;  %v1037_v2 = vrot.slane %v1035_v16, 5 }
  0xb2   : > { %1147 = vst.msk [vmem:[%s1375_s15 + $0x74] sm:$0xf] %vm1117_vm6, %v1114_v8  ;;  %v1080_v28 = vrot.slane %v1078_v53, 4  ;;  %v1081_v26 = vrot.slane %v170_v6, 5  ;;  %v1079_v19 = vsel %vm1301_vm4, %v1230_v18, %v1078_v53  ;;  %v1014_v31 = vmax.bf16 %v982_v49, %v169_v40 }
  0xb3   : > { %v1023_v21 = vrot.slane %v1022_v17, 4  ;;  %v1032_v23 = vor.u32 %v1031_v20, %v1027_v14 }
  0xb4   : > { %v1082_v24 = vsel %vm1301_vm4, %v1080_v28, %v1081_v26 }
  0xb5   : > { %v1028_v29 = vsel %vm1309_vm5, %v1023_v21, %v1027_v14  ;;  %v1033_v33 = vrot.slane %v1032_v23, 4 }
  0xb6   : > { %v1071_v11 = vmax.bf16 %v1028_v29, %v1013_v61 }
  0xb7   : > { %v1038_v60 = vsel %vm1309_vm5, %v1033_v33, %v1037_v2 }
  0xb8   : > { %v1115_v34 = vmax.bf16 %v1079_v19, %v1071_v11  ;;  %v1072_v63 = vmax.bf16 %v1038_v60, %v1014_v31 }
  0xba   : > { %1148 = vst.msk [vmem:[%s1375_s15 + $0x78] sm:$0xf] %vm1117_vm6, %v1115_v34  ;;  %v1116_v10 = vmax.bf16 %v1082_v24, %v1072_v63 }
  0xbc   : > { %1149 = vst.msk [vmem:[%s1375_s15 + $0x7c] sm:$0xf] %vm1117_vm6, %v1116_v10 }
  0xbd PF: > { %s11_s6 = sadd.s32 1, %s1249_s6  }
  0xbe   : > { %p8_p4 = scmp.ge.s32.totalorder %s11_s6, 4  }
  0xc0   :  { %10 = sbr.rel (!%p8_p4) target bundleno = 1 (0x1), region = 54 }

// kernel: backbone2d_resnet18_layer1.8
= control target key start
LH: loop header
LB: loop body
LE: loop exit
PB: predicated region body
PF: predicated region fallthrough
CT: control target
= control target key end

     0   :  { %s2124_s12 = smov 0   ;;  %s2553_s0 = inlined_call_operand.vmem [shape: bf16[2,10,10,64], index: 0, kind: input, shape index: {}]   ;;  %s2554_s1 = inlined_call_operand.vmem [shape: bf16[9,64,64], index: 1, kind: input, shape index: {}]   ;;  %s2555_s2 = inlined_call_operand.vmem [shape: f32[1,64], index: 2, kind: input, shape index: {}]   ;;  %s2556_s3 = inlined_call_operand.vmem [shape: bf16[2,8,8,64], index: 3, kind: output, shape index: {}]  }
   0x1 LB: > { %s1569_s13 = sadd.s32 4294967295, %s2102_s12   ;;  %p1573_p0 = scmp.ge.s32.totalorder %s2102_s12, 1  ;;  %s2102_s12 = sphi %s2124_s12, %s13_s12  }
   0x2   : > { %p137_p1 = scmp.lt.s32.totalorder %s2102_s12, 3 }
   0x4   : > { %p138_p2 = pnand %p1573_p0, %p137_p1 }
   0x5   : > { %v2051_v0 = vld [vmem:[%s2554_s1 + $0x20] sm:$0xff] (!%p138_p2)   ;;  %p161_p3 = scmp.lt.s32.totalorder (!%p138_p2), %s1569_s13, 1  ;;  %v2053_v2 = vld [vmem:[%s2554_s1 + $0x28] sm:$0xff] (!%p138_p2)   ;;  %v2055_v4 = vld [vmem:[%s2554_s1 + $0x30] sm:$0xff] (!%p138_p2)   ;;  %vm200_vm0 = vsmask.f32 (!%p138_p2), 3328 }
   0x6   : > { %141 = sbr.rel (%p138_p2) target bundleno = 327 (0x147), region = 32  ;;  %v2052_v1 = vld [vmem:[%s2554_s1 + $0x80] sm:$0xff] (!%p138_p2)   ;;  %1826 = vmatprep.subr.bf16.mxu1 (!%p138_p2), %v2051_v0  ;;  %v2054_v3 = vld [vmem:[%s2554_s1 + $0x88] sm:$0xff] (!%p138_p2)   ;;  %v2056_v5 = vld [vmem:[%s2554_s1 + $0x90] sm:$0xff] (!%p138_p2)   ;;  %vm201_vm1 = vsmask.f32 (!%p138_p2), 7440 }
   0x7   : > { %1890 = vmatprep.subr.bf16.mxu0 (!%p138_p2), %v2052_v1  ;;  %1827 = vmatpush3.bf16.msra.mxu1 (!%p138_p2), %v2051_v0  ;;  %v2057_v6 = vld [vmem:[%s2554_s1 + $0x38] sm:$0xff] (!%p138_p2)   ;;  %v2185_v22 = vld [vmem:[%s2554_s1] sm:$0xff] (!%p138_p2)   ;;  %vm2209_vm2 = vmor (!%p138_p2), %vm200_vm0, %vm201_vm1  ;;  %vm360_vm3 = vcmask (!%p138_p2), 523264   ;;  %vm567_vm4 = vcmask (!%p138_p2), 1042432   ;;  %vm568_vm5 = vcmask (!%p138_p2), 1046532   ;;  %vm1505_vm7 = vcmask (!%p138_p2), 519168  }
   0x8   : > { %1891 = vmatpush3.bf16.msra.mxu0 (!%p138_p2), %v2052_v1  ;;  %1828 = vmatprep.subr.bf16.mxu1 (!%p138_p2), %v2053_v2  ;;  %v2058_v10 = vld [vmem:[%s2554_s1 + $0x98] sm:$0xff] (!%p138_p2)   ;;  %v2190_v23 = vld [vmem:[%s2554_s1 + $0xa0] sm:$0xff] (!%p138_p2)   ;;  %vm2306_vm6 = vmor (!%p138_p2), %vm567_vm4, %vm568_vm5 }
   0x9   : > { %1892 = vmatprep.subr.bf16.mxu0 (!%p138_p2), %v2054_v3 }
   0xb   : > { %1829 = vmatpush3.bf16.msra.mxu1 (!%p138_p2), %v2053_v2 }
   0xc   : > { %1893 = vmatpush3.bf16.msra.mxu0 (!%p138_p2), %v2054_v3  ;;  %1830 = vmatprep.subr.bf16.mxu1 (!%p138_p2), %v2055_v4 }
   0xd   : > { %s2562_s13 = smov (!%p161_p3, %s1569_s13), 1  ;;  %1894 = vmatprep.subr.bf16.mxu0 %v2056_v5 }
   0xe   : > { %s2042_s24 = smul.u32 80, %s2562_s13  ;;  %s1753_s17 = sshll.u32 %s2562_s13, 5 }
   0xf   : > { %1831 = vmatpush3.bf16.msra.mxu1 %v2055_v4  ;;  %s170_s20 = scalar_lea.vmem %s2556_s3, %s1753_s17 }
  0x10   : > { %s2156_s29 = scalar_lea.vmem %s2553_s0, %s2042_s24  ;;  %1895 = vmatpush3.bf16.msra.mxu0 %v2056_v5  ;;  %1832 = vmatprep.subr.bf16.mxu1 %v2057_v6 }
  0x11   : > { %v2162_v7 = vld [vmem:[%s2156_s29] sm:$0xf]  ;;  %v2165_v8 = vld [vmem:[%s2156_s29 + $0x4] sm:$0x1]  ;;  %v2168_v9 = vld [vmem:[%s2156_s29 + $0x8] sm:$0xf]  ;;  %1896 = vmatprep.subr.bf16.mxu0 %v2058_v10 }
  0x12   : > { %v2174_v11 = vld [vmem:[%s2156_s29 + $0xc] sm:$0x1]  ;;  %v204_v12 = vshrl.u32 %v2162_v7, 16  ;;  %v207_v13 = vshll.u32 %v2162_v7, 16  ;;  %v213_v14 = vshll.u32 %v2165_v8, 16  ;;  %v218_v15 = vshrl.u32 %v2168_v9, 16 }
  0x13   : > { %v221_v16 = vshll.u32 %v2168_v9, 16  ;;  %v227_v17 = vshll.u32 %v2174_v11, 16  ;;  %v2193_v26 = vld [vmem:[%s2156_s29 + $0x10] sm:$0xf]  ;;  %v2196_v27 = vld [vmem:[%s2156_s29 + $0x14] sm:$0x1]  ;;  %1833 = vmatpush3.bf16.msra.mxu1 %v2057_v6 }
  0x14   : > { %v206_v18 = vrot.slane %v204_v12, 4  ;;  %v209_v19 = vrot.slane %v207_v13, 5  ;;  %v215_v20 = vrot.slane %v213_v14, 5  ;;  %v220_v21 = vrot.slane %v218_v15, 4  ;;  %v2199_v29 = vld [vmem:[%s2156_s29 + $0x18] sm:$0xf]  ;;  %1897 = vmatpush3.bf16.msra.mxu0 %v2058_v10  ;;  %1842 = vmatprep.subr.bf16.mxu1 %v2185_v22 }
  0x15   : > { %v223_v24 = vrot.slane %v221_v16, 5  ;;  %v229_v25 = vrot.slane %v227_v17, 5  ;;  %v2202_v30 = vld [vmem:[%s2156_s29 + $0x1c] sm:$0x1]  ;;  %v2205_v31 = vld [vmem:[%s2156_s29 + $0x20] sm:$0xf]  ;;  %1906 = vmatprep.subr.bf16.mxu0 %v2190_v23 }
  0x16   : > { %v210_v28 = vor.u32 %v209_v19, %v206_v18  ;;  %v2214_v34 = vld [vmem:[%s2156_s29 + $0x24] sm:$0x1]  ;;  %v232_v35 = vshrl.u32 %v2193_v26, 16  ;;  %v235_v36 = vshll.u32 %v2193_v26, 16  ;;  %v241_v37 = vshll.u32 %v2196_v27, 16  ;;  %v2061_v18 = vld [vmem:[%s2554_s1 + $0x8] sm:$0xff]  }
  0x17   : > { %v224_v33 = vor.u32 %v223_v24, %v220_v21  ;;  %v246_v39 = vshrl.u32 %v2199_v29, 16  ;;  %v249_v40 = vshll.u32 %v2199_v29, 16  ;;  %v255_v41 = vshll.u32 %v2202_v30, 16  ;;  %v2232_v57 = vld [vmem:[%s2156_s29 + $0x28] sm:$0xf] }
  0x18   : > { %v211_v38 = vrot.slane %v210_v28, 4  ;;  %v234_v43 = vrot.slane %v232_v35, 4  ;;  %v237_v44 = vrot.slane %v235_v36, 5  ;;  %v243_v46 = vrot.slane %v241_v37, 5  ;;  %v2235_v61 = vld [vmem:[%s2156_s29 + $0x2c] sm:$0x1] }
  0x19   : > { %v225_v42 = vrot.slane %v224_v33, 4  ;;  %v248_v47 = vrot.slane %v246_v39, 4  ;;  %v251_v48 = vrot.slane %v249_v40, 5  ;;  %v260_v51 = vshrl.u32 %v2205_v31, 16  ;;  %v2247_v13 = vld [vmem:[%s2156_s29 + $0x30] sm:$0xf] }
  0x1a   : > { %v216_v45 = vsel %vm2209_vm2, %v211_v38, %v215_v20  ;;  %v238_v50 = vor.u32 %v237_v44, %v234_v43  ;;  %v263_v52 = vshll.u32 %v2205_v31, 16  ;;  %v257_v55 = vrot.slane %v255_v41, 5  ;;  %v2250_v14 = vld [vmem:[%s2156_s29 + $0x34] sm:$0x1]  ;;  %v2062_v20 = vld [vmem:[%s2554_s1 + $0xa8] sm:$0xff]  }
  0x1b   : > { %v230_v49 = vsel %vm2209_vm2, %v225_v42, %v229_v25  ;;  %v252_v54 = vor.u32 %v251_v48, %v248_v47  ;;  %v269_v56 = vshll.u32 %v2214_v34, 16  ;;  %v262_v59 = vrot.slane %v260_v51, 4  ;;  %v2270_v36 = vld [vmem:[%s2156_s29 + $0x38] sm:$0xf]  ;;  %v2273_v37 = vld [vmem:[%s2156_s29 + $0x3c] sm:$0x1] }
  0x1c   : > { %v1585_v53 = vcombine.low %v216_v45, %v230_v49  ;;  %v239_v58 = vrot.slane %v238_v50, 4  ;;  %v265_v60 = vrot.slane %v263_v52, 5  ;;  %v274_v0 = vshrl.u32 %v2232_v57, 16  ;;  %v2276_v38 = vld [vmem:[%s2156_s29 + $0x40] sm:$0xf]  ;;  %v2063_v40 = vld [vmem:[%s2554_s1 + $0x10] sm:$0xff]  }
  0x1d   : > { %v253_v62 = vrot.slane %v252_v54, 4  ;;  %v271_v63 = vrot.slane %v269_v56, 5  ;;  %v277_v3 = vshll.u32 %v2232_v57, 16  ;;  %v283_v4 = vshll.u32 %v2235_v61, 16  ;;  %v2283_v44 = vld [vmem:[%s2156_s29 + $0x44] sm:$0x1] }
  0x1e   : > { %1834 = vmatprep.mubr.msk.bf16.mxu1 %vm360_vm3, %v1585_v53  ;;  %v244_v1 = vsel %vm2209_vm2, %v239_v58, %v243_v46  ;;  %v266_v2 = vor.u32 %v265_v60, %v262_v59  ;;  %v576_v5 = vrot.slane %v2174_v11, 5  ;;  %v276_v12 = vrot.slane %v274_v0, 4  ;;  %v2064_v54 = vld [vmem:[%s2554_s1 + $0xb0] sm:$0xff]  }
  0x1f   : > { %v258_v6 = vsel %vm2209_vm2, %v253_v62, %v257_v55  ;;  %v1665_v10 = vcombine.low %v230_v49, %v244_v1  ;;  %v580_v17 = vrot.slane %v2196_v27, 5  ;;  %v279_v19 = vrot.slane %v277_v3, 5 }
  0x20   : > { %v267_v15 = vrot.slane %v266_v2, 4  ;;  %v2252_v16 = vcombine.low %v244_v1, %v258_v6  ;;  %v285_v21 = vrot.slane %v283_v4, 5  ;;  %v288_v24 = vshrl.u32 %v2247_v13, 16 }
  0x21   : > { %1898 = vmatprep.mubr.msk.bf16.mxu0 %vm360_vm3, %v1665_v10  ;;  %v291_v25 = vshll.u32 %v2247_v13, 16  ;;  %v297_v28 = vshll.u32 %v2250_v14, 16  ;;  %v280_v35 = vor.u32 %v279_v19, %v276_v12  ;;  %v302_v46 = vshrl.u32 %v2270_v36, 16 }
  0x22   : > { %v272_v33 = vsel %vm2209_vm2, %v267_v15, %v271_v63  ;;  %1835 = vmatmul.mubr.msk.bf16.vlgmr.msra.gmra.mrb[0].mxu1 %vm360_vm3, %v2252_v16  ;;  %v290_v41 = vrot.slane %v288_v24, 4  ;;  %v305_v47 = vshll.u32 %v2270_v36, 16  ;;  %v311_v48 = vshll.u32 %v2273_v37, 16  ;;  %v2066_v15 = vld [vmem:[%s2554_s1 + $0xb8] sm:$0xff]  }
  0x23   : > { %v1666_v39 = vcombine.low %v258_v6, %v272_v33  ;;  %1843 = vmatpush3.bf16.msra.mxu1 %v2185_v22  ;;  %v293_v42 = vrot.slane %v291_v25, 5  ;;  %v299_v43 = vrot.slane %v297_v28, 5  ;;  %v281_v45 = vrot.slane %v280_v35, 4 }
  0x24   : > { %1844 = vmatprep.subr.bf16.mxu1 %v2061_v18  ;;  %v857_v49 = vshrl.u32 %v2276_v38, 16  ;;  %v860_v50 = vshll.u32 %v2276_v38, 16  ;;  %v866_v51 = vshll.u32 %v2283_v44, 16  ;;  %v584_v52 = vrot.slane %v2202_v30, 5 }
  0x25   : > { %1899 = vmatmul.mubr.msk.bf16.vlgmr.msra.gmra.mrb[0].mxu0 %vm360_vm3, %v1666_v39  ;;  %v294_v22 = vor.u32 %v293_v42, %v290_v41  ;;  %v286_v53 = vsel %vm2209_vm2, %v281_v45, %v285_v21  ;;  %v304_v55 = vrot.slane %v302_v46, 4  ;;  %v307_v56 = vrot.slane %v305_v47, 5  ;;  %v2372_v46 = vld [vmem:[%s2156_s29 + $0x48] sm:$0xf] }
  0x26   : > { %1907 = vmatpush3.bf16.msra.mxu0 %v2190_v23  ;;  %v2299_v58 = vcombine.low %v272_v33, %v286_v53  ;;  %v859_v60 = vrot.slane %v857_v49, 4  ;;  %v862_v62 = vrot.slane %v860_v50, 5  ;;  %v2065_v23 = vld [vmem:[%s2554_s1 + $0x18] sm:$0xff]   ;;  %v313_v63 = vrot.slane %v311_v48, 5 }
  0x27   : > { %1908 = vmatprep.subr.bf16.mxu0 %v2062_v20  ;;  %1845 = vmatpush3.bf16.msra.mxu1 %v2061_v18  ;;  %v295_v59 = vrot.slane %v294_v22, 4  ;;  %v308_v30 = vor.u32 %v307_v56, %v304_v55  ;;  %v1610_v1 = vrot.slane %v2168_v9, 9  ;;  %v868_v4 = vrot.slane %v866_v51, 5  ;;  %v2072_v56 = vld [vmem:[%s2554_s1 + $0xc8] sm:$0xff]  }
  0x28   : > { %1846 = vmatprep.subr.bf16.mxu1 %v2063_v40  ;;  %1838 = vmatprep.mubr.msk.bf16.mxu1 %vm360_vm3, %v2299_v58  ;;  %v863_v3 = vor.u32 %v862_v62, %v859_v60  ;;  %v1611_v6 = vrot.slane %v2193_v26, 9  ;;  %v1612_v21 = vrot.slane %v2199_v29, 9  ;;  %v588_v24 = vrot.slane %v2214_v34, 5  ;;  %v2068_v34 = vld [vmem:[%s2554_s1 + $0x40] sm:$0xff]  }
  0x29   : > { %v300_v2 = vsel %vm2209_vm2, %v295_v59, %v299_v43  ;;  %v309_v12 = vrot.slane %v308_v30, 4  ;;  %v2323_v19 = vsel %vm2306_vm6, %v1610_v1, %v576_v5  ;;  %v1613_v11 = vrot.slane %v2205_v31, 9  ;;  %v2074_v30 = vld [vmem:[%s2554_s1 + $0x50] sm:$0xff]  }
  0x2a   : > { %1909 = vmatpush3.bf16.msra.mxu0 %v2062_v20  ;;  %v1667_v10 = vcombine.low %v286_v53, %v300_v2  ;;  %v864_v18 = vrot.slane %v863_v3, 4  ;;  %v2329_v20 = vsel %vm2306_vm6, %v1611_v6, %v580_v17  ;;  %v1597_v17 = vcombine.low %v2162_v7, %v2168_v9 }
  0x2b   : > { %1910 = vmatprep.subr.bf16.mxu0 %v2064_v54  ;;  %1847 = vmatpush3.bf16.msra.mxu1 %v2063_v40  ;;  %v314_v25 = vsel %vm2209_vm2, %v309_v12, %v313_v63  ;;  %v1686_v33 = vcombine.low %v2323_v19, %v2329_v20  ;;  %v572_v35 = vrot.slane %v2165_v8, 5  ;;  %v2356_v39 = vsel %vm2306_vm6, %v1612_v21, %v584_v52  ;;  %v2069_v40 = vld [vmem:[%s2554_s1 + $0xc0] sm:$0xff]   ;;  %v2078_v21 = vld [vmem:[%s2554_s1 + $0xd8] sm:$0xff]  }
  0x2c   : > { %1902 = vmatprep.mubr.msk.bf16.mxu0 %vm360_vm3, %v1667_v10  ;;  %1848 = vmatprep.subr.bf16.mxu1 %v2065_v23  ;;  %v2337_v5 = vcombine.low %v300_v2, %v314_v25  ;;  %v2341_v27 = vsel %vm2209_vm2, %v864_v18, %v868_v4  ;;  %v1614_v41 = vrot.slane %v2232_v57, 9  ;;  %v2365_v8 = vsel %vm2306_vm6, %v1613_v11, %v588_v24  ;;  %v2075_v2 = vld [vmem:[%s2554_s1 + $0xd0] sm:$0xff]   ;;  %v2080_v11 = vld [vmem:[%s2554_s1 + $0xe0] sm:$0xff]  }
  0x2d   : > { %v1668_v28 = vcombine.low %v314_v25, %v2341_v27  ;;  %v592_v42 = vrot.slane %v2235_v61, 5  ;;  %v1615_v43 = vrot.slane %v2247_v13, 9  ;;  %v596_v45 = vrot.slane %v2250_v14, 5  ;;  %v2071_v61 = vld [vmem:[%s2554_s1 + $0x48] sm:$0xff]   ;;  %v2079_v25 = vld [vmem:[%s2554_s1 + $0x60] sm:$0xff]  }
  0x2e   : > { %1911 = vmatpush3.bf16.msra.mxu0 %v2064_v54  ;;  %1839 = vmatmul.mubr.msk.bf16.gmra.mrb[4].mxu1 %vm360_vm3, %v2337_v5  ;;  %v1687_v47 = vcombine.low %v2356_v39, %v2365_v8  ;;  %v1598_v48 = vcombine.low %v2193_v26, %v2199_v29  ;;  %v2383_v14 = vld [vmem:[%s2156_s29 + $0x4c] sm:$0x1]  ;;  %v1616_v22 = vrot.slane %v2270_v36, 9  ;;  %v600_v49 = vrot.slane %v2273_v37, 5 }
  0x2f   : > { %1912 = vmatprep.subr.bf16.mxu0 %v2066_v15  ;;  %1903 = vmatmul.mubr.msk.bf16.gmra.mrb[4].mxu0 %vm360_vm3, %v1668_v28  ;;  %v593_v50 = vsel %vm2306_vm6, %v1614_v41, %v592_v42  ;;  %v2391_v51 = vsel %vm2306_vm6, %v1615_v43, %v596_v45  ;;  %v1677_v52 = vrot.slane %v2276_v38, 9  ;;  %v1234_v53 = vshrl.u32 %v2372_v46, 16  ;;  %v2087_v41 = vld [vmem:[%s2554_s1 + $0xf8] sm:$0xff]   ;;  %v2089_v42 = vld [vmem:[%s2554_s1 + $0x100] sm:$0xff]  }
  0x30   : > { %1849 = vmatpush3.bf16.msra.mxu1 %v2065_v23  ;;  %1850 = vmatprep.mubr.msk.bf16.mxu1 %vm360_vm3, %v1597_v17  ;;  %v996_v54 = vrot.slane %v2283_v44, 5  ;;  %v1237_v55 = vshll.u32 %v2372_v46, 16  ;;  %v1599_v37 = vcombine.low %v2205_v31, %v2232_v57  ;;  %v1688_v60 = vcombine.low %v593_v50, %v2391_v51  ;;  %v2081_v17 = vld [vmem:[%s2554_s1 + $0x68] sm:$0xff]  }
  0x31   : > { %1858 = vmatprep.subr.bf16.mxu1 %v2068_v34  ;;  %1914 = vmatprep.mubr.msk.bf16.mxu0 %vm360_vm3, %v1686_v33  ;;  %v1236_v59 = vrot.slane %v1234_v53, 4  ;;  %v1609_v62 = vrot.slane %v2162_v7, 9  ;;  %v1243_v44 = vshll.u32 %v2383_v14, 16  ;;  %v601_v63 = vsel %vm2306_vm6, %v1616_v22, %v600_v49  ;;  %v2084_v33 = vld [vmem:[%s2554_s1 + $0xf0] sm:$0xff]  }
  0x32   : > { %1913 = vmatpush3.bf16.msra.mxu0 %v2066_v15  ;;  %v1239_v23 = vrot.slane %v1237_v55, 5  ;;  %v2414_v1 = vsel %vm2306_vm6, %v1677_v52, %v996_v54  ;;  %v1600_v4 = vcombine.low %v2247_v13, %v2270_v36  ;;  %v2077_v15 = vld [vmem:[%s2554_s1 + $0x58] sm:$0xff]   ;;  %v2462_v28 = vcombine.low %v2365_v8, %v593_v50  ;;  %v1750_v54 = vld [vmem:[%s2555_s2] ss:$0 sm:$0xff] }
  0x33   : > { %1922 = vmatprep.subr.bf16.mxu0 %v2069_v40  ;;  %v2420_v3 = vrot.slane %v1243_v44, 5  ;;  %v573_v6 = vsel %vm2306_vm6, %v1609_v62, %v572_v35  ;;  %v1689_v12 = vcombine.low %v601_v63, %v2414_v1  ;;  %v1628_v35 = vcombine.low %v2391_v51, %v601_v63 }
  0x34   : > { %v1240_v7 = vor.u32 %v1239_v23, %v1236_v59  ;;  %v1625_v24 = vcombine.low %v573_v6, %v2323_v19  ;;  %v2452_v19 = vcombine.low %v2329_v20, %v2356_v39  ;;  %v2083_v20 = vld [vmem:[%s2554_s1 + $0x70] sm:$0xff]   ;;  %v1706_v39 = vcombine.low %v2276_v38, %v2372_v46 }
  0x35   : > { %v1645_v8 = vcombine.low %v2168_v9, %v2193_v26  ;;  %v1646_v9 = vcombine.low %v2199_v29, %v2205_v31  ;;  %v2091_v26 = vld [vmem:[%s2554_s1 + $0x108] sm:$0xff]   ;;  %v1647_v43 = vcombine.low %v2232_v57, %v2247_v13  ;;  %v2093_v29 = vld [vmem:[%s2554_s1 + $0x110] sm:$0xff]   ;;  %v1648_v31 = vcombine.low %v2270_v36, %v2276_v38 }
  0x36   : > { %1851 = vmatmul.mubr.msk.bf16.vlgmr.msra.gmra.mrb[0].mxu1 %vm360_vm3, %v1598_v48  ;;  %v2427_v10 = vrot.slane %v1240_v7, 4  ;;  %v1732_v57 = vrot.slane %v2372_v46, 9  ;;  %v1361_v13 = vrot.slane %v2383_v14, 5 }
  0x37   : > { %1859 = vmatpush3.bf16.msra.mxu1 %v2068_v34  ;;  %1915 = vmatmul.mubr.msk.bf16.vlgmr.msra.gmra.mrb[0].mxu0 %vm360_vm3, %v1687_v47  ;;  %v2082_v34 = vld [vmem:[%s2554_s1 + $0xe8] sm:$0xff]  }
  0x38   : > { %1923 = vmatpush3.bf16.msra.mxu0 %v2069_v40  ;;  %1860 = vmatprep.subr.bf16.mxu1 %v2071_v61  ;;  %v1246_v18 = vsel %vm2209_vm2, %v2427_v10, %v2420_v3  ;;  %v2086_v40 = vld [vmem:[%s2554_s1 + $0x78] sm:$0xff]   ;;  %v1362_v36 = vsel %vm2306_vm6, %v1732_v57, %v1361_v13 }
  0x39   : > { %1924 = vmatprep.subr.bf16.mxu0 %v2072_v56  ;;  %1854 = vmatprep.mubr.msk.bf16.mxu1 %vm360_vm3, %v1599_v37  ;;  %v1741_v32 = vcombine.low %v2414_v1, %v1362_v36 }
  0x3a   : > { %1918 = vmatprep.mubr.msk.bf16.mxu0 %vm360_vm3, %v1688_v60 }
  0x3b   : > { %1861 = vmatpush3.bf16.msra.mxu1 %v2071_v61 }
  0x3c   : > { %1925 = vmatpush3.bf16.msra.mxu0 %v2072_v56  ;;  %1862 = vmatprep.subr.bf16.mxu1 %v2074_v30 }
  0x3d   : > { %1926 = vmatprep.subr.bf16.mxu0 %v2075_v2 }
  0x3e   : > { %1855 = vmatmul.mubr.msk.bf16.gmra.mrb[4].mxu1 %vm360_vm3, %v1600_v4 }
  0x3f   : > { %1863 = vmatpush3.bf16.msra.mxu1 %v2074_v30  ;;  %1919 = vmatmul.mubr.msk.bf16.gmra.mrb[4].mxu0 %vm360_vm3, %v1689_v12 }
  0x40   : > { %1927 = vmatpush3.bf16.msra.mxu0 %v2075_v2  ;;  %1864 = vmatprep.subr.bf16.mxu1 %v2077_v15 }
  0x41   : > { %1928 = vmatprep.subr.bf16.mxu0 %v2078_v21  ;;  %1866 = vmatprep.mubr.msk.bf16.mxu1 %vm360_vm3, %v1625_v24 }
  0x42   : > { %1930 = vmatprep.mubr.msk.bf16.mxu0 %vm360_vm3, %v1598_v48 }
  0x43   : > { %1865 = vmatpush3.bf16.msra.mxu1 %v2077_v15 }
  0x44   : > { %1929 = vmatpush3.bf16.msra.mxu0 %v2078_v21  ;;  %1874 = vmatprep.subr.bf16.mxu1 %v2079_v25 }
  0x45   : > { %1938 = vmatprep.subr.bf16.mxu0 %v2080_v11 }
  0x46   : > { %1867 = vmatmul.mubr.msk.bf16.vlgmr.msra.gmra.mrb[0].mxu1 %vm360_vm3, %v2452_v19 }
  0x47   : > { %1875 = vmatpush3.bf16.msra.mxu1 %v2079_v25  ;;  %1931 = vmatmul.mubr.msk.bf16.vlgmr.msra.gmra.mrb[0].mxu0 %vm360_vm3, %v1599_v37 }
  0x48   : > { %1939 = vmatpush3.bf16.msra.mxu0 %v2080_v11  ;;  %1876 = vmatprep.subr.bf16.mxu1 %v2081_v17 }
  0x49   : > { %1940 = vmatprep.subr.bf16.mxu0 %v2082_v34  ;;  %1870 = vmatprep.mubr.msk.bf16.mxu1 %vm360_vm3, %v2462_v28 }
  0x4a   : > { %1934 = vmatprep.mubr.msk.bf16.mxu0 %vm360_vm3, %v1600_v4 }
  0x4b   : > { %1877 = vmatpush3.bf16.msra.mxu1 %v2081_v17 }
  0x4c   : > { %1941 = vmatpush3.bf16.msra.mxu0 %v2082_v34  ;;  %1878 = vmatprep.subr.bf16.mxu1 %v2083_v20 }
  0x4d   : > { %1942 = vmatprep.subr.bf16.mxu0 %v2084_v33 }
  0x4e   : > { %1871 = vmatmul.mubr.msk.bf16.gmra.mrb[4].mxu1 %vm360_vm3, %v1628_v35 }
  0x4f   : > { %1879 = vmatpush3.bf16.msra.mxu1 %v2083_v20  ;;  %1935 = vmatmul.mubr.msk.bf16.gmra.mrb[4].mxu0 %vm360_vm3, %v1706_v39 }
  0x50   : > { %1943 = vmatpush3.bf16.msra.mxu0 %v2084_v33  ;;  %1880 = vmatprep.subr.bf16.mxu1 %v2086_v40 }
  0x51   : > { %1944 = vmatprep.subr.bf16.mxu0 %v2087_v41  ;;  %1882 = vmatprep.mubr.msk.bf16.mxu1 %vm360_vm3, %v1645_v8 }
  0x52   : > { %1946 = vmatprep.mubr.msk.bf16.mxu0 %vm360_vm3, %v2252_v16  ;;  %v1723_v16 = vcombine.low %v2341_v27, %v1246_v18 }
  0x53   : > { %1881 = vmatpush3.bf16.msra.mxu1 %v2086_v40 }
  0x54   : > { %1945 = vmatpush3.bf16.msra.mxu0 %v2087_v41  ;;  %1970 = vmatprep.subr.bf16.mxu1 %v2089_v42 }
  0x55   : > { %1954 = vmatprep.subr.bf16.mxu0 %v2089_v42 }
  0x56   : > { %1883 = vmatmul.mubr.msk.bf16.vlgmr.msra.gmra.mrb[0].mxu1 %vm360_vm3, %v1646_v9 }
  0x57   : > { %1947 = vmatmul.mubr.msk.bf16.vlgmr.msra.gmra.mrb[0].mxu0 %vm360_vm3, %v2299_v58  ;;  %1974 = vmatpush3.bf16.msra.mxu1 %v2089_v42  ;;  %v2095_v58 = vld [vmem:[%s2554_s1 + $0x118] sm:$0xff]  }
  0x58   : > { %1955 = vmatpush3.bf16.msra.mxu0 %v2089_v42  ;;  %1971 = vmatprep.subr.bf16.mxu1 %v2091_v26 }
  0x59   : > { %1956 = vmatprep.subr.bf16.mxu0 %v2091_v26  ;;  %1886 = vmatprep.mubr.msk.bf16.mxu1 %vm360_vm3, %v1647_v43 }
  0x5a   : > { %1950 = vmatprep.mubr.msk.bf16.mxu0 %vm360_vm3, %v2337_v5 }
  0x5b   : > { %1975 = vmatpush3.bf16.msra.mxu1 %v2091_v26 }
  0x5c   : > { %1957 = vmatpush3.bf16.msra.mxu0 %v2091_v26  ;;  %1972 = vmatprep.subr.bf16.mxu1 %v2093_v29 }
  0x5d   : > { %1958 = vmatprep.subr.bf16.mxu0 %v2093_v29 }
  0x5e   : > { %1887 = vmatmul.mubr.msk.bf16.gmra.mrb[4].mxu1 %vm360_vm3, %v1648_v31 }
  0x5f   : > { %1951 = vmatmul.mubr.msk.bf16.gmra.mrb[4].mxu0 %vm360_vm3, %v1723_v16  ;;  %1976 = vmatpush3.bf16.msra.mxu1 %v2093_v29 }
  0x60   : > { %1959 = vmatpush3.bf16.msra.mxu0 %v2093_v29  ;;  %1973 = vmatprep.subr.bf16.mxu1 %v2095_v58 }
  0x61   : > { %1960 = vmatprep.subr.bf16.mxu0 %v2095_v58  ;;  %1962 = vmatprep.mubr.msk.bf16.mxu0 %vm360_vm3, %v2452_v19 }
  0x62   : > { %1966 = vmatprep.mubr.msk.bf16.mxu1 %vm360_vm3, %v1628_v35 }
  0x63   : > { %1977 = vmatpush3.bf16.msra.mxu1 %v2095_v58 }
  0x64   : > { %1961 = vmatpush3.bf16.msra.mxu0 %v2095_v58 }
  0x66   : > { %1967 = vmatmul.mubr.msk.bf16.vlgmr.msra.gmra.mrb[8].mxu1 %vm360_vm3, %v1741_v32 }
  0x67   : > { %1963 = vmatmul.mubr.msk.bf16.vlgmr.msra.gmra.mrb[0].mxu0 %vm360_vm3, %v2462_v28 }
 0x129   : > { %v1884_v38 = vpop.f32.mrb[0].mxu1 }
 0x12a   : > { %v817_v0 = vpop.f32.mrb[1].mxu1 }
 0x12b   : > { %v1885_v5 = vpop.f32.mrb[2].mxu1 }
 0x12c   : > { %v820_v27 = vpop.f32.mrb[3].mxu1 }
 0x131   : > { %v1888_v45 = vpop.f32.mrb[4].mxu1 }
 0x132   : > { %v1952_v46 = vpop.f32.mrb[4].mxu0  ;;  %v833_v47 = vpop.f32.mrb[5].mxu1 }
 0x133   : > { %v1982_v48 = vadd.f32 %v1952_v46, %v1888_v45  ;;  %v1335_v61 = vpop.f32.mrb[5].mxu0  ;;  %v1889_v14 = vpop.f32.mrb[6].mxu1 }
 0x134   : > { %v1984_v22 = vadd.f32 %v1335_v61, %v833_v47  ;;  %v1953_v49 = vpop.f32.mrb[6].mxu0  ;;  %v836_v50 = vpop.f32.mrb[7].mxu1 }
 0x135   : > { %v1986_v51 = vadd.f32 %v1953_v49, %v1889_v14  ;;  %v1338_v52 = vpop.f32.mrb[7].mxu0 }
 0x136   : > { %v1988_v53 = vadd.f32 %v1338_v52, %v836_v50 }
 0x139   : > { %v1968_v55 = vpop.f32.mrb[8].mxu1 }
 0x13a   : > { %v1964_v56 = vpop.f32.mrb[0].mxu0  ;;  %v1983_v37 = vadd.f32 %v1982_v48, %v1968_v55  ;;  %v1451_v59 = vpop.f32.mrb[9].mxu1 }
 0x13b   : > { %v1978_v60 = vadd.f32 %v1964_v56, %v1884_v38  ;;  %v1435_v62 = vpop.f32.mrb[1].mxu0  ;;  %v1985_v23 = vadd.f32 %v1984_v22, %v1451_v59  ;;  %v1969_v44 = vpop.f32.mrb[10].mxu1 }
 0x13c   : > { %v1487_v30 = vadd.f32 %v1983_v37, %v1750_v54  ;;  %v1979_v63 = vadd.f32 %v1435_v62, %v817_v0  ;;  %v1965_v1 = vpop.f32.mrb[2].mxu0  ;;  %v1987_v7 = vadd.f32 %v1986_v51, %v1969_v44  ;;  %v1454_v2 = vpop.f32.mrb[11].mxu1 }
 0x13d   : > { %v1483_v3 = vadd.f32 %v1978_v60, %v1750_v54  ;;  %v1485_v4 = vadd.f32 %v1985_v23, %v1750_v54  ;;  %v1980_v6 = vadd.f32 %v1965_v1, %v1885_v5  ;;  %v1438_v10 = vpop.f32.mrb[3].mxu0  ;;  %v1989_v12 = vadd.f32 %v1988_v53, %v1454_v2 }
 0x13e   : > { %v1495_v15 = vmax.f32 %v1487_v30, 0.0  ;;  %v1481_v18 = vadd.f32 %v1979_v63, %v1750_v54  ;;  %v1488_v21 = vadd.f32 %v1987_v7, %v1750_v54  ;;  %v1981_v24 = vadd.f32 %v1438_v10, %v820_v27 }
 0x13f   : > { %v1491_v25 = vmax.f32 %v1483_v3, 0.0  ;;  %v1493_v11 = vmax.f32 %v1485_v4, 0.0  ;;  %v1484_v19 = vadd.f32 %v1980_v6, %v1750_v54  ;;  %v1486_v17 = vadd.f32 %v1989_v12, %v1750_v54 }
 0x140   : > { %v1503_v34 = vpack.c.bf16 %v1495_v15, %v1495_v15  ;;  %v1489_v28 = vmax.f32 %v1481_v18, 0.0  ;;  %v1496_v20 = vmax.f32 %v1488_v21, 0.0  ;;  %v1482_v33 = vadd.f32 %v1981_v24, %v1750_v54 }
 0x141   : > { %v1499_v35 = vpack.c.bf16 %v1491_v25, %v1491_v25  ;;  %v1501_v39 = vpack.c.bf16 %v1493_v11, %v1493_v11  ;;  %v1492_v40 = vmax.f32 %v1484_v19, 0.0  ;;  %v1494_v41 = vmax.f32 %v1486_v17, 0.0 }
 0x142   : > { %1512 = vst.msk [vmem:[%s170_s20 + $0x18] sm:$0xf] %vm1505_vm7, %v1503_v34  ;;  %v1497_v8 = vpack.c.bf16 %v1489_v28, %v1489_v28  ;;  %v1504_v42 = vpack.c.bf16 %v1496_v20, %v1496_v20  ;;  %v1490_v9 = vmax.f32 %v1482_v33, 0.0 }
 0x143   : > { %1508 = vst.msk [vmem:[%s170_s20 + $0x8] sm:$0xf] %vm1505_vm7, %v1499_v35  ;;  %1510 = vst.msk [vmem:[%s170_s20 + $0x10] sm:$0xf] %vm1505_vm7, %v1501_v39  ;;  %v1500_v26 = vpack.c.bf16 %v1492_v40, %v1492_v40  ;;  %v1502_v43 = vpack.c.bf16 %v1494_v41, %v1494_v41 }
 0x144   : > { %1506 = vst.msk [vmem:[%s170_s20] sm:$0xf] %vm1505_vm7, %v1497_v8  ;;  %1513 = vst.msk [vmem:[%s170_s20 + $0x1c] sm:$0xf] %vm1505_vm7, %v1504_v42  ;;  %v1498_v29 = vpack.c.bf16 %v1490_v9, %v1490_v9 }
 0x145   : > { %1509 = vst.msk [vmem:[%s170_s20 + $0xc] sm:$0xf] %vm1505_vm7, %v1500_v26  ;;  %1511 = vst.msk [vmem:[%s170_s20 + $0x14] sm:$0xf] %vm1505_vm7, %v1502_v43 }
 0x146   : > { %1507 = vst.msk [vmem:[%s170_s20 + $0x4] sm:$0xf] %vm1505_vm7, %v1498_v29 }
 0x147 PF: > { %s13_s12 = sadd.s32 1, %s2102_s12  }
 0x148   : > { %p10_p4 = scmp.ge.s32.totalorder %s13_s12, 4  }
 0x14a   :  { %12 = sbr.rel (!%p10_p4) target bundleno = 1 (0x1), region = 70 }

// kernel: backbone2d_resnet18_layer1.9
= control target key start
LH: loop header
LB: loop body
LE: loop exit
PB: predicated region body
PF: predicated region fallthrough
CT: control target
= control target key end

     0   :  { %s2234_s15 = smov 0   ;;  %s2670_s0 = inlined_call_operand.vmem [shape: bf16[2,10,10,64], index: 0, kind: input, shape index: {}]   ;;  %s2671_s1 = inlined_call_operand.vmem [shape: bf16[9,64,64], index: 1, kind: input, shape index: {}]   ;;  %s2672_s2 = inlined_call_operand.vmem [shape: f32[1,64], index: 2, kind: input, shape index: {}]   ;;  %s2673_s3 = inlined_call_operand.vmem [shape: bf16[2,8,8,64], index: 3, kind: input, shape index: {}]   ;;  %s2674_s4 = inlined_call_operand.vmem [shape: bf16[2,8,8,64], index: 4, kind: output, shape index: {}]  }
   0x1 LB: > { %s1652_s16 = sadd.s32 4294967295, %s2207_s15   ;;  %p1656_p0 = scmp.ge.s32.totalorder %s2207_s15, 1  ;;  %s2207_s15 = sphi %s2234_s15, %s14_s15  }
   0x2   : > { %p172_p1 = scmp.lt.s32.totalorder %s2207_s15, 3 }
   0x4   : > { %p173_p2 = pnand %p1656_p0, %p172_p1 }
   0x5   : > { %v2156_v0 = vld [vmem:[%s2671_s1 + $0x20] sm:$0xff] (!%p173_p2)   ;;  %p203_p3 = scmp.lt.s32.totalorder (!%p173_p2), %s1652_s16, 1  ;;  %v2158_v2 = vld [vmem:[%s2671_s1 + $0x28] sm:$0xff] (!%p173_p2)   ;;  %v2160_v4 = vld [vmem:[%s2671_s1 + $0x30] sm:$0xff] (!%p173_p2)   ;;  %vm247_vm0 = vsmask.f32 (!%p173_p2), 3328 }
   0x6   : > { %176 = sbr.rel (%p173_p2) target bundleno = 329 (0x149), region = 36  ;;  %v2157_v1 = vld [vmem:[%s2671_s1 + $0x80] sm:$0xff] (!%p173_p2)   ;;  %1931 = vmatprep.subr.bf16.mxu1 (!%p173_p2), %v2156_v0  ;;  %v2159_v3 = vld [vmem:[%s2671_s1 + $0x88] sm:$0xff] (!%p173_p2)   ;;  %v2161_v5 = vld [vmem:[%s2671_s1 + $0x90] sm:$0xff] (!%p173_p2)   ;;  %vm248_vm1 = vsmask.f32 (!%p173_p2), 7440 }
   0x7   : > { %1995 = vmatprep.subr.bf16.mxu0 (!%p173_p2), %v2157_v1  ;;  %1932 = vmatpush3.bf16.msra.mxu1 (!%p173_p2), %v2156_v0  ;;  %v2162_v6 = vld [vmem:[%s2671_s1 + $0x38] sm:$0xff] (!%p173_p2)   ;;  %v2295_v22 = vld [vmem:[%s2671_s1] sm:$0xff] (!%p173_p2)   ;;  %vm2319_vm2 = vmor (!%p173_p2), %vm247_vm0, %vm248_vm1  ;;  %vm407_vm3 = vcmask (!%p173_p2), 523264   ;;  %vm614_vm4 = vcmask (!%p173_p2), 1042432   ;;  %vm615_vm5 = vcmask (!%p173_p2), 1046532   ;;  %vm1576_vm7 = vcmask (!%p173_p2), 519168  }
   0x8   : > { %1996 = vmatpush3.bf16.msra.mxu0 (!%p173_p2), %v2157_v1  ;;  %1933 = vmatprep.subr.bf16.mxu1 (!%p173_p2), %v2158_v2  ;;  %v2163_v10 = vld [vmem:[%s2671_s1 + $0x98] sm:$0xff] (!%p173_p2)   ;;  %v2300_v23 = vld [vmem:[%s2671_s1 + $0xa0] sm:$0xff] (!%p173_p2)   ;;  %vm2416_vm6 = vmor (!%p173_p2), %vm614_vm4, %vm615_vm5 }
   0x9   : > { %1997 = vmatprep.subr.bf16.mxu0 (!%p173_p2), %v2159_v3 }
   0xb   : > { %1934 = vmatpush3.bf16.msra.mxu1 (!%p173_p2), %v2158_v2 }
   0xc   : > { %1998 = vmatpush3.bf16.msra.mxu0 (!%p173_p2), %v2159_v3  ;;  %1935 = vmatprep.subr.bf16.mxu1 (!%p173_p2), %v2160_v4 }
   0xd   : > { %s2680_s16 = smov (!%p203_p3, %s1652_s16), 1  ;;  %1999 = vmatprep.subr.bf16.mxu0 %v2161_v5 }
   0xe   : > { %s2147_s27 = smul.u32 80, %s2680_s16  ;;  %s1838_s21 = sshll.u32 %s2680_s16, 5 }
   0xf   : > { %1936 = vmatpush3.bf16.msra.mxu1 %v2160_v4  ;;  %s212_s24 = scalar_lea.vmem %s2673_s3, %s1838_s21  ;;  %s217_s29 = scalar_lea.vmem %s2674_s4, %s1838_s21 }
  0x10   : > { %s2266_s6 = scalar_lea.vmem %s2670_s0, %s2147_s27  ;;  %2000 = vmatpush3.bf16.msra.mxu0 %v2161_v5  ;;  %1937 = vmatprep.subr.bf16.mxu1 %v2162_v6 }
  0x11   : > { %v2272_v7 = vld [vmem:[%s2266_s6] sm:$0xf]  ;;  %v2275_v8 = vld [vmem:[%s2266_s6 + $0x4] sm:$0x1]  ;;  %v2278_v9 = vld [vmem:[%s2266_s6 + $0x8] sm:$0xf]  ;;  %2001 = vmatprep.subr.bf16.mxu0 %v2163_v10 }
  0x12   : > { %v2284_v11 = vld [vmem:[%s2266_s6 + $0xc] sm:$0x1]  ;;  %v251_v12 = vshrl.u32 %v2272_v7, 16  ;;  %v254_v13 = vshll.u32 %v2272_v7, 16  ;;  %v260_v14 = vshll.u32 %v2275_v8, 16  ;;  %v265_v15 = vshrl.u32 %v2278_v9, 16 }
  0x13   : > { %v268_v16 = vshll.u32 %v2278_v9, 16  ;;  %v274_v17 = vshll.u32 %v2284_v11, 16  ;;  %v2303_v26 = vld [vmem:[%s2266_s6 + $0x10] sm:$0xf]  ;;  %v2306_v27 = vld [vmem:[%s2266_s6 + $0x14] sm:$0x1]  ;;  %1938 = vmatpush3.bf16.msra.mxu1 %v2162_v6 }
  0x14   : > { %v253_v18 = vrot.slane %v251_v12, 4  ;;  %v256_v19 = vrot.slane %v254_v13, 5  ;;  %v262_v20 = vrot.slane %v260_v14, 5  ;;  %v267_v21 = vrot.slane %v265_v15, 4  ;;  %v2309_v29 = vld [vmem:[%s2266_s6 + $0x18] sm:$0xf]  ;;  %2002 = vmatpush3.bf16.msra.mxu0 %v2163_v10  ;;  %1947 = vmatprep.subr.bf16.mxu1 %v2295_v22 }
  0x15   : > { %v270_v24 = vrot.slane %v268_v16, 5  ;;  %v276_v25 = vrot.slane %v274_v17, 5  ;;  %v2312_v30 = vld [vmem:[%s2266_s6 + $0x1c] sm:$0x1]  ;;  %v2315_v31 = vld [vmem:[%s2266_s6 + $0x20] sm:$0xf]  ;;  %2011 = vmatprep.subr.bf16.mxu0 %v2300_v23 }
  0x16   : > { %v257_v28 = vor.u32 %v256_v19, %v253_v18  ;;  %v2324_v34 = vld [vmem:[%s2266_s6 + $0x24] sm:$0x1]  ;;  %v279_v35 = vshrl.u32 %v2303_v26, 16  ;;  %v282_v36 = vshll.u32 %v2303_v26, 16  ;;  %v288_v37 = vshll.u32 %v2306_v27, 16  ;;  %v2166_v18 = vld [vmem:[%s2671_s1 + $0x8] sm:$0xff]  }
  0x17   : > { %v271_v33 = vor.u32 %v270_v24, %v267_v21  ;;  %v293_v39 = vshrl.u32 %v2309_v29, 16  ;;  %v296_v40 = vshll.u32 %v2309_v29, 16  ;;  %v302_v41 = vshll.u32 %v2312_v30, 16  ;;  %v2342_v57 = vld [vmem:[%s2266_s6 + $0x28] sm:$0xf] }
  0x18   : > { %v258_v38 = vrot.slane %v257_v28, 4  ;;  %v281_v43 = vrot.slane %v279_v35, 4  ;;  %v284_v44 = vrot.slane %v282_v36, 5  ;;  %v290_v46 = vrot.slane %v288_v37, 5  ;;  %v2345_v61 = vld [vmem:[%s2266_s6 + $0x2c] sm:$0x1] }
  0x19   : > { %v272_v42 = vrot.slane %v271_v33, 4  ;;  %v295_v47 = vrot.slane %v293_v39, 4  ;;  %v298_v48 = vrot.slane %v296_v40, 5  ;;  %v307_v51 = vshrl.u32 %v2315_v31, 16  ;;  %v2357_v13 = vld [vmem:[%s2266_s6 + $0x30] sm:$0xf] }
  0x1a   : > { %v263_v45 = vsel %vm2319_vm2, %v258_v38, %v262_v20  ;;  %v285_v50 = vor.u32 %v284_v44, %v281_v43  ;;  %v310_v52 = vshll.u32 %v2315_v31, 16  ;;  %v304_v55 = vrot.slane %v302_v41, 5  ;;  %v2360_v14 = vld [vmem:[%s2266_s6 + $0x34] sm:$0x1]  ;;  %v2167_v20 = vld [vmem:[%s2671_s1 + $0xa8] sm:$0xff]  }
  0x1b   : > { %v277_v49 = vsel %vm2319_vm2, %v272_v42, %v276_v25  ;;  %v299_v54 = vor.u32 %v298_v48, %v295_v47  ;;  %v316_v56 = vshll.u32 %v2324_v34, 16  ;;  %v309_v59 = vrot.slane %v307_v51, 4  ;;  %v2380_v36 = vld [vmem:[%s2266_s6 + $0x38] sm:$0xf]  ;;  %v2383_v37 = vld [vmem:[%s2266_s6 + $0x3c] sm:$0x1] }
  0x1c   : > { %v1670_v53 = vcombine.low %v263_v45, %v277_v49  ;;  %v286_v58 = vrot.slane %v285_v50, 4  ;;  %v312_v60 = vrot.slane %v310_v52, 5  ;;  %v321_v0 = vshrl.u32 %v2342_v57, 16  ;;  %v2386_v38 = vld [vmem:[%s2266_s6 + $0x40] sm:$0xf]  ;;  %v2168_v40 = vld [vmem:[%s2671_s1 + $0x10] sm:$0xff]  }
  0x1d   : > { %v300_v62 = vrot.slane %v299_v54, 4  ;;  %v318_v63 = vrot.slane %v316_v56, 5  ;;  %v324_v3 = vshll.u32 %v2342_v57, 16  ;;  %v330_v4 = vshll.u32 %v2345_v61, 16  ;;  %v2393_v44 = vld [vmem:[%s2266_s6 + $0x44] sm:$0x1] }
  0x1e   : > { %1939 = vmatprep.mubr.msk.bf16.mxu1 %vm407_vm3, %v1670_v53  ;;  %v291_v1 = vsel %vm2319_vm2, %v286_v58, %v290_v46  ;;  %v313_v2 = vor.u32 %v312_v60, %v309_v59  ;;  %v623_v5 = vrot.slane %v2284_v11, 5  ;;  %v323_v12 = vrot.slane %v321_v0, 4  ;;  %v2169_v54 = vld [vmem:[%s2671_s1 + $0xb0] sm:$0xff]  }
  0x1f   : > { %v305_v6 = vsel %vm2319_vm2, %v300_v62, %v304_v55  ;;  %v1750_v10 = vcombine.low %v277_v49, %v291_v1  ;;  %v627_v17 = vrot.slane %v2306_v27, 5  ;;  %v326_v19 = vrot.slane %v324_v3, 5 }
  0x20   : > { %v314_v15 = vrot.slane %v313_v2, 4  ;;  %v2362_v16 = vcombine.low %v291_v1, %v305_v6  ;;  %v332_v21 = vrot.slane %v330_v4, 5  ;;  %v335_v24 = vshrl.u32 %v2357_v13, 16 }
  0x21   : > { %2003 = vmatprep.mubr.msk.bf16.mxu0 %vm407_vm3, %v1750_v10  ;;  %v338_v25 = vshll.u32 %v2357_v13, 16  ;;  %v344_v28 = vshll.u32 %v2360_v14, 16  ;;  %v327_v35 = vor.u32 %v326_v19, %v323_v12  ;;  %v349_v46 = vshrl.u32 %v2380_v36, 16 }
  0x22   : > { %v319_v33 = vsel %vm2319_vm2, %v314_v15, %v318_v63  ;;  %1940 = vmatmul.mubr.msk.bf16.vlgmr.msra.gmra.mrb[0].mxu1 %vm407_vm3, %v2362_v16  ;;  %v337_v41 = vrot.slane %v335_v24, 4  ;;  %v352_v47 = vshll.u32 %v2380_v36, 16  ;;  %v358_v48 = vshll.u32 %v2383_v37, 16  ;;  %v2171_v15 = vld [vmem:[%s2671_s1 + $0xb8] sm:$0xff]  }
  0x23   : > { %v1751_v39 = vcombine.low %v305_v6, %v319_v33  ;;  %1948 = vmatpush3.bf16.msra.mxu1 %v2295_v22  ;;  %v340_v42 = vrot.slane %v338_v25, 5  ;;  %v346_v43 = vrot.slane %v344_v28, 5  ;;  %v328_v45 = vrot.slane %v327_v35, 4 }
  0x24   : > { %1949 = vmatprep.subr.bf16.mxu1 %v2166_v18  ;;  %v904_v49 = vshrl.u32 %v2386_v38, 16  ;;  %v907_v50 = vshll.u32 %v2386_v38, 16  ;;  %v913_v51 = vshll.u32 %v2393_v44, 16  ;;  %v631_v52 = vrot.slane %v2312_v30, 5 }
  0x25   : > { %2004 = vmatmul.mubr.msk.bf16.vlgmr.msra.gmra.mrb[0].mxu0 %vm407_vm3, %v1751_v39  ;;  %v341_v22 = vor.u32 %v340_v42, %v337_v41  ;;  %v333_v53 = vsel %vm2319_vm2, %v328_v45, %v332_v21  ;;  %v351_v55 = vrot.slane %v349_v46, 4  ;;  %v354_v56 = vrot.slane %v352_v47, 5  ;;  %v2482_v46 = vld [vmem:[%s2266_s6 + $0x48] sm:$0xf] }
  0x26   : > { %2012 = vmatpush3.bf16.msra.mxu0 %v2300_v23  ;;  %v2409_v58 = vcombine.low %v319_v33, %v333_v53  ;;  %v906_v60 = vrot.slane %v904_v49, 4  ;;  %v909_v62 = vrot.slane %v907_v50, 5  ;;  %v2170_v23 = vld [vmem:[%s2671_s1 + $0x18] sm:$0xff]   ;;  %v360_v63 = vrot.slane %v358_v48, 5 }
  0x27   : > { %2013 = vmatprep.subr.bf16.mxu0 %v2167_v20  ;;  %1950 = vmatpush3.bf16.msra.mxu1 %v2166_v18  ;;  %v342_v59 = vrot.slane %v341_v22, 4  ;;  %v355_v30 = vor.u32 %v354_v56, %v351_v55  ;;  %v1695_v1 = vrot.slane %v2278_v9, 9  ;;  %v915_v4 = vrot.slane %v913_v51, 5  ;;  %v2177_v56 = vld [vmem:[%s2671_s1 + $0xc8] sm:$0xff]  }
  0x28   : > { %1951 = vmatprep.subr.bf16.mxu1 %v2168_v40  ;;  %1943 = vmatprep.mubr.msk.bf16.mxu1 %vm407_vm3, %v2409_v58  ;;  %v910_v3 = vor.u32 %v909_v62, %v906_v60  ;;  %v1696_v6 = vrot.slane %v2303_v26, 9  ;;  %v1697_v21 = vrot.slane %v2309_v29, 9  ;;  %v635_v24 = vrot.slane %v2324_v34, 5  ;;  %v2173_v34 = vld [vmem:[%s2671_s1 + $0x40] sm:$0xff]  }
  0x29   : > { %v347_v2 = vsel %vm2319_vm2, %v342_v59, %v346_v43  ;;  %v356_v12 = vrot.slane %v355_v30, 4  ;;  %v2433_v19 = vsel %vm2416_vm6, %v1695_v1, %v623_v5  ;;  %v1698_v11 = vrot.slane %v2315_v31, 9  ;;  %v2179_v30 = vld [vmem:[%s2671_s1 + $0x50] sm:$0xff]  }
  0x2a   : > { %2014 = vmatpush3.bf16.msra.mxu0 %v2167_v20  ;;  %v1752_v10 = vcombine.low %v333_v53, %v347_v2  ;;  %v911_v18 = vrot.slane %v910_v3, 4  ;;  %v2439_v20 = vsel %vm2416_vm6, %v1696_v6, %v627_v17  ;;  %v1682_v17 = vcombine.low %v2272_v7, %v2278_v9 }
  0x2b   : > { %2015 = vmatprep.subr.bf16.mxu0 %v2169_v54  ;;  %1952 = vmatpush3.bf16.msra.mxu1 %v2168_v40  ;;  %v361_v25 = vsel %vm2319_vm2, %v356_v12, %v360_v63  ;;  %v1771_v33 = vcombine.low %v2433_v19, %v2439_v20  ;;  %v619_v35 = vrot.slane %v2275_v8, 5  ;;  %v2466_v39 = vsel %vm2416_vm6, %v1697_v21, %v631_v52  ;;  %v2174_v40 = vld [vmem:[%s2671_s1 + $0xc0] sm:$0xff]   ;;  %v2183_v21 = vld [vmem:[%s2671_s1 + $0xd8] sm:$0xff]  }
  0x2c   : > { %2007 = vmatprep.mubr.msk.bf16.mxu0 %vm407_vm3, %v1752_v10  ;;  %1953 = vmatprep.subr.bf16.mxu1 %v2170_v23  ;;  %v2447_v5 = vcombine.low %v347_v2, %v361_v25  ;;  %v2451_v27 = vsel %vm2319_vm2, %v911_v18, %v915_v4  ;;  %v1699_v41 = vrot.slane %v2342_v57, 9  ;;  %v2475_v8 = vsel %vm2416_vm6, %v1698_v11, %v635_v24  ;;  %v2180_v2 = vld [vmem:[%s2671_s1 + $0xd0] sm:$0xff]   ;;  %v2185_v11 = vld [vmem:[%s2671_s1 + $0xe0] sm:$0xff]  }
  0x2d   : > { %v1753_v28 = vcombine.low %v361_v25, %v2451_v27  ;;  %v639_v42 = vrot.slane %v2345_v61, 5  ;;  %v1700_v43 = vrot.slane %v2357_v13, 9  ;;  %v643_v45 = vrot.slane %v2360_v14, 5  ;;  %v2176_v61 = vld [vmem:[%s2671_s1 + $0x48] sm:$0xff]   ;;  %v2184_v25 = vld [vmem:[%s2671_s1 + $0x60] sm:$0xff]  }
  0x2e   : > { %2016 = vmatpush3.bf16.msra.mxu0 %v2169_v54  ;;  %1944 = vmatmul.mubr.msk.bf16.gmra.mrb[4].mxu1 %vm407_vm3, %v2447_v5  ;;  %v1772_v47 = vcombine.low %v2466_v39, %v2475_v8  ;;  %v1683_v48 = vcombine.low %v2303_v26, %v2309_v29  ;;  %v2493_v14 = vld [vmem:[%s2266_s6 + $0x4c] sm:$0x1]  ;;  %v1701_v22 = vrot.slane %v2380_v36, 9  ;;  %v647_v49 = vrot.slane %v2383_v37, 5 }
  0x2f   : > { %2017 = vmatprep.subr.bf16.mxu0 %v2171_v15  ;;  %2008 = vmatmul.mubr.msk.bf16.gmra.mrb[4].mxu0 %vm407_vm3, %v1753_v28  ;;  %v640_v50 = vsel %vm2416_vm6, %v1699_v41, %v639_v42  ;;  %v2501_v51 = vsel %vm2416_vm6, %v1700_v43, %v643_v45  ;;  %v1762_v52 = vrot.slane %v2386_v38, 9  ;;  %v1281_v53 = vshrl.u32 %v2482_v46, 16  ;;  %v2192_v41 = vld [vmem:[%s2671_s1 + $0xf8] sm:$0xff]   ;;  %v2194_v42 = vld [vmem:[%s2671_s1 + $0x100] sm:$0xff]  }
  0x30   : > { %1954 = vmatpush3.bf16.msra.mxu1 %v2170_v23  ;;  %1955 = vmatprep.mubr.msk.bf16.mxu1 %vm407_vm3, %v1682_v17  ;;  %v1043_v54 = vrot.slane %v2393_v44, 5  ;;  %v1284_v55 = vshll.u32 %v2482_v46, 16  ;;  %v1684_v37 = vcombine.low %v2315_v31, %v2342_v57  ;;  %v1773_v60 = vcombine.low %v640_v50, %v2501_v51  ;;  %v2186_v17 = vld [vmem:[%s2671_s1 + $0x68] sm:$0xff]  }
  0x31   : > { %1963 = vmatprep.subr.bf16.mxu1 %v2173_v34  ;;  %2019 = vmatprep.mubr.msk.bf16.mxu0 %vm407_vm3, %v1771_v33  ;;  %v1283_v59 = vrot.slane %v1281_v53, 4  ;;  %v1694_v62 = vrot.slane %v2272_v7, 9  ;;  %v1290_v44 = vshll.u32 %v2493_v14, 16  ;;  %v648_v63 = vsel %vm2416_vm6, %v1701_v22, %v647_v49  ;;  %v2189_v33 = vld [vmem:[%s2671_s1 + $0xf0] sm:$0xff]  }
  0x32   : > { %2018 = vmatpush3.bf16.msra.mxu0 %v2171_v15  ;;  %v1286_v23 = vrot.slane %v1284_v55, 5  ;;  %v2524_v1 = vsel %vm2416_vm6, %v1762_v52, %v1043_v54  ;;  %v1685_v4 = vcombine.low %v2357_v13, %v2380_v36  ;;  %v2182_v15 = vld [vmem:[%s2671_s1 + $0x58] sm:$0xff]   ;;  %v2572_v28 = vcombine.low %v2475_v8, %v640_v50  ;;  %v1856_v54 = vld [vmem:[%s212_s24 + $0x8] sm:$0xff]  }
  0x33   : > { %2027 = vmatprep.subr.bf16.mxu0 %v2174_v40  ;;  %v2530_v3 = vrot.slane %v1290_v44, 5  ;;  %v620_v6 = vsel %vm2416_vm6, %v1694_v62, %v619_v35  ;;  %v1774_v12 = vcombine.low %v648_v63, %v2524_v1  ;;  %v1713_v35 = vcombine.low %v2501_v51, %v648_v63  ;;  %v1858_v55 = vld [vmem:[%s212_s24 + $0x18] sm:$0xff]  }
  0x34   : > { %v1287_v7 = vor.u32 %v1286_v23, %v1283_v59  ;;  %v1710_v24 = vcombine.low %v620_v6, %v2433_v19  ;;  %v2562_v19 = vcombine.low %v2439_v20, %v2466_v39  ;;  %v2188_v20 = vld [vmem:[%s2671_s1 + $0x70] sm:$0xff]   ;;  %v1791_v39 = vcombine.low %v2386_v38, %v2482_v46  ;;  %v1835_v59 = vld [vmem:[%s2672_s2] ss:$0 sm:$0xff] }
  0x35   : > { %v1730_v8 = vcombine.low %v2278_v9, %v2303_v26  ;;  %v1731_v9 = vcombine.low %v2309_v29, %v2315_v31  ;;  %v2196_v26 = vld [vmem:[%s2671_s1 + $0x108] sm:$0xff]   ;;  %v1732_v43 = vcombine.low %v2342_v57, %v2357_v13  ;;  %v2198_v29 = vld [vmem:[%s2671_s1 + $0x110] sm:$0xff]   ;;  %v1733_v31 = vcombine.low %v2380_v36, %v2386_v38 }
  0x36   : > { %1956 = vmatmul.mubr.msk.bf16.vlgmr.msra.gmra.mrb[0].mxu1 %vm407_vm3, %v1683_v48  ;;  %v2537_v10 = vrot.slane %v1287_v7, 4  ;;  %v1817_v57 = vrot.slane %v2482_v46, 9  ;;  %v1408_v13 = vrot.slane %v2493_v14, 5  ;;  %v1854_v23 = vunpack.c.l.bf16 %v1858_v55 }
  0x37   : > { %1964 = vmatpush3.bf16.msra.mxu1 %v2173_v34  ;;  %2020 = vmatmul.mubr.msk.bf16.vlgmr.msra.gmra.mrb[0].mxu0 %vm407_vm3, %v1772_v47  ;;  %v2187_v34 = vld [vmem:[%s2671_s1 + $0xe8] sm:$0xff]  }
  0x38   : > { %2028 = vmatpush3.bf16.msra.mxu0 %v2174_v40  ;;  %1965 = vmatprep.subr.bf16.mxu1 %v2176_v61  ;;  %v1293_v18 = vsel %vm2319_vm2, %v2537_v10, %v2530_v3  ;;  %v2191_v40 = vld [vmem:[%s2671_s1 + $0x78] sm:$0xff]   ;;  %v1409_v36 = vsel %vm2416_vm6, %v1817_v57, %v1408_v13  ;;  %v1855_v3 = vunpack.c.h.bf16 %v1858_v55 }
  0x39   : > { %2029 = vmatprep.subr.bf16.mxu0 %v2177_v56  ;;  %1959 = vmatprep.mubr.msk.bf16.mxu1 %vm407_vm3, %v1684_v37  ;;  %v1826_v32 = vcombine.low %v2524_v1, %v1409_v36 }
  0x3a   : > { %2023 = vmatprep.mubr.msk.bf16.mxu0 %vm407_vm3, %v1773_v60  ;;  %v1846_v60 = vunpack.c.l.bf16 %v1856_v54 }
  0x3b   : > { %1966 = vmatpush3.bf16.msra.mxu1 %v2176_v61 }
  0x3c   : > { %2030 = vmatpush3.bf16.msra.mxu0 %v2177_v56  ;;  %1967 = vmatprep.subr.bf16.mxu1 %v2179_v30  ;;  %v1841_v56 = vld [vmem:[%s212_s24] sm:$0xff]  }
  0x3d   : > { %2031 = vmatprep.subr.bf16.mxu0 %v2180_v2  ;;  %v1842_v44 = vunpack.c.l.bf16 %v1841_v56 }
  0x3e   : > { %1960 = vmatmul.mubr.msk.bf16.gmra.mrb[4].mxu1 %vm407_vm3, %v1685_v4 }
  0x3f   : > { %1968 = vmatpush3.bf16.msra.mxu1 %v2179_v30  ;;  %2024 = vmatmul.mubr.msk.bf16.gmra.mrb[4].mxu0 %vm407_vm3, %v1774_v12 }
  0x40   : > { %2032 = vmatpush3.bf16.msra.mxu0 %v2180_v2  ;;  %1969 = vmatprep.subr.bf16.mxu1 %v2182_v15  ;;  %v1847_v2 = vunpack.c.h.bf16 %v1856_v54 }
  0x41   : > { %2033 = vmatprep.subr.bf16.mxu0 %v2183_v21  ;;  %1971 = vmatprep.mubr.msk.bf16.mxu1 %vm407_vm3, %v1710_v24 }
  0x42   : > { %2035 = vmatprep.mubr.msk.bf16.mxu0 %vm407_vm3, %v1683_v48 }
  0x43   : > { %1970 = vmatpush3.bf16.msra.mxu1 %v2182_v15  ;;  %v1843_v15 = vunpack.c.h.bf16 %v1841_v56 }
  0x44   : > { %2034 = vmatpush3.bf16.msra.mxu0 %v2183_v21  ;;  %1979 = vmatprep.subr.bf16.mxu1 %v2184_v25 }
  0x45   : > { %2043 = vmatprep.subr.bf16.mxu0 %v2185_v11 }
  0x46   : > { %1972 = vmatmul.mubr.msk.bf16.vlgmr.msra.gmra.mrb[0].mxu1 %vm407_vm3, %v2562_v19 }
  0x47   : > { %1980 = vmatpush3.bf16.msra.mxu1 %v2184_v25  ;;  %2036 = vmatmul.mubr.msk.bf16.vlgmr.msra.gmra.mrb[0].mxu0 %vm407_vm3, %v1684_v37  ;;  %v1857_v37 = vld [vmem:[%s212_s24 + $0x10] sm:$0xff]  }
  0x48   : > { %2044 = vmatpush3.bf16.msra.mxu0 %v2185_v11  ;;  %1981 = vmatprep.subr.bf16.mxu1 %v2186_v17  ;;  %v1850_v7 = vunpack.c.l.bf16 %v1857_v37 }
  0x49   : > { %2045 = vmatprep.subr.bf16.mxu0 %v2187_v34  ;;  %1975 = vmatprep.mubr.msk.bf16.mxu1 %vm407_vm3, %v2572_v28 }
  0x4a   : > { %2039 = vmatprep.mubr.msk.bf16.mxu0 %vm407_vm3, %v1685_v4 }
  0x4b   : > { %1982 = vmatpush3.bf16.msra.mxu1 %v2186_v17 }
  0x4c   : > { %2046 = vmatpush3.bf16.msra.mxu0 %v2187_v34  ;;  %1983 = vmatprep.subr.bf16.mxu1 %v2188_v20 }
  0x4d   : > { %2047 = vmatprep.subr.bf16.mxu0 %v2189_v33 }
  0x4e   : > { %1976 = vmatmul.mubr.msk.bf16.gmra.mrb[4].mxu1 %vm407_vm3, %v1713_v35 }
  0x4f   : > { %1984 = vmatpush3.bf16.msra.mxu1 %v2188_v20  ;;  %2040 = vmatmul.mubr.msk.bf16.gmra.mrb[4].mxu0 %vm407_vm3, %v1791_v39 }
  0x50   : > { %2048 = vmatpush3.bf16.msra.mxu0 %v2189_v33  ;;  %1985 = vmatprep.subr.bf16.mxu1 %v2191_v40 }
  0x51   : > { %2049 = vmatprep.subr.bf16.mxu0 %v2192_v41  ;;  %1987 = vmatprep.mubr.msk.bf16.mxu1 %vm407_vm3, %v1730_v8 }
  0x52   : > { %2051 = vmatprep.mubr.msk.bf16.mxu0 %vm407_vm3, %v2362_v16  ;;  %v1808_v16 = vcombine.low %v2451_v27, %v1293_v18  ;;  %v1851_v18 = vunpack.c.h.bf16 %v1857_v37 }
  0x53   : > { %1986 = vmatpush3.bf16.msra.mxu1 %v2191_v40 }
  0x54   : > { %2050 = vmatpush3.bf16.msra.mxu0 %v2192_v41  ;;  %2075 = vmatprep.subr.bf16.mxu1 %v2194_v42 }
  0x55   : > { %2059 = vmatprep.subr.bf16.mxu0 %v2194_v42 }
  0x56   : > { %1988 = vmatmul.mubr.msk.bf16.vlgmr.msra.gmra.mrb[0].mxu1 %vm407_vm3, %v1731_v9 }
  0x57   : > { %2052 = vmatmul.mubr.msk.bf16.vlgmr.msra.gmra.mrb[0].mxu0 %vm407_vm3, %v2409_v58  ;;  %2079 = vmatpush3.bf16.msra.mxu1 %v2194_v42  ;;  %v2200_v58 = vld [vmem:[%s2671_s1 + $0x118] sm:$0xff]  }
  0x58   : > { %2060 = vmatpush3.bf16.msra.mxu0 %v2194_v42  ;;  %2076 = vmatprep.subr.bf16.mxu1 %v2196_v26 }
  0x59   : > { %2061 = vmatprep.subr.bf16.mxu0 %v2196_v26  ;;  %1991 = vmatprep.mubr.msk.bf16.mxu1 %vm407_vm3, %v1732_v43 }
  0x5a   : > { %2055 = vmatprep.mubr.msk.bf16.mxu0 %vm407_vm3, %v2447_v5 }
  0x5b   : > { %2080 = vmatpush3.bf16.msra.mxu1 %v2196_v26 }
  0x5c   : > { %2062 = vmatpush3.bf16.msra.mxu0 %v2196_v26  ;;  %2077 = vmatprep.subr.bf16.mxu1 %v2198_v29 }
  0x5d   : > { %2063 = vmatprep.subr.bf16.mxu0 %v2198_v29 }
  0x5e   : > { %1992 = vmatmul.mubr.msk.bf16.gmra.mrb[4].mxu1 %vm407_vm3, %v1733_v31 }
  0x5f   : > { %2056 = vmatmul.mubr.msk.bf16.gmra.mrb[4].mxu0 %vm407_vm3, %v1808_v16  ;;  %2081 = vmatpush3.bf16.msra.mxu1 %v2198_v29 }
  0x60   : > { %2064 = vmatpush3.bf16.msra.mxu0 %v2198_v29  ;;  %2078 = vmatprep.subr.bf16.mxu1 %v2200_v58 }
  0x61   : > { %2065 = vmatprep.subr.bf16.mxu0 %v2200_v58  ;;  %2067 = vmatprep.mubr.msk.bf16.mxu0 %vm407_vm3, %v2562_v19 }
  0x62   : > { %2071 = vmatprep.mubr.msk.bf16.mxu1 %vm407_vm3, %v1713_v35 }
  0x63   : > { %2082 = vmatpush3.bf16.msra.mxu1 %v2200_v58 }
  0x64   : > { %2066 = vmatpush3.bf16.msra.mxu0 %v2200_v58 }
  0x66   : > { %2072 = vmatmul.mubr.msk.bf16.vlgmr.msra.gmra.mrb[8].mxu1 %vm407_vm3, %v1826_v32 }
  0x67   : > { %2068 = vmatmul.mubr.msk.bf16.vlgmr.msra.gmra.mrb[0].mxu0 %vm407_vm3, %v2572_v28 }
 0x129   : > { %v1989_v38 = vpop.f32.mrb[0].mxu1 }
 0x12a   : > { %v864_v0 = vpop.f32.mrb[1].mxu1 }
 0x12b   : > { %v1990_v5 = vpop.f32.mrb[2].mxu1 }
 0x12c   : > { %v867_v27 = vpop.f32.mrb[3].mxu1 }
 0x131   : > { %v1993_v45 = vpop.f32.mrb[4].mxu1 }
 0x132   : > { %v2057_v46 = vpop.f32.mrb[4].mxu0  ;;  %v880_v47 = vpop.f32.mrb[5].mxu1 }
 0x133   : > { %v2087_v48 = vadd.f32 %v2057_v46, %v1993_v45  ;;  %v1382_v61 = vpop.f32.mrb[5].mxu0  ;;  %v1994_v14 = vpop.f32.mrb[6].mxu1 }
 0x134   : > { %v2089_v22 = vadd.f32 %v1382_v61, %v880_v47  ;;  %v2058_v49 = vpop.f32.mrb[6].mxu0  ;;  %v883_v50 = vpop.f32.mrb[7].mxu1 }
 0x135   : > { %v2091_v51 = vadd.f32 %v2058_v49, %v1994_v14  ;;  %v1385_v52 = vpop.f32.mrb[7].mxu0 }
 0x136   : > { %v2093_v53 = vadd.f32 %v1385_v52, %v883_v50 }
 0x139   : > { %v2073_v62 = vpop.f32.mrb[8].mxu1 }
 0x13a   : > { %v2069_v30 = vpop.f32.mrb[0].mxu0  ;;  %v2088_v63 = vadd.f32 %v2087_v48, %v2073_v62  ;;  %v1498_v1 = vpop.f32.mrb[9].mxu1 }
 0x13b   : > { %v2083_v4 = vadd.f32 %v2069_v30, %v1989_v38  ;;  %v1482_v6 = vpop.f32.mrb[1].mxu0  ;;  %v2090_v10 = vadd.f32 %v2089_v22, %v1498_v1  ;;  %v2074_v12 = vpop.f32.mrb[10].mxu1 }
 0x13c   : > { %v1534_v21 = vadd.f32 %v2088_v63, %v1835_v59  ;;  %v2084_v24 = vadd.f32 %v1482_v6, %v864_v0  ;;  %v2070_v25 = vpop.f32.mrb[2].mxu0  ;;  %v2092_v11 = vadd.f32 %v2091_v51, %v2074_v12  ;;  %v1501_v19 = vpop.f32.mrb[11].mxu1 }
 0x13d   : > { %v1530_v17 = vadd.f32 %v2083_v4, %v1835_v59  ;;  %v1532_v34 = vadd.f32 %v2090_v10, %v1835_v59  ;;  %v2085_v28 = vadd.f32 %v2070_v25, %v1990_v5  ;;  %v1485_v20 = vpop.f32.mrb[3].mxu0  ;;  %v2094_v33 = vadd.f32 %v2093_v53, %v1501_v19 }
 0x13e   : > { %v1558_v35 = vadd.f32 %v1854_v23, %v1534_v21  ;;  %v1528_v39 = vadd.f32 %v2084_v24, %v1835_v59  ;;  %v1535_v40 = vadd.f32 %v2092_v11, %v1835_v59  ;;  %v2086_v41 = vadd.f32 %v1485_v20, %v867_v27 }
 0x13f   : > { %v1554_v8 = vadd.f32 %v1846_v60, %v1530_v17  ;;  %v1556_v42 = vadd.f32 %v1850_v7, %v1532_v34  ;;  %v1531_v9 = vadd.f32 %v2085_v28, %v1835_v59  ;;  %v1533_v26 = vadd.f32 %v2094_v33, %v1835_v59 }
 0x140   : > { %v1566_v43 = vmax.f32 %v1558_v35, 0.0  ;;  %v1552_v29 = vadd.f32 %v1842_v44, %v1528_v39  ;;  %v1559_v31 = vadd.f32 %v1855_v3, %v1535_v40  ;;  %v1529_v57 = vadd.f32 %v2086_v41, %v1835_v59 }
 0x141   : > { %v1562_v13 = vmax.f32 %v1554_v8, 0.0  ;;  %v1564_v16 = vmax.f32 %v1556_v42, 0.0  ;;  %v1555_v58 = vadd.f32 %v1847_v2, %v1531_v9  ;;  %v1557_v36 = vadd.f32 %v1851_v18, %v1533_v26 }
 0x142   : > { %v1574_v32 = vpack.c.bf16 %v1566_v43, %v1566_v43  ;;  %v1560_v38 = vmax.f32 %v1552_v29, 0.0  ;;  %v1567_v0 = vmax.f32 %v1559_v31, 0.0  ;;  %v1553_v5 = vadd.f32 %v1843_v15, %v1529_v57 }
 0x143   : > { %v1570_v27 = vpack.c.bf16 %v1562_v13, %v1562_v13  ;;  %v1572_v45 = vpack.c.bf16 %v1564_v16, %v1564_v16  ;;  %v1563_v46 = vmax.f32 %v1555_v58, 0.0  ;;  %v1565_v47 = vmax.f32 %v1557_v36, 0.0 }
 0x144   : > { %1583 = vst.msk [vmem:[%s217_s29 + $0x18] sm:$0xf] %vm1576_vm7, %v1574_v32  ;;  %v1568_v48 = vpack.c.bf16 %v1560_v38, %v1560_v38  ;;  %v1575_v61 = vpack.c.bf16 %v1567_v0, %v1567_v0  ;;  %v1561_v14 = vmax.f32 %v1553_v5, 0.0 }
 0x145   : > { %1579 = vst.msk [vmem:[%s217_s29 + $0x8] sm:$0xf] %vm1576_vm7, %v1570_v27  ;;  %1581 = vst.msk [vmem:[%s217_s29 + $0x10] sm:$0xf] %vm1576_vm7, %v1572_v45  ;;  %v1571_v22 = vpack.c.bf16 %v1563_v46, %v1563_v46  ;;  %v1573_v49 = vpack.c.bf16 %v1565_v47, %v1565_v47 }
 0x146   : > { %1577 = vst.msk [vmem:[%s217_s29] sm:$0xf] %vm1576_vm7, %v1568_v48  ;;  %1584 = vst.msk [vmem:[%s217_s29 + $0x1c] sm:$0xf] %vm1576_vm7, %v1575_v61  ;;  %v1569_v50 = vpack.c.bf16 %v1561_v14, %v1561_v14 }
 0x147   : > { %1580 = vst.msk [vmem:[%s217_s29 + $0xc] sm:$0xf] %vm1576_vm7, %v1571_v22  ;;  %1582 = vst.msk [vmem:[%s217_s29 + $0x14] sm:$0xf] %vm1576_vm7, %v1573_v49 }
 0x148   : > { %1578 = vst.msk [vmem:[%s217_s29 + $0x4] sm:$0xf] %vm1576_vm7, %v1569_v50 }
 0x149 PF: > { %s14_s15 = sadd.s32 1, %s2207_s15  }
 0x14a   : > { %p11_p4 = scmp.ge.s32.totalorder %s14_s15, 4  }
 0x14c   :  { %13 = sbr.rel (!%p11_p4) target bundleno = 1 (0x1), region = 77 }

</bundles_post_ra>
